<compile_context>
chip_gen: v7x
topology: tpu7x:2x2x1
jax: 0.10.0
libtpu: 0.0.40
codegen_flags: <defaults>
</compile_context>

<pallas_src>
import math
from functools import partial

import jax
import jax.numpy as jnp
from jax.experimental import pallas as pl
from jax.experimental.pallas import tpu as pltpu

BN_EPS = 1e-5
LANE = 128


def _round_up(x, m):
    return ((x + m - 1) // m) * m


def _pick_tile_rows(H, W, max_pixels):
    """Largest divisor TH of H with TH*W <= max_pixels (falls back to 1)."""
    th = 1
    for d in range(1, H + 1):
        if H % d == 0 and d * W <= max_pixels:
            th = d
    return th


# ----------------------------- fused Pallas kernel -----------------------------

def _bottleneck_kernel(xc_ref, xt_ref, xb_ref, w1_ref, s1_ref, b1_ref,
                       w2_ref, s2_ref, b2_ref, o_ref, hpad_ref, *, add, TH, W):
    # xc_ref  : (1, TH, W, Cin) f32 center rows of the input
    # xt_ref  : (1, 1,  W, Cin) f32 row above the tile (clamped at image top)
    # xb_ref  : (1, 1,  W, Cin) f32 row below the tile (clamped at image bottom)
    # w1_ref  : (Cin, Cp)        1x1 conv weight (compute dtype)
    # s1/b1   : (1, Cp)          folded BN scale/bias for cv1 (f32)
    # w2_ref  : (9, Cp, C2p)     3x3 conv weight, one (Cp, C2p) slab per tap
    # s2/b2   : (1, C2p)         folded BN scale/bias for cv2 (f32)
    # o_ref   : (1, TH, W, C2p)  f32 output rows
    # hpad_ref: (TH+2, W+2, Cp)  VMEM scratch in compute dtype (zero-padded interm.)
    Cin = xc_ref.shape[3]
    Cp = hpad_ref.shape[2]
    C2p = o_ref.shape[3]
    cdt = hpad_ref.dtype
    i = pl.program_id(1)
    nrt = pl.num_programs(1)

    w1 = w1_ref[...]
    s1 = s1_ref[...]
    b1 = b1_ref[...]

    def cv1(rows_f32):
        # 1x1 conv (MXU, f32 accumulate) + folded BN + SiLU; single cast to cdt.
        h = jnp.dot(rows_f32.astype(w1.dtype), w1, preferred_element_type=jnp.float32)
        h = h * s1 + b1
        h = h * pl.reciprocal(1.0 + jnp.exp(-h), approx=True)   # SiLU on the EUP slot
        return h.astype(cdt)

    xm = xc_ref[0].reshape(TH * W, Cin)                 # f32; also the residual
    h_c = cv1(xm)                                       # (TH*W, Cp)
    h_t = cv1(xt_ref[0].reshape(W, Cin))                # (W, Cp) halo rows (recomputed)
    h_b = cv1(xb_ref[0].reshape(W, Cin))
    # At the image top/bottom the halo is conv zero-padding, not the clamped row.
    h_t = jnp.where(i > 0, h_t, jnp.zeros_like(h_t))
    h_b = jnp.where(i < nrt - 1, h_b, jnp.zeros_like(h_b))

    # Zero-padded intermediate lives only in VMEM.  Interior + halo rows are fully
    # written every step; only the 2 border columns need explicit zeroing.
    hpad_ref[1:TH + 1, 1:W + 1, :] = h_c.reshape(TH, W, Cp)
    hpad_ref[0:1, 1:W + 1, :] = h_t.reshape(1, W, Cp)
    hpad_ref[TH + 1:TH + 2, 1:W + 1, :] = h_b.reshape(1, W, Cp)
    hpad_ref[:, 0:1, :] = jnp.zeros((TH + 2, 1, Cp), cdt)
    hpad_ref[:, W + 1:W + 2, :] = jnp.zeros((TH + 2, 1, Cp), cdt)

    # cv2: 3x3 conv = 9 accumulating K=Cp dots over shifted views (no im2col scratch).
    acc = jnp.zeros((TH * W, C2p), jnp.float32)
    for dy in range(3):
        for dx in range(3):
            view = hpad_ref[dy:dy + TH, dx:dx + W, :].reshape(TH * W, Cp)
            acc = acc + jnp.dot(view, w2_ref[dy * 3 + dx],
                                preferred_element_type=jnp.float32)

    # Folded BN + SiLU epilogue (f32) + optional residual.
    y = acc * s2_ref[...] + b2_ref[...]
    y = y * pl.reciprocal(1.0 + jnp.exp(-y), approx=True)
    if add:
        y = y + xm            # wrapper guarantees Cin == C2p on the residual path
    o_ref[...] = y.reshape(1, TH, W, C2p).astype(o_ref.dtype)


# ----------------------------- pallas_call wrapper -----------------------------

def bottleneck_forward(x_nchw, kp, *, max_tile_pixels=2048):
    """Bottleneck forward.  x_nchw: (N, C1, H, W) float32 (PyTorch layout)."""
    N, C1, H, W = x_nchw.shape
    cin, Cp, C2p, C2, add = kp["cin"], kp["cp"], kp["c2p"], kp["c2"], kp["add"]
    cdt = kp["w2"].dtype

    # NCHW -> NHWC (PyTorch-compatible boundary).  Channel padding is only applied
    # when the residual shortcut needs lane-aligned channels; otherwise the kernel
    # reads the unpadded channels directly (full last-dim block).
    x = jnp.transpose(x_nchw, (0, 2, 3, 1)).astype(jnp.float32)
    if cin != C1:
        x = jnp.pad(x, ((0, 0), (0, 0), (0, 0), (0, cin - C1)))

    TH = _pick_tile_rows(H, W, max_tile_pixels)
    nrt = H // TH

    def center_map(n, i):
        return (n, i, 0, 0)

    def top_map(n, i):          # 1-row block -> block index == element row index
        return (n, jnp.maximum(i * TH - 1, 0), 0, 0)

    def bot_map(n, i):
        return (n, jnp.minimum((i + 1) * TH, H - 1), 0, 0)

    def const2(n, i):
        return (0, 0)

    def const3(n, i):
        return (0, 0, 0)

    out_p = pl.pallas_call(
        partial(_bottleneck_kernel, add=add, TH=TH, W=W),
        out_shape=jax.ShapeDtypeStruct((N, H, W, C2p), jnp.float32),
        grid=(N, nrt),
        in_specs=[
            pl.BlockSpec((1, TH, W, cin), center_map),
            pl.BlockSpec((1, 1, W, cin), top_map),
            pl.BlockSpec((1, 1, W, cin), bot_map),
            pl.BlockSpec((cin, Cp), const2),
            pl.BlockSpec((1, Cp), const2),
            pl.BlockSpec((1, Cp), const2),
            pl.BlockSpec((9, Cp, C2p), const3),
            pl.BlockSpec((1, C2p), const2),
            pl.BlockSpec((1, C2p), const2),
        ],
        out_specs=pl.BlockSpec((1, TH, W, C2p), center_map),
        scratch_shapes=[pltpu.VMEM((TH + 2, W + 2, Cp), cdt)],
        compiler_params=pltpu.CompilerParams(
            dimension_semantics=("parallel", "parallel"),   # batch + row tiles
            vmem_limit_bytes=64 * 1024 * 1024,
        ),
    )(x, x, x, kp["w1"], kp["s1"], kp["b1"], kp["w2"], kp["s2"], kp["b2"])

    out = out_p[..., :C2]
    return jnp.transpose(out, (0, 3, 1, 2))                 # back to NCHW


# ----------------------------- parameters -----------------------------

def init_bottleneck_params(key, c1, c2, shortcut=True, g=1, e=0.5):
    """Raw Conv2d(bias=False) + BatchNorm2d params (PyTorch layout, eval-mode stats)."""
    if g != 1:
        raise NotImplementedError("grouped conv (g > 1) is not supported by this kernel")
    c_ = int(c2 * e)
    k1, k2 = jax.random.split(key)

    def conv_bn(k, cin, cout, ksz):
        kw, kg, kb, km, kv = jax.random.split(k, 5)
        w = jax.random.normal(kw, (cout, cin, ksz, ksz), jnp.float32) / math.sqrt(cin * ksz * ksz)
        gamma = 1.0 + 0.1 * jax.random.normal(kg, (cout,), jnp.float32)
        beta = 0.1 * jax.random.normal(kb, (cout,), jnp.float32)
        mean = 0.1 * jax.random.normal(km, (cout,), jnp.float32)
        var = 0.5 + 0.5 * jnp.abs(jax.random.normal(kv, (cout,), jnp.float32))
        return dict(w=w, gamma=gamma, beta=beta, mean=mean, var=var)

    return {
        "cv1": conv_bn(k1, c1, c_, 1),
        "cv2": conv_bn(k2, c_, c2, 3),
        "c1": c1, "c2": c2, "c_": c_,
        "add": bool(shortcut and c1 == c2),
    }


def prepare_kernel_params(params, compute_dtype=jnp.float32):
    """Fold BN into scale/bias, lane-pad channels, lay the 3x3 weight out tap-major."""
    c1, c2, c_ = params["c1"], params["c2"], params["c_"]
    add = params["add"]
    Cp, C2p = _round_up(c_, LANE), _round_up(c2, LANE)
    # The residual path needs the input and the lane-padded output to share the same
    # channel width; otherwise the input is consumed unpadded (no wrapper pad pass).
    cin = _round_up(c1, LANE) if add else c1

    def fold_bn(p):
        scale = p["gamma"] / jnp.sqrt(p["var"] + BN_EPS)
        bias = p["beta"] - p["mean"] * scale
        return scale, bias

    # cv1: OIHW (c_, c1, 1, 1) -> (c1, c_) -> zero-padded (cin, Cp)
    w1 = params["cv1"]["w"][:, :, 0, 0].T
    w1 = jnp.zeros((cin, Cp), jnp.float32).at[:c1, :c_].set(w1)
    s1, b1 = fold_bn(params["cv1"])
    s1 = jnp.zeros((1, Cp), jnp.float32).at[0, :c_].set(s1)
    b1 = jnp.zeros((1, Cp), jnp.float32).at[0, :c_].set(b1)

    # cv2: OIHW (c2, c_, 3, 3) -> tap-major (9, c_, c2) -> zero-padded (9, Cp, C2p)
    w2 = jnp.transpose(params["cv2"]["w"], (2, 3, 1, 0)).reshape(9, c_, c2)
    w2 = jnp.zeros((9, Cp, C2p), jnp.float32).at[:, :c_, :c2].set(w2)
    s2, b2 = fold_bn(params["cv2"])
    s2 = jnp.zeros((1, C2p), jnp.float32).at[0, :c2].set(s2)
    b2 = jnp.zeros((1, C2p), jnp.float32).at[0, :c2].set(b2)

    return dict(
        w1=w1.astype(compute_dtype), s1=s1, b1=b1,
        w2=w2.astype(compute_dtype), s2=s2, b2=b2,
        cin=cin, cp=Cp, c2p=C2p, c2=c2, add=add,
    )


# ----------------------------- pure-JAX reference -----------------------------

def bottleneck_ref(x, params):
    def conv_bn_silu(x, p, k):
        pad = k // 2
        y = jax.lax.conv_general_dilated(
            x, p["w"], window_strides=(1, 1), padding=[(pad, pad), (pad, pad)],
            dimension_numbers=("NCHW", "OIHW", "NCHW"))
        scale = p["gamma"] / jnp.sqrt(p["var"] + BN_EPS)
        bias = p["beta"] - p["mean"] * scale
        y = y * scale[None, :, None, None] + bias[None, :, None, None]
        return y * jax.nn.sigmoid(y)

    y = conv_bn_silu(x, params["cv1"], 1)
    y = conv_bn_silu(y, params["cv2"], 3)
    return x + y if params["add"] else y


# ----------------------------- main -----------------------------

if __name__ == "__main__":
    key = jax.random.PRNGKey(0)
    k1, k2, kx1, kx2 = jax.random.split(key, 4)

    N, H, W = 2, 16, 16

    # Case 1: residual shortcut (c1 == c2), lane-padded input path, 2 row tiles.
    p1 = init_bottleneck_params(k1, 4, 4, shortcut=True, e=0.5)
    x1 = jax.random.normal(kx1, (N, 4, H, W), jnp.float32)          # NCHW, like PyTorch
    ref1 = jax.block_until_ready(bottleneck_ref(x1, p1))

    kp1 = prepare_kernel_params(p1, jnp.float32)                     # f32 MXU (v5e path)
    out1 = jax.block_until_ready(bottleneck_forward(x1, kp1, max_tile_pixels=128))
    assert out1.shape == (N, 4, H, W) and out1.dtype == jnp.float32
    assert jnp.allclose(out1, ref1, atol=5e-2, rtol=5e-2), \
        float(jnp.max(jnp.abs(out1 - ref1)))

    kp1_bf = prepare_kernel_params(p1, jnp.bfloat16)                 # bf16 MXU (v6e/v7x)
    out1b = jax.block_until_ready(bottleneck_forward(x1, kp1_bf, max_tile_pixels=128))
    assert out1b.shape == (N, 4, H, W)
    assert jnp.allclose(out1b, ref1, atol=2e-1, rtol=2e-1), \
        float(jnp.max(jnp.abs(out1b - ref1)))

    # Case 2: no residual (c1 != c2), unpadded-channel input path, single row tile.
    p2 = init_bottleneck_params(k2, 4, 8, shortcut=True, e=0.5)      # add=False (c1 != c2)
    x2 = jax.random.normal(kx2, (N, 4, H, W), jnp.float32)
    ref2 = jax.block_until_ready(bottleneck_ref(x2, p2))
    kp2 = prepare_kernel_params(p2, jnp.float32)
    out2 = jax.block_until_ready(bottleneck_forward(x2, kp2))
    assert out2.shape == (N, 8, H, W)
    assert jnp.allclose(out2, ref2, atol=5e-2, rtol=5e-2), \
        float(jnp.max(jnp.abs(out2 - ref2)))

    print("KERNEL_OK")
</pallas_src>

<mosaic_0001>
module attributes {stable_mosaic.version = 11 : i64} {
  func.func @_bottleneck_kernel(%arg0: i32, %arg1: i32, %arg2: memref<1x8x16x128xf32, #tpu.memory_space<vmem>>, %arg3: memref<1x1x16x128xf32, #tpu.memory_space<vmem>>, %arg4: memref<1x1x16x128xf32, #tpu.memory_space<vmem>>, %arg5: memref<128x128xf32, #tpu.memory_space<vmem>>, %arg6: memref<1x128xf32, #tpu.memory_space<vmem>>, %arg7: memref<1x128xf32, #tpu.memory_space<vmem>>, %arg8: memref<9x128x128xf32, #tpu.memory_space<vmem>>, %arg9: memref<1x128xf32, #tpu.memory_space<vmem>>, %arg10: memref<1x128xf32, #tpu.memory_space<vmem>>, %arg11: memref<1x8x16x128xf32, #tpu.memory_space<vmem>>, %arg12: memref<10x18x128xf32, #tpu.memory_space<vmem>>) attributes {dimension_semantics = [#tpu.dimension_semantics<parallel>, #tpu.dimension_semantics<parallel>], iteration_bounds = array<i64: 2, 2>, scalar_prefetch = 0 : i64, scratch_operands = 1 : i64, tpu.core_type = #tpu.core_type<tc>, window_params = [{transform_indices = @transform_0, window_bounds = array<i64: 1, 8, 16, 128>}, {transform_indices = @transform_1, window_bounds = array<i64: 1, 1, 16, 128>}, {transform_indices = @transform_2, window_bounds = array<i64: 1, 1, 16, 128>}, {pipeline_mode = #tpu.pipeline_mode<synchronous>, transform_indices = @transform_3, window_bounds = array<i64: 128, 128>}, {pipeline_mode = #tpu.pipeline_mode<synchronous>, transform_indices = @transform_4, window_bounds = array<i64: 1, 128>}, {pipeline_mode = #tpu.pipeline_mode<synchronous>, transform_indices = @transform_5, window_bounds = array<i64: 1, 128>}, {pipeline_mode = #tpu.pipeline_mode<synchronous>, transform_indices = @transform_6, window_bounds = array<i64: 9, 128, 128>}, {pipeline_mode = #tpu.pipeline_mode<synchronous>, transform_indices = @transform_7, window_bounds = array<i64: 1, 128>}, {pipeline_mode = #tpu.pipeline_mode<synchronous>, transform_indices = @transform_8, window_bounds = array<i64: 1, 128>}, {transform_indices = @transform_9, window_bounds = array<i64: 1, 8, 16, 128>}]} {
    %c0 = arith.constant 0 : index
    %c0_0 = arith.constant 0 : index
    %0 = vector.load %arg5[%c0, %c0_0] : memref<128x128xf32, #tpu.memory_space<vmem>>, vector<128x128xf32>
    %c0_1 = arith.constant 0 : index
    %c0_2 = arith.constant 0 : index
    %1 = vector.load %arg6[%c0_1, %c0_2] : memref<1x128xf32, #tpu.memory_space<vmem>>, vector<1x128xf32>
    %c0_3 = arith.constant 0 : index
    %c0_4 = arith.constant 0 : index
    %2 = vector.load %arg7[%c0_3, %c0_4] : memref<1x128xf32, #tpu.memory_space<vmem>>, vector<1x128xf32>
    %c0_5 = arith.constant 0 : index
    %c0_6 = arith.constant 0 : index
    %c0_7 = arith.constant 0 : index
    %c0_8 = arith.constant 0 : index
    %3 = vector.load %arg2[%c0_5, %c0_6, %c0_7, %c0_8] : memref<1x8x16x128xf32, #tpu.memory_space<vmem>>, vector<1x8x16x128xf32>
    %4 = vector.shape_cast %3 : vector<1x8x16x128xf32> to vector<8x16x128xf32>
    %5 = vector.shape_cast %4 : vector<8x16x128xf32> to vector<128x128xf32>
    %cst = arith.constant dense<0.000000e+00> : vector<128x128xf32>
    %6 = tpu.matmul %5, %0, %cst {dimension_numbers = #tpu.dot_dimension_numbers<[1], [0], [0], [1], [0, 0, 1, 1], [], []>} : vector<128x128xf32>, vector<128x128xf32>, vector<128x128xf32> -> vector<128x128xf32>
    %7 = vector.broadcast %1 : vector<1x128xf32> to vector<128x128xf32>
    %8 = arith.mulf %6, %7 : vector<128x128xf32>
    %9 = vector.broadcast %2 : vector<1x128xf32> to vector<128x128xf32>
    %10 = arith.addf %8, %9 : vector<128x128xf32>
    %cst_9 = arith.constant 0.000000e+00 : f32
    %11 = vector.broadcast %cst_9 : f32 to vector<128x128xf32>
    %12 = arith.subf %11, %10 : vector<128x128xf32>
    %13 = math.exp %12 : vector<128x128xf32>
    %cst_10 = arith.constant 1.000000e+00 : f32
    %14 = vector.broadcast %cst_10 : f32 to vector<128x128xf32>
    %15 = arith.addf %14, %13 : vector<128x128xf32>
    %16 = tpu.reciprocal %15 {approx = true} : vector<128x128xf32> -> vector<128x128xf32>
    %17 = arith.mulf %10, %16 : vector<128x128xf32>
    %c0_11 = arith.constant 0 : index
    %c0_12 = arith.constant 0 : index
    %c0_13 = arith.constant 0 : index
    %c0_14 = arith.constant 0 : index
    %18 = vector.load %arg3[%c0_11, %c0_12, %c0_13, %c0_14] : memref<1x1x16x128xf32, #tpu.memory_space<vmem>>, vector<1x1x16x128xf32>
    %19 = vector.shape_cast %18 : vector<1x1x16x128xf32> to vector<1x16x128xf32>
    %20 = vector.shape_cast %19 : vector<1x16x128xf32> to vector<16x128xf32>
    %cst_15 = arith.constant dense<0.000000e+00> : vector<16x128xf32>
    %21 = tpu.matmul %20, %0, %cst_15 {dimension_numbers = #tpu.dot_dimension_numbers<[1], [0], [0], [1], [0, 0, 1, 1], [], []>} : vector<16x128xf32>, vector<128x128xf32>, vector<16x128xf32> -> vector<16x128xf32>
    %22 = vector.broadcast %1 : vector<1x128xf32> to vector<16x128xf32>
    %23 = arith.mulf %21, %22 : vector<16x128xf32>
    %24 = vector.broadcast %2 : vector<1x128xf32> to vector<16x128xf32>
    %25 = arith.addf %23, %24 : vector<16x128xf32>
    %cst_16 = arith.constant 0.000000e+00 : f32
    %26 = vector.broadcast %cst_16 : f32 to vector<16x128xf32>
    %27 = arith.subf %26, %25 : vector<16x128xf32>
    %28 = math.exp %27 : vector<16x128xf32>
    %cst_17 = arith.constant 1.000000e+00 : f32
    %29 = vector.broadcast %cst_17 : f32 to vector<16x128xf32>
    %30 = arith.addf %29, %28 : vector<16x128xf32>
    %31 = tpu.reciprocal %30 {approx = true} : vector<16x128xf32> -> vector<16x128xf32>
    %32 = arith.mulf %25, %31 : vector<16x128xf32>
    %c0_18 = arith.constant 0 : index
    %c0_19 = arith.constant 0 : index
    %c0_20 = arith.constant 0 : index
    %c0_21 = arith.constant 0 : index
    %33 = vector.load %arg4[%c0_18, %c0_19, %c0_20, %c0_21] : memref<1x1x16x128xf32, #tpu.memory_space<vmem>>, vector<1x1x16x128xf32>
    %34 = vector.shape_cast %33 : vector<1x1x16x128xf32> to vector<1x16x128xf32>
    %35 = vector.shape_cast %34 : vector<1x16x128xf32> to vector<16x128xf32>
    %cst_22 = arith.constant dense<0.000000e+00> : vector<16x128xf32>
    %36 = tpu.matmul %35, %0, %cst_22 {dimension_numbers = #tpu.dot_dimension_numbers<[1], [0], [0], [1], [0, 0, 1, 1], [], []>} : vector<16x128xf32>, vector<128x128xf32>, vector<16x128xf32> -> vector<16x128xf32>
    %37 = vector.broadcast %1 : vector<1x128xf32> to vector<16x128xf32>
    %38 = arith.mulf %36, %37 : vector<16x128xf32>
    %39 = vector.broadcast %2 : vector<1x128xf32> to vector<16x128xf32>
    %40 = arith.addf %38, %39 : vector<16x128xf32>
    %cst_23 = arith.constant 0.000000e+00 : f32
    %41 = vector.broadcast %cst_23 : f32 to vector<16x128xf32>
    %42 = arith.subf %41, %40 : vector<16x128xf32>
    %43 = math.exp %42 : vector<16x128xf32>
    %cst_24 = arith.constant 1.000000e+00 : f32
    %44 = vector.broadcast %cst_24 : f32 to vector<16x128xf32>
    %45 = arith.addf %44, %43 : vector<16x128xf32>
    %46 = tpu.reciprocal %45 {approx = true} : vector<16x128xf32> -> vector<16x128xf32>
    %47 = arith.mulf %40, %46 : vector<16x128xf32>
    %c0_i32 = arith.constant 0 : i32
    %48 = arith.cmpi sgt, %arg1, %c0_i32 : i32
    %cst_25 = arith.constant 0.000000e+00 : f32
    %49 = vector.broadcast %cst_25 : f32 to vector<16x128xf32>
    %50 = arith.select %48, %32, %49 : vector<16x128xf32>
    %c1_i32 = arith.constant 1 : i32
    %51 = arith.cmpi slt, %arg1, %c1_i32 : i32
    %cst_26 = arith.constant 0.000000e+00 : f32
    %52 = vector.broadcast %cst_26 : f32 to vector<16x128xf32>
    %53 = arith.select %51, %47, %52 : vector<16x128xf32>
    %54 = vector.shape_cast %17 : vector<128x128xf32> to vector<8x16x128xf32>
    %c1 = arith.constant 1 : index
    %c1_27 = arith.constant 1 : index
    %c0_28 = arith.constant 0 : index
    %55 = vector.load %arg12[%c1, %c1_27, %c0_28] : memref<10x18x128xf32, #tpu.memory_space<vmem>>, vector<8x16x128xf32>
    tpu.vector_store %arg12[%c1, %c1_27, %c0_28], %54 {strides = array<i32>} : memref<10x18x128xf32, #tpu.memory_space<vmem>>, vector<8x16x128xf32>,
    %56 = vector.shape_cast %50 : vector<16x128xf32> to vector<1x16x128xf32>
    %c0_29 = arith.constant 0 : index
    %c1_30 = arith.constant 1 : index
    %c0_31 = arith.constant 0 : index
    %57 = vector.load %arg12[%c0_29, %c1_30, %c0_31] : memref<10x18x128xf32, #tpu.memory_space<vmem>>, vector<1x16x128xf32>
    tpu.vector_store %arg12[%c0_29, %c1_30, %c0_31], %56 {strides = array<i32>} : memref<10x18x128xf32, #tpu.memory_space<vmem>>, vector<1x16x128xf32>,
    %58 = vector.shape_cast %53 : vector<16x128xf32> to vector<1x16x128xf32>
    %c9 = arith.constant 9 : index
    %c1_32 = arith.constant 1 : index
    %c0_33 = arith.constant 0 : index
    %59 = vector.load %arg12[%c9, %c1_32, %c0_33] : memref<10x18x128xf32, #tpu.memory_space<vmem>>, vector<1x16x128xf32>
    tpu.vector_store %arg12[%c9, %c1_32, %c0_33], %58 {strides = array<i32>} : memref<10x18x128xf32, #tpu.memory_space<vmem>>, vector<1x16x128xf32>,
    %cst_34 = arith.constant 0.000000e+00 : f32
    %60 = vector.broadcast %cst_34 : f32 to vector<10x1x128xf32>
    %c0_35 = arith.constant 0 : index
    %c0_36 = arith.constant 0 : index
    %c0_37 = arith.constant 0 : index
    %61 = vector.load %arg12[%c0_35, %c0_36, %c0_37] : memref<10x18x128xf32, #tpu.memory_space<vmem>>, vector<10x1x128xf32>
    tpu.vector_store %arg12[%c0_35, %c0_36, %c0_37], %60 {strides = array<i32>} : memref<10x18x128xf32, #tpu.memory_space<vmem>>, vector<10x1x128xf32>,
    %cst_38 = arith.constant 0.000000e+00 : f32
    %62 = vector.broadcast %cst_38 : f32 to vector<10x1x128xf32>
    %c0_39 = arith.constant 0 : index
    %c17 = arith.constant 17 : index
    %c0_40 = arith.constant 0 : index
    %63 = vector.load %arg12[%c0_39, %c17, %c0_40] : memref<10x18x128xf32, #tpu.memory_space<vmem>>, vector<10x1x128xf32>
    tpu.vector_store %arg12[%c0_39, %c17, %c0_40], %62 {strides = array<i32>} : memref<10x18x128xf32, #tpu.memory_space<vmem>>, vector<10x1x128xf32>,
    %cst_41 = arith.constant 0.000000e+00 : f32
    %64 = vector.broadcast %cst_41 : f32 to vector<128x128xf32>
    %c0_42 = arith.constant 0 : index
    %c0_43 = arith.constant 0 : index
    %c0_44 = arith.constant 0 : index
    %65 = vector.load %arg12[%c0_42, %c0_43, %c0_44] : memref<10x18x128xf32, #tpu.memory_space<vmem>>, vector<8x16x128xf32>
    %66 = vector.shape_cast %65 : vector<8x16x128xf32> to vector<128x128xf32>
    %c0_45 = arith.constant 0 : index
    %c0_46 = arith.constant 0 : index
    %c0_47 = arith.constant 0 : index
    %67 = vector.load %arg8[%c0_45, %c0_46, %c0_47] : memref<9x128x128xf32, #tpu.memory_space<vmem>>, vector<1x128x128xf32>
    %68 = vector.shape_cast %67 : vector<1x128x128xf32> to vector<128x128xf32>
    %cst_48 = arith.constant dense<0.000000e+00> : vector<128x128xf32>
    %69 = tpu.matmul %66, %68, %cst_48 {dimension_numbers = #tpu.dot_dimension_numbers<[1], [0], [0], [1], [0, 0, 1, 1], [], []>} : vector<128x128xf32>, vector<128x128xf32>, vector<128x128xf32> -> vector<128x128xf32>
    %70 = arith.addf %64, %69 : vector<128x128xf32>
    %c0_49 = arith.constant 0 : index
    %c1_50 = arith.constant 1 : index
    %c0_51 = arith.constant 0 : index
    %71 = vector.load %arg12[%c0_49, %c1_50, %c0_51] : memref<10x18x128xf32, #tpu.memory_space<vmem>>, vector<8x16x128xf32>
    %72 = vector.shape_cast %71 : vector<8x16x128xf32> to vector<128x128xf32>
    %c1_52 = arith.constant 1 : index
    %c0_53 = arith.constant 0 : index
    %c0_54 = arith.constant 0 : index
    %73 = vector.load %arg8[%c1_52, %c0_53, %c0_54] : memref<9x128x128xf32, #tpu.memory_space<vmem>>, vector<1x128x128xf32>
    %74 = vector.shape_cast %73 : vector<1x128x128xf32> to vector<128x128xf32>
    %cst_55 = arith.constant dense<0.000000e+00> : vector<128x128xf32>
    %75 = tpu.matmul %72, %74, %cst_55 {dimension_numbers = #tpu.dot_dimension_numbers<[1], [0], [0], [1], [0, 0, 1, 1], [], []>} : vector<128x128xf32>, vector<128x128xf32>, vector<128x128xf32> -> vector<128x128xf32>
    %76 = arith.addf %70, %75 : vector<128x128xf32>
    %c0_56 = arith.constant 0 : index
    %c2 = arith.constant 2 : index
    %c0_57 = arith.constant 0 : index
    %77 = vector.load %arg12[%c0_56, %c2, %c0_57] : memref<10x18x128xf32, #tpu.memory_space<vmem>>, vector<8x16x128xf32>
    %78 = vector.shape_cast %77 : vector<8x16x128xf32> to vector<128x128xf32>
    %c2_58 = arith.constant 2 : index
    %c0_59 = arith.constant 0 : index
    %c0_60 = arith.constant 0 : index
    %79 = vector.load %arg8[%c2_58, %c0_59, %c0_60] : memref<9x128x128xf32, #tpu.memory_space<vmem>>, vector<1x128x128xf32>
    %80 = vector.shape_cast %79 : vector<1x128x128xf32> to vector<128x128xf32>
    %cst_61 = arith.constant dense<0.000000e+00> : vector<128x128xf32>
    %81 = tpu.matmul %78, %80, %cst_61 {dimension_numbers = #tpu.dot_dimension_numbers<[1], [0], [0], [1], [0, 0, 1, 1], [], []>} : vector<128x128xf32>, vector<128x128xf32>, vector<128x128xf32> -> vector<128x128xf32>
    %82 = arith.addf %76, %81 : vector<128x128xf32>
    %c1_62 = arith.constant 1 : index
    %c0_63 = arith.constant 0 : index
    %c0_64 = arith.constant 0 : index
    %83 = vector.load %arg12[%c1_62, %c0_63, %c0_64] : memref<10x18x128xf32, #tpu.memory_space<vmem>>, vector<8x16x128xf32>
    %84 = vector.shape_cast %83 : vector<8x16x128xf32> to vector<128x128xf32>
    %c3 = arith.constant 3 : index
    %c0_65 = arith.constant 0 : index
    %c0_66 = arith.constant 0 : index
    %85 = vector.load %arg8[%c3, %c0_65, %c0_66] : memref<9x128x128xf32, #tpu.memory_space<vmem>>, vector<1x128x128xf32>
    %86 = vector.shape_cast %85 : vector<1x128x128xf32> to vector<128x128xf32>
    %cst_67 = arith.constant dense<0.000000e+00> : vector<128x128xf32>
    %87 = tpu.matmul %84, %86, %cst_67 {dimension_numbers = #tpu.dot_dimension_numbers<[1], [0], [0], [1], [0, 0, 1, 1], [], []>} : vector<128x128xf32>, vector<128x128xf32>, vector<128x128xf32> -> vector<128x128xf32>
    %88 = arith.addf %82, %87 : vector<128x128xf32>
    %c1_68 = arith.constant 1 : index
    %c1_69 = arith.constant 1 : index
    %c0_70 = arith.constant 0 : index
    %89 = vector.load %arg12[%c1_68, %c1_69, %c0_70] : memref<10x18x128xf32, #tpu.memory_space<vmem>>, vector<8x16x128xf32>
    %90 = vector.shape_cast %89 : vector<8x16x128xf32> to vector<128x128xf32>
    %c4 = arith.constant 4 : index
    %c0_71 = arith.constant 0 : index
    %c0_72 = arith.constant 0 : index
    %91 = vector.load %arg8[%c4, %c0_71, %c0_72] : memref<9x128x128xf32, #tpu.memory_space<vmem>>, vector<1x128x128xf32>
    %92 = vector.shape_cast %91 : vector<1x128x128xf32> to vector<128x128xf32>
    %cst_73 = arith.constant dense<0.000000e+00> : vector<128x128xf32>
    %93 = tpu.matmul %90, %92, %cst_73 {dimension_numbers = #tpu.dot_dimension_numbers<[1], [0], [0], [1], [0, 0, 1, 1], [], []>} : vector<128x128xf32>, vector<128x128xf32>, vector<128x128xf32> -> vector<128x128xf32>
    %94 = arith.addf %88, %93 : vector<128x128xf32>
    %c1_74 = arith.constant 1 : index
    %c2_75 = arith.constant 2 : index
    %c0_76 = arith.constant 0 : index
    %95 = vector.load %arg12[%c1_74, %c2_75, %c0_76] : memref<10x18x128xf32, #tpu.memory_space<vmem>>, vector<8x16x128xf32>
    %96 = vector.shape_cast %95 : vector<8x16x128xf32> to vector<128x128xf32>
    %c5 = arith.constant 5 : index
    %c0_77 = arith.constant 0 : index
    %c0_78 = arith.constant 0 : index
    %97 = vector.load %arg8[%c5, %c0_77, %c0_78] : memref<9x128x128xf32, #tpu.memory_space<vmem>>, vector<1x128x128xf32>
    %98 = vector.shape_cast %97 : vector<1x128x128xf32> to vector<128x128xf32>
    %cst_79 = arith.constant dense<0.000000e+00> : vector<128x128xf32>
    %99 = tpu.matmul %96, %98, %cst_79 {dimension_numbers = #tpu.dot_dimension_numbers<[1], [0], [0], [1], [0, 0, 1, 1], [], []>} : vector<128x128xf32>, vector<128x128xf32>, vector<128x128xf32> -> vector<128x128xf32>
    %100 = arith.addf %94, %99 : vector<128x128xf32>
    %c2_80 = arith.constant 2 : index
    %c0_81 = arith.constant 0 : index
    %c0_82 = arith.constant 0 : index
    %101 = vector.load %arg12[%c2_80, %c0_81, %c0_82] : memref<10x18x128xf32, #tpu.memory_space<vmem>>, vector<8x16x128xf32>
    %102 = vector.shape_cast %101 : vector<8x16x128xf32> to vector<128x128xf32>
    %c6 = arith.constant 6 : index
    %c0_83 = arith.constant 0 : index
    %c0_84 = arith.constant 0 : index
    %103 = vector.load %arg8[%c6, %c0_83, %c0_84] : memref<9x128x128xf32, #tpu.memory_space<vmem>>, vector<1x128x128xf32>
    %104 = vector.shape_cast %103 : vector<1x128x128xf32> to vector<128x128xf32>
    %cst_85 = arith.constant dense<0.000000e+00> : vector<128x128xf32>
    %105 = tpu.matmul %102, %104, %cst_85 {dimension_numbers = #tpu.dot_dimension_numbers<[1], [0], [0], [1], [0, 0, 1, 1], [], []>} : vector<128x128xf32>, vector<128x128xf32>, vector<128x128xf32> -> vector<128x128xf32>
    %106 = arith.addf %100, %105 : vector<128x128xf32>
    %c2_86 = arith.constant 2 : index
    %c1_87 = arith.constant 1 : index
    %c0_88 = arith.constant 0 : index
    %107 = vector.load %arg12[%c2_86, %c1_87, %c0_88] : memref<10x18x128xf32, #tpu.memory_space<vmem>>, vector<8x16x128xf32>
    %108 = vector.shape_cast %107 : vector<8x16x128xf32> to vector<128x128xf32>
    %c7 = arith.constant 7 : index
    %c0_89 = arith.constant 0 : index
    %c0_90 = arith.constant 0 : index
    %109 = vector.load %arg8[%c7, %c0_89, %c0_90] : memref<9x128x128xf32, #tpu.memory_space<vmem>>, vector<1x128x128xf32>
    %110 = vector.shape_cast %109 : vector<1x128x128xf32> to vector<128x128xf32>
    %cst_91 = arith.constant dense<0.000000e+00> : vector<128x128xf32>
    %111 = tpu.matmul %108, %110, %cst_91 {dimension_numbers = #tpu.dot_dimension_numbers<[1], [0], [0], [1], [0, 0, 1, 1], [], []>} : vector<128x128xf32>, vector<128x128xf32>, vector<128x128xf32> -> vector<128x128xf32>
    %112 = arith.addf %106, %111 : vector<128x128xf32>
    %c2_92 = arith.constant 2 : index
    %c2_93 = arith.constant 2 : index
    %c0_94 = arith.constant 0 : index
    %113 = vector.load %arg12[%c2_92, %c2_93, %c0_94] : memref<10x18x128xf32, #tpu.memory_space<vmem>>, vector<8x16x128xf32>
    %114 = vector.shape_cast %113 : vector<8x16x128xf32> to vector<128x128xf32>
    %c8 = arith.constant 8 : index
    %c0_95 = arith.constant 0 : index
    %c0_96 = arith.constant 0 : index
    %115 = vector.load %arg8[%c8, %c0_95, %c0_96] : memref<9x128x128xf32, #tpu.memory_space<vmem>>, vector<1x128x128xf32>
    %116 = vector.shape_cast %115 : vector<1x128x128xf32> to vector<128x128xf32>
    %cst_97 = arith.constant dense<0.000000e+00> : vector<128x128xf32>
    %117 = tpu.matmul %114, %116, %cst_97 {dimension_numbers = #tpu.dot_dimension_numbers<[1], [0], [0], [1], [0, 0, 1, 1], [], []>} : vector<128x128xf32>, vector<128x128xf32>, vector<128x128xf32> -> vector<128x128xf32>
    %118 = arith.addf %112, %117 : vector<128x128xf32>
    %c0_98 = arith.constant 0 : index
    %c0_99 = arith.constant 0 : index
    %119 = vector.load %arg9[%c0_98, %c0_99] : memref<1x128xf32, #tpu.memory_space<vmem>>, vector<1x128xf32>
    %120 = vector.broadcast %119 : vector<1x128xf32> to vector<128x128xf32>
    %121 = arith.mulf %118, %120 : vector<128x128xf32>
    %c0_100 = arith.constant 0 : index
    %c0_101 = arith.constant 0 : index
    %122 = vector.load %arg10[%c0_100, %c0_101] : memref<1x128xf32, #tpu.memory_space<vmem>>, vector<1x128xf32>
    %123 = vector.broadcast %122 : vector<1x128xf32> to vector<128x128xf32>
    %124 = arith.addf %121, %123 : vector<128x128xf32>
    %cst_102 = arith.constant 0.000000e+00 : f32
    %125 = vector.broadcast %cst_102 : f32 to vector<128x128xf32>
    %126 = arith.subf %125, %124 : vector<128x128xf32>
    %127 = math.exp %126 : vector<128x128xf32>
    %cst_103 = arith.constant 1.000000e+00 : f32
    %128 = vector.broadcast %cst_103 : f32 to vector<128x128xf32>
    %129 = arith.addf %128, %127 : vector<128x128xf32>
    %130 = tpu.reciprocal %129 {approx = true} : vector<128x128xf32> -> vector<128x128xf32>
    %131 = arith.mulf %124, %130 : vector<128x128xf32>
    %132 = arith.addf %131, %5 : vector<128x128xf32>
    %133 = vector.shape_cast %132 : vector<128x128xf32> to vector<1x8x16x128xf32>
    %c0_104 = arith.constant 0 : index
    %c0_105 = arith.constant 0 : index
    %c0_106 = arith.constant 0 : index
    %c0_107 = arith.constant 0 : index
    %134 = vector.load %arg11[%c0_104, %c0_105, %c0_106, %c0_107] : memref<1x8x16x128xf32, #tpu.memory_space<vmem>>, vector<1x8x16x128xf32>
    tpu.vector_store %arg11[%c0_104, %c0_105, %c0_106, %c0_107], %133 {strides = array<i32>} : memref<1x8x16x128xf32, #tpu.memory_space<vmem>>, vector<1x8x16x128xf32>,
    return
  }
  func.func @transform_0(%arg0: i32, %arg1: i32) -> (i32, i32, i32, i32) {
    %c0_i32 = arith.constant 0 : i32
    %c0_i32_0 = arith.constant 0 : i32
    %c0_i32_1 = arith.constant 0 : i32
    return %arg0, %arg1, %c0_i32, %c0_i32_0 : i32, i32, i32, i32
  }
  func.func @transform_1(%arg0: i32, %arg1: i32) -> (i32, i32, i32, i32) {
    %c8_i32 = arith.constant 8 : i32
    %0 = arith.muli %arg1, %c8_i32 : i32
    %c1_i32 = arith.constant 1 : i32
    %1 = arith.subi %0, %c1_i32 : i32
    %c0_i32 = arith.constant 0 : i32
    %2 = arith.maxsi %1, %c0_i32 : i32
    %c0_i32_0 = arith.constant 0 : i32
    %c0_i32_1 = arith.constant 0 : i32
    %c0_i32_2 = arith.constant 0 : i32
    return %arg0, %2, %c0_i32_0, %c0_i32_1 : i32, i32, i32, i32
  }
  func.func @transform_2(%arg0: i32, %arg1: i32) -> (i32, i32, i32, i32) {
    %c1_i32 = arith.constant 1 : i32
    %0 = arith.addi %arg1, %c1_i32 : i32
    %c8_i32 = arith.constant 8 : i32
    %1 = arith.muli %0, %c8_i32 : i32
    %c15_i32 = arith.constant 15 : i32
    %2 = arith.minsi %1, %c15_i32 : i32
    %c0_i32 = arith.constant 0 : i32
    %c0_i32_0 = arith.constant 0 : i32
    %c0_i32_1 = arith.constant 0 : i32
    return %arg0, %2, %c0_i32, %c0_i32_0 : i32, i32, i32, i32
  }
  func.func @transform_3(%arg0: i32, %arg1: i32) -> (i32, i32) {
    %c0_i32 = arith.constant 0 : i32
    %c0_i32_0 = arith.constant 0 : i32
    %c0_i32_1 = arith.constant 0 : i32
    return %c0_i32, %c0_i32_0 : i32, i32
  }
  func.func @transform_4(%arg0: i32, %arg1: i32) -> (i32, i32) {
    %c0_i32 = arith.constant 0 : i32
    %c0_i32_0 = arith.constant 0 : i32
    %c0_i32_1 = arith.constant 0 : i32
    return %c0_i32, %c0_i32_0 : i32, i32
  }
  func.func @transform_5(%arg0: i32, %arg1: i32) -> (i32, i32) {
    %c0_i32 = arith.constant 0 : i32
    %c0_i32_0 = arith.constant 0 : i32
    %c0_i32_1 = arith.constant 0 : i32
    return %c0_i32, %c0_i32_0 : i32, i32
  }
  func.func @transform_6(%arg0: i32, %arg1: i32) -> (i32, i32, i32) {
    %c0_i32 = arith.constant 0 : i32
    %c0_i32_0 = arith.constant 0 : i32
    %c0_i32_1 = arith.constant 0 : i32
    %c0_i32_2 = arith.constant 0 : i32
    return %c0_i32, %c0_i32_0, %c0_i32_1 : i32, i32, i32
  }
  func.func @transform_7(%arg0: i32, %arg1: i32) -> (i32, i32) {
    %c0_i32 = arith.constant 0 : i32
    %c0_i32_0 = arith.constant 0 : i32
    %c0_i32_1 = arith.constant 0 : i32
    return %c0_i32, %c0_i32_0 : i32, i32
  }
  func.func @transform_8(%arg0: i32, %arg1: i32) -> (i32, i32) {
    %c0_i32 = arith.constant 0 : i32
    %c0_i32_0 = arith.constant 0 : i32
    %c0_i32_1 = arith.constant 0 : i32
    return %c0_i32, %c0_i32_0 : i32, i32
  }
  func.func @transform_9(%arg0: i32, %arg1: i32) -> (i32, i32, i32, i32) {
    %c0_i32 = arith.constant 0 : i32
    %c0_i32_0 = arith.constant 0 : i32
    %c0_i32_1 = arith.constant 0 : i32
    return %arg0, %arg1, %c0_i32, %c0_i32_0 : i32, i32, i32, i32
  }
}

</mosaic_0001>

<bundles_post_ra>
// kernel: tpu_custom_call.1
= control target key start
LH: loop header
LB: loop body
LE: loop exit
PB: predicated region body
PF: predicated region fallthrough
CT: control target
= control target key end

     0   :  { %s6900_s0 = inlined_call_operand.hbm [shape: f32[2,16,16,128], index: 0, kind: input, shape index: {}]   ;;  %s6901_s1 = inlined_call_operand.hbm [shape: f32[2,16,16,128], index: 1, kind: input, shape index: {}]   ;;  %s6902_s2 = inlined_call_operand.hbm [shape: f32[2,16,16,128], index: 2, kind: input, shape index: {}]   ;;  %s6903_s3 = inlined_call_operand.hbm [shape: f32[128,128], index: 3, kind: input, shape index: {}]   ;;  %s6904_s4 = inlined_call_operand.hbm [shape: f32[1,128], index: 4, kind: input, shape index: {}]   ;;  %s6905_s5 = inlined_call_operand.hbm [shape: f32[1,128], index: 5, kind: input, shape index: {}]   ;;  %s6906_s6 = inlined_call_operand.hbm [shape: f32[9,128,128], index: 6, kind: input, shape index: {}]   ;;  %s6907_s7 = inlined_call_operand.hbm [shape: f32[1,128], index: 7, kind: input, shape index: {}]   ;;  %s6908_s8 = inlined_call_operand.hbm [shape: f32[1,128], index: 8, kind: input, shape index: {}]   ;;  %s6909_s9 = inlined_call_operand.hbm [shape: f32[2,16,16,128], index: 9, kind: output, shape index: {}]  }
   0x1   :  { %6938 = sst [smem:[#allocation39_spill]] %s6900_s0 }
   0x2   :  { %6939 = sst [smem:[#allocation40_spill]] %s6901_s1 }
   0x3   :  { %6940 = sst [smem:[#allocation41_spill]] %s6902_s2 }
   0x4   :  { %6941 = sst [smem:[#allocation42_spill]] %s6903_s3 }
   0x5   :  { %6942 = sst [smem:[#allocation43_spill]] %s6904_s4 }
   0x6   :  { %6943 = sst [smem:[#allocation44_spill]] %s6905_s5 }
   0x7   :  { %6944 = sst [smem:[#allocation45_spill]] %s6906_s6 }
   0x8   :  { %6945 = sst [smem:[#allocation46_spill]] %s6907_s7 }
   0x9   :  { %6946 = sst [smem:[#allocation47_spill]] %s6908_s8 }
   0xa   :  { %6947 = sst [smem:[#allocation48_spill]] %s6909_s9 }
   0xb   :  { %14 = vsyncpa [#allocation4], 0 }
   0xc   :  { %16 = vsyncpa [#allocation4 + $0x1], 0 }
   0xd   :  { %17 = vsyncpa [#allocation7], 0 }
   0xe   :  { %19 = vsyncpa [#allocation7 + $0x1], 0 }
   0xf   :  { %20 = vsyncpa [#allocation10], 0 }
  0x10   :  { %21 = vsyncpa [#allocation13], 0 }
  0x11   :  { %22 = vsyncpa [#allocation16], 0 }
  0x12   :  { %23 = vsyncpa [#allocation5], 0 }
  0x13   :  { %25 = vsyncpa [#allocation5 + $0x1], 0  ;;  %s5645_s30 = smov 0   ;;  %s5647_s10 = smov 0  }
  0x14   :  { %s5649_s11 = smov 0   ;;  %s5651_s12 = smov 0  }
  0x15   :  { %s5653_s13 = smov 0   ;;  %s5655_s14 = smov 0  }
  0x16   :  { %s5657_s15 = smov 0   ;;  %s5659_s16 = smov 0  }
  0x17   :  { %s5661_s17 = smov 0   ;;  %s5663_s18 = smov 0  }
  0x18   :  { %s5665_s19 = smov 0   ;;  %s5667_s20 = smov 0  }
  0x19   :  { %s5669_s21 = smov 0   ;;  %s5671_s22 = smov 0  }
  0x1a LB: > { %6948 = sst [smem:[#allocation26_spill]] %s5526_s30  ;;  %s5716_s23 = sadd.s32 4294967295, %s5578_s22   ;;  %s5578_s22 = sphi %s5671_s22, %s31_s22   ;;  %s5574_s21 = sphi %s5669_s21, %s7043_s21   ;;  %s5570_s20 = sphi %s5667_s20, %s7042_s20   ;;  %s5566_s19 = sphi %s5665_s19, %s7041_s19   ;;  %s5562_s18 = sphi %s5663_s18, %s7040_s18   ;;  %s5558_s17 = sphi %s5661_s17, %s7039_s17   ;;  %s5554_s16 = sphi %s5659_s16, %s7038_s16   ;;  %s5550_s15 = sphi %s5657_s15, %s7032_s15   ;;  %s5546_s14 = sphi %s5655_s14, %s7037_s14   ;;  %s5542_s13 = sphi %s5653_s13, %s7036_s13   ;;  %s5538_s12 = sphi %s5651_s12, %s7031_s12   ;;  %s5534_s11 = sphi %s5649_s11, %s7035_s11   ;;  %s5530_s10 = sphi %s5647_s10, %s7030_s10   ;;  %s5526_s30 = sphi %s5645_s30, %s7029_s30  }
  0x1b   : > { %6949 = sst [smem:[#allocation27_spill]] %s5530_s10  ;;  %p3236_p0 = scmp.ge.s32.totalorder %s5578_s22, 1 }
  0x1c   : > { %6950 = sst [smem:[#allocation28_spill]] %s5534_s11  ;;  %p6918_p1 = scmp.eq.s32.totalorder %s5716_s23, 0 }
  0x1d   : > { %6951 = sst [smem:[#allocation29_spill]] %s5542_s13  ;;  %p302_p2 = scmp.lt.s32.totalorder %s5578_s22, 5 }
  0x1e   : > { %6952 = sst [smem:[#allocation30_spill]] %s5550_s15  ;;  %s5580_s25 = smov [#allocation9]  }
  0x1f   : > { %6953 = sst [smem:[#allocation31_spill]] %s5554_s16  ;;  %p5721_p3 = pnand %p3236_p0, %p302_p2 }
  0x20   : > { %6954 = sst [smem:[#allocation32_spill]] %s5562_s18  ;;  %s314_s26 = sshll.u32 %s5580_s25, 4  ;;  %s5725_s26 = int_to_ptr.vmem [resolvable:$true] %s314_s26 }
  0x21   : > { %6955 = sst [smem:[#allocation33_spill]] %s5566_s19  ;;  %p4820_p4 = pneg %p5721_p3 }
  0x22   : > { %s6956_s24 = scalar_select %p5721_p3, 1, 0 }
  0x23   : > { %p5731_p5 = pnand %p4820_p4, %p6918_p1  ;;  %s5581_s28 = smov [#allocation12]  }
  0x24   : > { %6957 = sst [smem:[#allocation34_spill]] %s6956_s24  ;;  %s339_s29 = sshll.u32 %s5581_s28, 4  ;;  %s5735_s29 = int_to_ptr.vmem [resolvable:$true] %s339_s29 }
  0x25   : > { %s6958_s27 = scalar_select %p5731_p5, 1, 0 }
  0x26   : > { %s5582_s9 = smov [#allocation15]   ;;  %s6959_s3 = sld [smem:[#allocation42_spill]] }
  0x27   : > { %s5737_s19 = sshll.u32 %s5582_s9, 4  ;;  %p5747_p7 = pneg %p5731_p5  ;;  %s364_s19 = int_to_ptr.vmem [resolvable:$true] %s5737_s19 }
  0x2c   : > { %s5154_s25 = scalar_lea.hbm %s6959_s3, 2048 }
  0x2d   : > { %p5155_p6 = scmp.ne.s32.totalorder %s6959_s3, %s5154_s25  ;;  %p5161_p10 = scmp.lt.u32.totalorder %s5154_s25, %s6959_s3 }
  0x2f   : > { %p5157_p8 = pnand %p5747_p7, %p5155_p6 }
  0x31   : > { %p5158_p9 = pneg %p5157_p8 }
  0x33   : > { %p5163_p11 = pnand %p5161_p10, %p5158_p9 }
  0x35   : > { %5166 = shalt.err (!%p5163_p11)
}
  0x36   : > { %s5167_s2 = scalar_lea.vmem %s5725_s26, 2048  ;;  %p5175_p2 = scmp.lt.s32.totalorder %s5725_s26, %s5725_s26 }
  0x37   : > { %p5168_p12 = scmp.ne.s32.totalorder %s5725_s26, %s5167_s2  ;;  %p5176_p4 = scmp.lt.s32.totalorder %s5167_s2, %s5167_s2 }
  0x39   : > { %p5170_p13 = pnand %p5168_p12, %p5747_p7  ;;  %p5177_p6 = por %p5176_p4, %p5175_p2 }
  0x3b   : > { %p5171_p0 = pneg %p5170_p13 }
  0x3d   : > { %p5178_p8 = pnand %p5177_p6, %p5171_p0 }
  0x3f   : > { %5181 = shalt.err (!%p5178_p8)
}
  0x40   : > { %s6920_s30 = smov 128   ;;  %s6922_s18 = smov 8  }
  0x41   : > { %4823 = dma.hbm_to_vmem [thread:$0]  (!%p5731_p5), %s6959_s3, 2048, %s5725_s26, [#allocation10], %s6920_s30, %s6920_s30, %s6922_s18  }
  0x42   : > { %s6961_s5 = sld [smem:[#allocation44_spill]] }
  0x48   : > { %s5182_s2 = scalar_lea.hbm %s6961_s5, 16 }
  0x49   : > { %p5183_p9 = scmp.ne.s32.totalorder %s6961_s5, %s5182_s2  ;;  %p5189_p12 = scmp.lt.u32.totalorder %s5182_s2, %s6961_s5 }
  0x4b   : > { %p5185_p10 = pnand %p5183_p9, %p5747_p7 }
  0x4d   : > { %p5186_p11 = pneg %p5185_p10 }
  0x4f   : > { %p5191_p13 = pnand %p5189_p12, %p5186_p11 }
  0x51   : > { %5194 = shalt.err (!%p5191_p13)
}
  0x52   : > { %s5195_s26 = scalar_lea.vmem %s5735_s29, 16  ;;  %s5202_s0 = scalar_lea.vmem %s5735_s29, 32 }
  0x53   : > { %p5196_p0 = scmp.ne.s32.totalorder %s5735_s29, %s5195_s26  ;;  %p5203_p6 = scmp.lt.s32.totalorder %s5735_s29, %s5735_s29 }
  0x54   : > { %p5204_p8 = scmp.lt.s32.totalorder %s5202_s0, %s5195_s26 }
  0x55   : > { %p5198_p2 = pnand %p5196_p0, %p5747_p7 }
  0x56   : > { %p5205_p9 = por %p5204_p8, %p5203_p6 }
  0x57   : > { %p5199_p4 = pneg %p5198_p2 }
  0x59   : > { %p5206_p10 = pnand %p5205_p9, %p5199_p4 }
  0x5b   : > { %5209 = shalt.err (!%p5206_p10)
}
  0x5c   : > { %4829 = dma.hbm_to_vmem [thread:$0]  (!%p5731_p5), %s6961_s5, 16, %s5735_s29, [#allocation13]  }
  0x5d   : > { %s6962_s7 = sld [smem:[#allocation46_spill]] }
  0x63   : > { %s5210_s25 = scalar_lea.hbm %s6962_s7, 16 }
  0x64   : > { %p5211_p11 = scmp.ne.s32.totalorder %s6962_s7, %s5210_s25  ;;  %p5217_p0 = scmp.lt.u32.totalorder %s5210_s25, %s6962_s7 }
  0x66   : > { %p5213_p12 = pnand %p5211_p11, %p5747_p7 }
  0x68   : > { %p5214_p13 = pneg %p5213_p12 }
  0x6a   : > { %p5219_p2 = pnand %p5217_p0, %p5214_p13 }
  0x6c   : > { %5222 = shalt.err (!%p5219_p2)
}
  0x6d   : > { %s5223_s0 = scalar_lea.vmem %s364_s19, 16  ;;  %s5230_s29 = scalar_lea.vmem %s364_s19, 32 }
  0x6e   : > { %p5224_p4 = scmp.ne.s32.totalorder %s364_s19, %s5223_s0  ;;  %p5231_p9 = scmp.lt.s32.totalorder %s364_s19, %s364_s19 }
  0x6f   : > { %p5232_p10 = scmp.lt.s32.totalorder %s5230_s29, %s5223_s0 }
  0x70   : > { %p5226_p6 = pnand %p5224_p4, %p5747_p7 }
  0x71   : > { %p5233_p1 = por %p5232_p10, %p5231_p9 }
  0x72   : > { %p5227_p8 = pneg %p5226_p6 }
  0x74   : > { %p5234_p3 = pnand %p5233_p1, %p5227_p8 }
  0x76   : > { %5237 = shalt.err (!%p5234_p3)
}
  0x77   : > { %4835 = dma.hbm_to_vmem [thread:$0]  (!%p5731_p5), %s6962_s7, 16, %s364_s19, [#allocation16]  }
  0x78   : > { %s40_s16 = sadd.s32 1, %s5570_s20  ;;  %s43_s24 = sadd.s32 1, %s5574_s21 }
  0x79   : > { %p41_p11 = scmp.ge.s32.totalorder %s40_s16, 2  ;;  %p6931_p12 = scmp.eq.s32.totalorder %s5578_s22, 0 }
  0x7a   : > { %s3230_s25 = sshll.u32 %s5570_s20, 3  ;;  %s88_s2 = sadd.s32 1, %s5546_s14 }
  0x7b   : > { %s7045_s16 = smov (%p41_p11, %s40_s16), 0  ;;  %s7047_s24 = smov (!%p41_p11, %s43_s24), %s5574_s21 }
  0x7c   : > { %6963 = sst [smem:[#allocation35_spill]] %s7045_s16  ;;  %s48_s28 = ssub.s32 %s5570_s20, %s7045_s16 }
  0x7d   : > { %s3231_s9 = sadd.s32 4294967295, %s3230_s25  ;;  %p45_p1 = scmp.ge.s32.totalorder %s7047_s24, 2 }
  0x7e   : > { %p77_p3 = scmp.gt.s32.totalorder %s3231_s9, 0  ;;  %s3232_s19 = sshll.u32 %s7045_s16, 3 }
  0x7f   : > { %s7049_s24 = smov (%p45_p1, %s7047_s24), 0  ;;  %s3233_s0 = sadd.s32 4294967295, %s3232_s19 }
  0x80   : > { %6964 = sst [smem:[#allocation36_spill]] %s7049_s24  ;;  %s7051_s9 = smov (!%p77_p3, %s3231_s9), 0 }
  0x81   : > { %s5829_s26 = ssub.s32 %s5574_s21, %s7049_s24  ;;  %p81_p13 = scmp.gt.s32.totalorder %s3233_s0, 0 }
  0x82   : > { %6965 = sst [smem:[#allocation37_spill]] %s5829_s26  ;;  %s5832_s29 = sor.u32 %s48_s28, %s5829_s26 }
  0x83   : > { %p95_p2 = scmp.ne.s32.totalorder %s5546_s14, %s5542_s13  ;;  %s7053_s0 = smov (!%p81_p13, %s3233_s0), 0 }
  0x84   : > { %p101_p6 = scmp.ne.s32.totalorder %s5542_s13, %s5538_s12  ;;  %s84_s15 = ssub.s32 %s7051_s9, %s7053_s0 }
  0x85   : > { %p5839_p4 = por %p95_p2, %p6931_p12  ;;  %s5845_s30 = sadd.s32 8, %s3230_s25 }
  0x86   : > { %s85_s28 = sor.u32 %s84_s15, %s5829_s26  ;;  %p6967_p8 = scmp.eq.s32.totalorder %s5716_s23, 0 }
  0x87   : > { %p86_p10 = scmp.eq.s32.totalorder %s85_s28, 0  ;;  %s5855_s3 = sadd.s32 8, %s3232_s19 }
  0x88   : > { %p5850_p9 = por %p101_p6, %p6967_p8  ;;  %p6930_p1 = scmp.lt.s32.totalorder %s5578_s22, 4 }
  0x89   : > { %s5859_s5 = scalar_select %p86_p10, %s5546_s14, %s88_s2  }
  0x8a   : > { %s6968_s18 = scalar_select %p5850_p9, 1, 0 }
  0x8b   : > { %s5863_s12 = sshll.u32 %s5574_s21, 5  ;;  %s409_s25 = sand.u32 1, %s5578_s22  }
  0x8c   : > { %6969 = sst [smem:[#allocation38_spill]] %s6968_s18  ;;  %s411_s0 = sand.u32 1, %s5546_s14  }
  0x8d   : > { %s3249_s15 = sshll.u32 %s411_s0, 4  ;;  %s3252_s7 = sshll.u32 %s7051_s9, 1 }
  0x8e   : > { %s423_s24 = sadd.s32 %s3252_s7, %s5863_s12  ;;  %s413_s16 = scalar_lea.vmem [#allocation6], %s3249_s15 }
  0x8f   : > { %s426_s28 = sshll.u32 %s413_s16, 4  ;;  %s3254_s18 = sshll.u32 %s423_s24, 7  ;;  %s5868_s28 = int_to_ptr.vmem [resolvable:$true] %s426_s28 }
  0x90   : > { %s6970_s1 = sld [smem:[#allocation40_spill]]  ;;  %p5879_p13 = pnand %p6930_p1, %p5839_p4 }
  0x91   : > { %s5585_s7 = smov [#allocation11]   ;;  %s5885_s24 = scalar_lea.sflag [#allocation7], %s409_s25 }
  0x92   : > { %s5883_s16 = sshll.u32 %s5585_s7, 4  ;;  %p5240_p6 = pneg %p5879_p13  ;;  %s329_s16 = int_to_ptr.vmem [resolvable:$true] %s5883_s16 }
  0x96   : > { %s5873_s26 = scalar_lea.hbm %s6970_s1, %s3254_s18  ;;  %s5243_s11 = scalar_lea.hbm %s6970_s1, 8192 }
  0x97   : > { %s5238_s13 = scalar_lea.hbm %s5873_s26, 256  ;;  %p5244_p4 = scmp.lt.u32.totalorder %s5873_s26, %s6970_s1 }
  0x98   : > { %p5239_p2 = scmp.ne.s32.totalorder %s5873_s26, %s5238_s13  ;;  %p5245_p3 = scmp.lt.u32.totalorder %s5243_s11, %s5238_s13 }
  0x99   : > { %p5247_p1 = scmp.lt.u32.totalorder %s5238_s13, %s5873_s26 }
  0x9a   : > { %p5241_p8 = pnand %p5240_p6, %p5239_p2  ;;  %p5246_p11 = por %p5245_p3, %p5244_p4 }
  0x9c   : > { %p5242_p10 = pneg %p5241_p8  ;;  %p5248_p12 = por %p5247_p1, %p5246_p11 }
  0x9e   : > { %p5249_p0 = pnand %p5248_p12, %p5242_p10 }
  0xa0   : > { %5252 = shalt.err (!%p5249_p0)
}
  0xa1   : > { %s5253_s25 = scalar_lea.vmem %s5868_s28, 256  ;;  %s5586_s19 = smov [#allocation6]  }
  0xa2   : > { %p5254_p2 = scmp.ne.s32.totalorder %s5868_s28, %s5253_s25  ;;  %s5258_s7 = sshll.u32 %s5586_s19, 4  ;;  %s5259_s7 = int_to_ptr.vmem [resolvable:$false] %s5258_s7 }
  0xa3   : > { %s5260_s18 = scalar_lea.vmem %s5259_s7, 512  ;;  %p5261_p5 = scmp.lt.s32.totalorder %s5868_s28, %s5259_s7 }
  0xa4   : > { %p5256_p8 = pnand %p5254_p2, %p5240_p6  ;;  %p5262_p3 = scmp.lt.s32.totalorder %s5260_s18, %s5253_s25 }
  0xa6   : > { %p5257_p9 = pneg %p5256_p8  ;;  %p5263_p4 = por %p5262_p3, %p5261_p5 }
  0xa8   : > { %p5264_p11 = pnand %p5263_p4, %p5257_p9 }
  0xaa   : > { %5267 = shalt.err (!%p5264_p11)
}
  0xab   : > { %s6972_s13 = smov 8   ;;  %s6973_s9 = smov 128  }
  0xac   : > { %4845 = dma.hbm_to_vmem [thread:$0]  (!%p5879_p13), %s5873_s26, 256, %s5868_s28, %s5885_s24, %s6973_s9, %s6973_s9, %s6972_s13  }
  0xad   : > { %s5587_s11 = smov [#allocation14]   ;;  %s6974_s4 = sld [smem:[#allocation43_spill]] }
  0xae   : > { %s349_s0 = sshll.u32 %s5587_s11, 4  ;;  %s350_s0 = int_to_ptr.vmem [resolvable:$true] %s349_s0 }
  0xb3   : > { %s5268_s25 = scalar_lea.hbm %s6974_s4, 16 }
  0xb4   : > { %p5269_p5 = scmp.ne.s32.totalorder %s6974_s4, %s5268_s25  ;;  %p5275_p9 = scmp.lt.u32.totalorder %s5268_s25, %s6974_s4 }
  0xb6   : > { %p5271_p12 = pnand %p5269_p5, %p5747_p7 }
  0xb8   : > { %p5272_p0 = pneg %p5271_p12 }
  0xba   : > { %p5277_p1 = pnand %p5275_p9, %p5272_p0 }
  0xbc   : > { %5280 = shalt.err (!%p5277_p1)
}
  0xbd   : > { %s5281_s26 = scalar_lea.vmem %s329_s16, 16  ;;  %s5288_s28 = scalar_lea.vmem %s329_s16, 32 }
  0xbe   : > { %p5282_p13 = scmp.ne.s32.totalorder %s329_s16, %s5281_s26  ;;  %p5289_p2 = scmp.lt.s32.totalorder %s329_s16, %s329_s16 }
  0xbf   : > { %p5290_p8 = scmp.lt.s32.totalorder %s5288_s28, %s5281_s26 }
  0xc0   : > { %p5284_p6 = pnand %p5282_p13, %p5747_p7 }
  0xc1   : > { %p5291_p3 = por %p5290_p8, %p5289_p2 }
  0xc2   : > { %p5285_p10 = pneg %p5284_p6 }
  0xc4   : > { %p5292_p4 = pnand %p5291_p3, %p5285_p10 }
  0xc6   : > { %5295 = shalt.err (!%p5292_p4)
}
  0xc7   : > { %p6975_p11 = scmp.ne.s32.totalorder %s6958_s27, 0  ;;  %s6976_s6 = sld [smem:[#allocation45_spill]] }
  0xc9   : > { %4826 = dma.hbm_to_vmem [thread:$0]  (!%p6975_p11), %s6974_s4, 16, %s329_s16, [#allocation10]  }
  0xcd   : > { %s5296_s25 = scalar_lea.hbm %s6976_s6, 18432 }
  0xce   : > { %p5297_p5 = scmp.ne.s32.totalorder %s6976_s6, %s5296_s25  ;;  %p5303_p9 = scmp.lt.u32.totalorder %s5296_s25, %s6976_s6 }
  0xd0   : > { %p5299_p12 = pnand %p5297_p5, %p5747_p7 }
  0xd2   : > { %p5300_p0 = pneg %p5299_p12 }
  0xd4   : > { %p5305_p1 = pnand %p5303_p9, %p5300_p0 }
  0xd6   : > { %5308 = shalt.err (!%p5305_p1)
}
  0xd7   : > { %s5309_s28 = scalar_lea.vmem %s350_s0, 18432  ;;  %p5317_p2 = scmp.lt.s32.totalorder %s350_s0, %s350_s0 }
  0xd8   : > { %p5310_p13 = scmp.ne.s32.totalorder %s350_s0, %s5309_s28  ;;  %p5318_p8 = scmp.lt.s32.totalorder %s5309_s28, %s5309_s28 }
  0xda   : > { %p5312_p6 = pnand %p5310_p13, %p5747_p7  ;;  %p5319_p3 = por %p5318_p8, %p5317_p2 }
  0xdc   : > { %p5313_p10 = pneg %p5312_p6 }
  0xde   : > { %p5320_p4 = pnand %p5319_p3, %p5313_p10 }
  0xe0   : > { %5323 = shalt.err (!%p5320_p4)
}
  0xe1   : > { %4832 = dma.hbm_to_vmem [thread:$0]  (!%p6975_p11), %s6976_s6, 18432, %s350_s0, [#allocation13], %s6973_s9, %s6973_s9, %s6972_s13  }
  0xe2   : > { %s5588_s15 = smov [#allocation17]   ;;  %s6977_s8 = sld [smem:[#allocation47_spill]] }
  0xe3   : > { %s374_s1 = sshll.u32 %s5588_s15, 4  ;;  %s375_s1 = int_to_ptr.vmem [resolvable:$true] %s374_s1 }
  0xe8   : > { %s5324_s7 = scalar_lea.hbm %s6977_s8, 16 }
  0xe9   : > { %p5325_p5 = scmp.ne.s32.totalorder %s6977_s8, %s5324_s7  ;;  %p5331_p9 = scmp.lt.u32.totalorder %s5324_s7, %s6977_s8 }
  0xeb   : > { %p5327_p12 = pnand %p5325_p5, %p5747_p7 }
  0xed   : > { %p5328_p0 = pneg %p5327_p12 }
  0xef   : > { %p5333_p1 = pnand %p5331_p9, %p5328_p0 }
  0xf1   : > { %5336 = shalt.err (!%p5333_p1)
}
  0xf2   : > { %s5337_s0 = scalar_lea.vmem %s375_s1, 16  ;;  %s5344_s16 = scalar_lea.vmem %s375_s1, 32 }
  0xf3   : > { %p5338_p13 = scmp.ne.s32.totalorder %s375_s1, %s5337_s0  ;;  %p5345_p2 = scmp.lt.s32.totalorder %s375_s1, %s375_s1 }
  0xf4   : > { %p5346_p8 = scmp.lt.s32.totalorder %s5344_s16, %s5337_s0 }
  0xf5   : > { %p5340_p6 = pnand %p5338_p13, %p5747_p7 }
  0xf6   : > { %p5347_p3 = por %p5346_p8, %p5345_p2 }
  0xf7   : > { %p5341_p10 = pneg %p5340_p6 }
  0xf9   : > { %p5348_p4 = pnand %p5347_p3, %p5341_p10 }
  0xfb   : > { %5351 = shalt.err (!%p5348_p4)
}
  0xfc   : > { %s6978_s19 = sld [smem:[#allocation31_spill]]  ;;  %s6979_s10 = sld [smem:[#allocation30_spill]] }
  0xfd   : > { %4838 = dma.hbm_to_vmem [thread:$0]  (!%p6975_p11), %s6977_s8, 16, %s375_s1, [#allocation16]  }
  0xfe   : > { %s3229_s25 = sadd.s32 4294967294, %s5578_s22   ;;  %s52_s27 = sadd.s32 1, %s5558_s17 }
  0xff   : > { %p6980_p7 = scmp.eq.s32.totalorder %s5832_s29, 0  ;;  %p289_p0 = scmp.eq.s32.totalorder %s5716_s23, 3 }
 0x100   : > { %p295_p9 = scmp.eq.s32.totalorder %s3229_s25, 3  ;;  %p6981_p1 = scmp.eq.s32.totalorder %s5578_s22, 0 }
 0x101   : > { %s5979_s7 = scalar_select %p6980_p7, %s5558_s17, %s52_s27  }
 0x102   : > { %p59_p5 = scmp.ne.s32.totalorder %s5558_s17, %s6978_s19  ;;  %p65_p12 = scmp.ne.s32.totalorder %s6978_s19, %s6979_s10 }
 0x103   : > { %p6983_p6 = scmp.eq.s32.totalorder %s5716_s23, 0  ;;  %s385_s26 = sand.u32 1, %s5558_s17  }
 0x104   : > { %p5988_p13 = por %p6981_p1, %p59_p5  ;;  %p5998_p11 = por %p289_p0, %p59_p5 }
 0x105   : > { %p5994_p10 = por %p6983_p6, %p65_p12  ;;  %p6002_p2 = por %p295_p9, %p65_p12 }
 0x106   : > { %s6985_s29 = scalar_select %p5998_p11, 1, 0 }
 0x107   : > { %s6986_s1 = scalar_select %p6002_p2, 1, 0 }
 0x108   : > { %s3286_s28 = sshll.u32 %s5570_s20, 4  ;;  %s3244_s0 = sshll.u32 %s385_s26, 7 }
 0x109   : > { %s396_s16 = sadd.s32 %s3286_s28, %s5863_s12  ;;  %s389_s15 = scalar_lea.vmem [#allocation3], %s3244_s0 }
 0x10a   : > { %s3248_s11 = sshll.u32 %s396_s16, 7  ;;  %s399_s19 = sshll.u32 %s389_s15, 4  ;;  %s6014_s19 = int_to_ptr.vmem [resolvable:$true] %s399_s19 }
 0x10b   : > { %s6987_s27 = sld [smem:[#allocation39_spill]]  ;;  %p6988_p8 = scmp.lt.s32.totalorder %s5578_s22, 4 }
 0x10c   : > { %s6024_s28 = scalar_lea.sflag [#allocation4], %s385_s26 }
 0x10d   : > { %p6020_p3 = pnand %p6988_p8, %p5988_p13 }
 0x10f   : > { %p5354_p7 = pneg %p6020_p3 }
 0x111   : > { %s6012_s4 = scalar_lea.hbm %s6987_s27, %s3248_s11  ;;  %s5357_s18 = scalar_lea.hbm %s6987_s27, 8192 }
 0x112   : > { %s5352_s0 = scalar_lea.hbm %s6012_s4, 2048  ;;  %p5358_p0 = scmp.lt.u32.totalorder %s6012_s4, %s6987_s27 }
 0x113   : > { %p5353_p4 = scmp.ne.s32.totalorder %s6012_s4, %s5352_s0  ;;  %p5359_p9 = scmp.lt.u32.totalorder %s5357_s18, %s5352_s0 }
 0x114   : > { %p5361_p13 = scmp.lt.u32.totalorder %s5352_s0, %s6012_s4 }
 0x115   : > { %p5355_p5 = pnand %p5354_p7, %p5353_p4  ;;  %p5360_p1 = por %p5359_p9, %p5358_p0 }
 0x117   : > { %p5356_p12 = pneg %p5355_p5  ;;  %p5362_p6 = por %p5361_p13, %p5360_p1 }
 0x119   : > { %p5363_p8 = pnand %p5362_p6, %p5356_p12 }
 0x11b   : > { %5366 = shalt.err (!%p5363_p8)
}
 0x11c   : > { %s5367_s26 = scalar_lea.vmem %s6014_s19, 2048  ;;  %s5589_s25 = smov [#allocation3]  }
 0x11d   : > { %p5368_p4 = scmp.ne.s32.totalorder %s6014_s19, %s5367_s26  ;;  %s5372_s16 = sshll.u32 %s5589_s25, 4  ;;  %s5373_s16 = int_to_ptr.vmem [resolvable:$false] %s5372_s16 }
 0x11e   : > { %s5374_s11 = scalar_lea.vmem %s5373_s16, 4096  ;;  %p5375_p11 = scmp.lt.s32.totalorder %s6014_s19, %s5373_s16 }
 0x11f   : > { %p5370_p5 = pnand %p5368_p4, %p5354_p7  ;;  %p5376_p0 = scmp.lt.s32.totalorder %s5374_s11, %s5367_s26 }
 0x121   : > { %p5371_p2 = pneg %p5370_p5  ;;  %p5377_p9 = por %p5376_p0, %p5375_p11 }
 0x123   : > { %p5378_p1 = pnand %p5377_p9, %p5371_p2 }
 0x125   : > { %5381 = shalt.err (!%p5378_p1)
}
 0x126   : > { %s6990_s0 = sld [smem:[#allocation28_spill]]  ;;  %s6991_s18 = sld [smem:[#allocation27_spill]] }
 0x127   : > { %s6992_s15 = sld [smem:[#allocation26_spill]]  ;;  %s6993_s10 = sld [smem:[#allocation37_spill]] }
 0x128   : > { %4842 = dma.hbm_to_vmem [thread:$0]  (!%p6020_p3), %s6012_s4, 2048, %s6014_s19, %s6024_s28, %s6973_s9, %s6973_s9, %s6972_s13  }
 0x129   : > { %p6994_p11 = scmp.lt.s32.totalorder %s5845_s30, 15  ;;  %p6995_p2 = scmp.lt.s32.totalorder %s5855_s3, 15 }
 0x12a   : > { %p6996_p13 = scmp.eq.s32.totalorder %s5578_s22, 0  ;;  %p6998_p4 = scmp.eq.s32.totalorder %s5716_s23, 0 }
 0x12b   : > { %s7055_s30 = smov (!%p6994_p11, %s5845_s30), 15  ;;  %s7057_s3 = smov (!%p6995_p2, %s5855_s3), 15 }
 0x12c   : > { %s124_s6 = sadd.s32 1, %s6990_s0  ;;  %p131_p7 = scmp.ne.s32.totalorder %s6990_s0, %s6991_s18 }
 0x12d   : > { %s120_s26 = ssub.s32 %s7055_s30, %s7057_s3  ;;  %p137_p12 = scmp.ne.s32.totalorder %s6991_s18, %s6992_s15 }
 0x12e   : > { %s121_s25 = sor.u32 %s120_s26, %s6993_s10  ;;  %p6069_p6 = por %p131_p7, %p6996_p13 }
 0x12f   : > { %p122_p8 = scmp.eq.s32.totalorder %s121_s25, 0  ;;  %p6075_p5 = por %p137_p12, %p6998_p4 }
 0x130   : > { %s438_s19 = sand.u32 1, %s6990_s0   ;;  %s3257_s28 = sshll.u32 %s7055_s30, 1 }
 0x131   : > { %s6999_s4 = scalar_select %p6075_p5, 1, 0 }
 0x132   : > { %s7059_s0 = smov (!%p122_p8, %s6990_s0), %s124_s6  ;;  %s3255_s3 = sshll.u32 %s438_s19, 4 }
 0x133   : > { %s450_s11 = sadd.s32 %s3257_s28, %s5863_s12  ;;  %s7000_s26 = sld [smem:[#allocation41_spill]] }
 0x134   : > { %s3259_s18 = sshll.u32 %s450_s11, 7  ;;  %s440_s25 = scalar_lea.vmem [#allocation8], %s3255_s3 }
 0x135   : > { %s453_s27 = sshll.u32 %s440_s25, 4  ;;  %p7001_p3 = scmp.lt.s32.totalorder %s5578_s22, 4  ;;  %s6089_s27 = int_to_ptr.vmem [resolvable:$true] %s453_s27 }
 0x137   : > { %p6095_p0 = pnand %p7001_p3, %p6069_p6 }
 0x139   : > { %s6087_s8 = scalar_lea.hbm %s7000_s26, %s3259_s18  ;;  %p5384_p1 = pneg %p6095_p0 }
 0x13a   : > { %s5382_s12 = scalar_lea.hbm %s6087_s8, 256  ;;  %s5387_s28 = scalar_lea.hbm %s7000_s26, 8192 }
 0x13b   : > { %p5383_p9 = scmp.ne.s32.totalorder %s6087_s8, %s5382_s12  ;;  %p5388_p7 = scmp.lt.u32.totalorder %s6087_s8, %s7000_s26 }
 0x13c   : > { %p5389_p12 = scmp.lt.u32.totalorder %s5387_s28, %s5382_s12  ;;  %p5391_p6 = scmp.lt.u32.totalorder %s5382_s12, %s6087_s8 }
 0x13d   : > { %p5385_p11 = pnand %p5384_p1, %p5383_p9 }
 0x13e   : > { %p5390_p13 = por %p5389_p12, %p5388_p7 }
 0x13f   : > { %p5386_p2 = pneg %p5385_p11 }
 0x140   : > { %p5392_p8 = por %p5391_p6, %p5390_p13 }
 0x142   : > { %p5393_p4 = pnand %p5392_p8, %p5386_p2 }
 0x144   : > { %5396 = shalt.err (!%p5393_p4)
}
 0x145   : > { %s5397_s11 = scalar_lea.vmem %s6089_s27, 256  ;;  %s5590_s18 = smov [#allocation8]  }
 0x146   : > { %p5398_p3 = scmp.ne.s32.totalorder %s6089_s27, %s5397_s11  ;;  %s5402_s15 = sshll.u32 %s5590_s18, 4  ;;  %s5403_s15 = int_to_ptr.vmem [resolvable:$false] %s5402_s15 }
 0x147   : > { %s5404_s10 = scalar_lea.vmem %s5403_s15, 512  ;;  %p5405_p5 = scmp.lt.s32.totalorder %s6089_s27, %s5403_s15 }
 0x148   : > { %p5400_p9 = pnand %p5398_p3, %p5384_p1  ;;  %p5406_p7 = scmp.lt.s32.totalorder %s5404_s10, %s5397_s11 }
 0x14a   : > { %p5401_p11 = pneg %p5400_p9  ;;  %p5407_p12 = por %p5406_p7, %p5405_p5 }
 0x14c   : > { %p5408_p13 = pnand %p5407_p12, %p5401_p11 }
 0x14e   : > { %5411 = shalt.err (!%p5408_p13)
}
 0x14f   : > { %4848 = dma.hbm_to_vmem [thread:$0]  (!%p6095_p0), %s6087_s8, 256, %s6089_s27, %s5885_s24, %s6973_s9, %s6973_s9, %s6972_s13  }
 0x150   : > { %s7003_s25 = sld [smem:[#allocation34_spill]] }
 0x156   : > { %p7004_p1 = scmp.ne.s32.totalorder %s7003_s25, 0 }
 0x157   : > { %s7005_s12 = sld [smem:[#allocation31_spill]] (!%p7004_p1) }
 0x158   : > { %465 = sbr.rel (%p7004_p1) target bundleno = 1131 (0x46b), region = 56 }
 0x15d   : > { %s6131_s6 = sand.u32 (!%p7004_p1), 1, %s7005_s12  }
 0x15e   : > { %s3261_s19 = sshll.u32 (!%p7004_p1), %s6131_s6, 7  ;;  %s468_s28 = scalar_lea.sflag (!%p7004_p1), [#allocation4], %s6131_s6 }
 0x15f   : > { %s6137_s30 = scalar_lea.vmem [#allocation3], %s3261_s19 }
 0x160   : > { %5497 = dma.done.wait (%p5994_p10), %s468_s28, 2048  }
 0x161   : > { %5499 = vsyncadd (%p5994_p10), %s468_s28, 4294965248  ;;  %s7006_s8 = sld [smem:[#allocation29_spill]]  ;;  %s7007_s24 = sld [smem:[#allocation38_spill]] }
 0x162   : > { %s476_s13 = sand.u32 1, %s5716_s23  }
 0x163   : > { %s477_s16 = scalar_lea.sflag [#allocation7], %s476_s13 }
 0x167   : > { %s478_s9 = sand.u32 1, %s7006_s8   ;;  %p7008_p5 = scmp.ne.s32.totalorder %s7007_s24, 0 }
 0x168   : > { %s6145_s27 = sshll.u32 %s478_s9, 4 }
 0x169   : > { %s480_s3 = scalar_lea.vmem [#allocation6], %s6145_s27 }
 0x16a   : > { %5501 = dma.done.wait (%p7008_p5), %s477_s16, 256  }
 0x16b   : > { %5503 = vsyncadd (%p7008_p5), %s477_s16, 4294967040  ;;  %s7009_s11 = sld [smem:[#allocation27_spill]]  ;;  %p7010_p10 = scmp.ne.s32.totalorder %s6999_s4, 0 }
 0x171   : > { %s487_s18 = sand.u32 1, %s7009_s11  }
 0x172   : > { %s6153_s2 = sshll.u32 %s487_s18, 4 }
 0x173   : > { %s489_s15 = scalar_lea.vmem [#allocation8], %s6153_s2 }
 0x174   : > { %5505 = dma.done.wait (%p7010_p10), %s477_s16, 256  }
 0x175   : > { %5507 = vsyncadd (%p7010_p10), %s477_s16, 4294967040  ;;  %p7011_p0 = scmp.eq.s32.totalorder %s5716_s23, 0 }
 0x177   : > { %5509 = dma.done.wait (%p7011_p0), [#allocation10], 2064   ;;  %p7012_p2 = pmov %p7011_p0 }
 0x178   : > { %p7013_p6 = pmov %p7011_p0 }
 0x179   : > { %5511 = vsyncadd (%p7012_p2), [#allocation10], 4294965232 }
 0x17a   : > { %5513 = dma.done.wait (%p7013_p6), [#allocation13], 18448   ;;  %p7014_p8 = pmov %p7011_p0 }
 0x17b   : > { %p7015_p4 = pmov %p7011_p0 }
 0x17c   : > { %5515 = vsyncadd (%p7014_p8), [#allocation13], 4294948848 }
 0x17d   : > { %5517 = dma.done.wait (%p7015_p4), [#allocation16], 32   ;;  %p7016_p3 = pmov %p7011_p0 }
 0x17e   : > { %v568_v0 = vld [vmem:[#allocation9] sm:$0xff]  ;;  %v569_v1 = vld [vmem:[#allocation9 + $0x8] sm:$0xff]  ;;  %v570_v2 = vld [vmem:[#allocation9 + $0x10] sm:$0xff]  ;;  %s7017_s23 = sld [smem:[#allocation32_spill]]  ;;  %s6768_s25 = scalar_lea.vmem [#allocation18], %s3261_s19 }
 0x17f   : > { %5519 = vsyncadd (%p7016_p3), [#allocation16], 4294967264  ;;  %v6172_v3 = vpack.c.bf16 %v569_v1, %v568_v0  ;;  %v571_v4 = vld [vmem:[#allocation9 + $0x18] sm:$0xff]  ;;  %v572_v6 = vld [vmem:[#allocation9 + $0x20] sm:$0xff]  ;;  %v5591_v1 = vmov 0.0   ;;  %s7022_s12 = sld [smem:[#allocation33_spill]] }
 0x180   : > { %v6174_v5 = vpack.c.bf16 %v571_v4, %v570_v2  ;;  %v573_v7 = vld [vmem:[#allocation9 + $0x28] sm:$0xff]  ;;  %v586_v9 = vld [vmem:[%s6137_s30] sm:$0xff]  ;;  %v574_v10 = vld [vmem:[#allocation9 + $0x30] sm:$0xff]  ;;  %1108 = vst [vmem:[#allocation2 + $0x18] sm:$0x1] %v5591_v1  ;;  %s3032_s24 = sshll.u32 %s6768_s25, 4  ;;  %s6814_s24 = int_to_ptr.vmem [resolvable:$true] %s3032_s24 }
 0x181   : > { %4277 = vmatprep.subr.bf16.mxu0 %v6172_v3  ;;  %v6179_v8 = vpack.c.bf16 %v573_v7, %v572_v6  ;;  %v575_v11 = vld [vmem:[#allocation9 + $0x38] sm:$0xff]  ;;  %3678 = vmatprep.mubr.f32.mxu0 %v586_v9  ;;  %v576_v13 = vld [vmem:[#allocation9 + $0x40] sm:$0xff]  ;;  %v577_v14 = vld [vmem:[#allocation9 + $0x48] sm:$0xff]  ;;  %1107 = vst [vmem:[#allocation2] sm:$0x1] %v5591_v1  ;;  %s7023_s16 = sld [smem:[#allocation48_spill]] }
 0x182   : > { %4279 = vmatpush3.bf16.msra.mxu0 %v6172_v3  ;;  %v6184_v12 = vpack.c.bf16 %v575_v11, %v574_v10  ;;  %v6188_v15 = vpack.c.bf16 %v577_v14, %v576_v13  ;;  %v578_v16 = vld [vmem:[#allocation9 + $0x50] sm:$0xff]  ;;  %v579_v17 = vld [vmem:[#allocation9 + $0x58] sm:$0xff]  ;;  %v580_v19 = vld [vmem:[#allocation9 + $0x60] sm:$0xff]  ;;  %1109 = vst [vmem:[#allocation2 + $0x30] sm:$0x1] %v5591_v1  ;;  %s3016_s18 = scalar_lea.sflag [#allocation5], %s6131_s6 }
 0x183   : > { %4281 = vmatprep.subr.bf16.mxu0 %v6174_v5  ;;  %v6192_v18 = vpack.c.bf16 %v579_v17, %v578_v16  ;;  %v581_v20 = vld [vmem:[#allocation9 + $0x68] sm:$0xff]  ;;  %v582_v22 = vld [vmem:[#allocation9 + $0x70] sm:$0xff]  ;;  %v583_v23 = vld [vmem:[#allocation9 + $0x78] sm:$0xff]  ;;  %1110 = vst [vmem:[#allocation2 + $0x48] sm:$0x1] %v5591_v1  ;;  %s5412_s2 = scalar_lea.vmem %s6814_s24, 2048 }
 0x184   : > { %v6196_v21 = vpack.c.bf16 %v581_v20, %v580_v19  ;;  %v6200_v24 = vpack.c.bf16 %v583_v23, %v582_v22  ;;  %v587_v25 = vld [vmem:[%s6137_s30 + $0x8] sm:$0xff]  ;;  %v588_v26 = vld [vmem:[%s6137_s30 + $0x10] sm:$0xff]  ;;  %v589_v27 = vld [vmem:[%s6137_s30 + $0x18] sm:$0xff]  ;;  %1111 = vst [vmem:[#allocation2 + $0x60] sm:$0x1] %v5591_v1  ;;  %p1073_p9 = scmp.gt.s32.totalorder %s7017_s23, 0  ;;  %p5413_p7 = scmp.ne.s32.totalorder %s6814_s24, %s5412_s2 }
 0x185   : > { %v590_v28 = vld [vmem:[%s6137_s30 + $0x20] sm:$0xff]  ;;  %v591_v29 = vld [vmem:[%s6137_s30 + $0x28] sm:$0xff]  ;;  %v592_v30 = vld [vmem:[%s6137_s30 + $0x30] sm:$0xff]  ;;  %1112 = vst [vmem:[#allocation2 + $0x78] sm:$0x1] %v5591_v1  ;;  %p1079_p11 = scmp.lt.s32.totalorder %s7017_s23, 1 }
 0x186   : > { %4283 = vmatpush3.bf16.msra.mxu0 %v6174_v5  ;;  %v593_v31 = vld [vmem:[%s6137_s30 + $0x38] sm:$0xff]  ;;  %v594_v32 = vld [vmem:[%s6137_s30 + $0x40] sm:$0xff]  ;;  %v595_v33 = vld [vmem:[%s6137_s30 + $0x48] sm:$0xff]  ;;  %1113 = vst [vmem:[#allocation2 + $0x90] sm:$0x1] %v5591_v1  ;;  %s3289_s19 = sshll.u32 %s7017_s23, 4 }
 0x187   : > { %4285 = vmatprep.subr.bf16.mxu0 %v6179_v8  ;;  %v596_v34 = vld [vmem:[%s6137_s30 + $0x50] sm:$0xff]  ;;  %v597_v35 = vld [vmem:[%s6137_s30 + $0x58] sm:$0xff]  ;;  %v598_v36 = vld [vmem:[%s6137_s30 + $0x60] sm:$0xff]  ;;  %1114 = vst [vmem:[#allocation2 + $0xa8] sm:$0x1] %v5591_v1  ;;  %s3278_s28 = sshll.u32 %s7022_s12, 5 }
 0x188   : > { %v599_v37 = vld [vmem:[%s6137_s30 + $0x68] sm:$0xff]  ;;  %v600_v38 = vld [vmem:[%s6137_s30 + $0x70] sm:$0xff]  ;;  %v601_v39 = vld [vmem:[%s6137_s30 + $0x78] sm:$0xff]  ;;  %1115 = vst [vmem:[#allocation2 + $0xc0] sm:$0x1] %v5591_v1  ;;  %s3029_s8 = sadd.s32 %s3289_s19, %s3278_s28  ;;  %p7025_p12 = scmp.ne.s32.totalorder %s6985_s29, 0 }
 0x189   : > { %v887_v40 = vld [vmem:[%s480_s3] sm:$0xff]  ;;  %v888_v41 = vld [vmem:[%s480_s3 + $0x8] sm:$0xff]  ;;  %1116 = vst [vmem:[#allocation2 + $0xd8] sm:$0x1] %v5591_v1  ;;  %1117 = vst [vmem:[#allocation2 + $0x11] sm:$0x1] %v5591_v1  ;;  %s7024_s3 = smov %s7023_s16 }
 0x18a   : > { %4287 = vmatpush3.bf16.msra.mxu0 %v6179_v8  ;;  %v980_v42 = vld [vmem:[%s489_s15] sm:$0xff]  ;;  %v981_v43 = vld [vmem:[%s489_s15 + $0x8] sm:$0xff]  ;;  %1118 = vst [vmem:[#allocation2 + $0x29] sm:$0x1] %v5591_v1  ;;  %1119 = vst [vmem:[#allocation2 + $0x41] sm:$0x1] %v5591_v1  ;;  %p5414_p13 = pnand %p5413_p7, %p7025_p12 }
 0x18b   : > { %4289 = vmatprep.subr.bf16.mxu0 %v6184_v12  ;;  %v1693_v44 = vld [vmem:[#allocation14 + $0x180] sm:$0xff]  ;;  %v1694_v45 = vld [vmem:[#allocation14 + $0x188] sm:$0xff]  ;;  %v1695_v47 = vld [vmem:[#allocation14 + $0x190] sm:$0xff]  ;;  %1120 = vst [vmem:[#allocation2 + $0x59] sm:$0x1] %v5591_v1  ;;  %s3279_s13 = sshll.u32 %s3029_s8, 7 }
 0x18c   : > { %v4468_v46 = vpack.c.bf16 %v1694_v45, %v1693_v44  ;;  %v1696_v48 = vld [vmem:[#allocation14 + $0x198] sm:$0xff]  ;;  %v1697_v50 = vld [vmem:[#allocation14 + $0x1a0] sm:$0xff]  ;;  %v1698_v51 = vld [vmem:[#allocation14 + $0x1a8] sm:$0xff]  ;;  %1121 = vst [vmem:[#allocation2 + $0x71] sm:$0x1] %v5591_v1  ;;  %s6820_s11 = scalar_lea.hbm %s7023_s16, %s3279_s13  ;;  %p5415_p1 = pneg %p5414_p13 }
 0x18d   : > { %v4472_v49 = vpack.c.bf16 %v1696_v48, %v1695_v47  ;;  %v4476_v52 = vpack.c.bf16 %v1698_v51, %v1697_v50  ;;  %v1699_v53 = vld [vmem:[#allocation14 + $0x1b0] sm:$0xff]  ;;  %v1700_v54 = vld [vmem:[#allocation14 + $0x1b8] sm:$0xff]  ;;  %v1701_v56 = vld [vmem:[#allocation14 + $0x1c0] sm:$0xff]  ;;  %1122 = vst [vmem:[#allocation2 + $0x89] sm:$0x1] %v5591_v1  ;;  %s5592_s15 = smov [#allocation18]  }
 0x18e   : > { %4291 = vmatpush3.bf16.msra.mxu0 %v6184_v12  ;;  %4469 = vmatprep.subr.bf16.mxu1 %v4468_v46  ;;  %v4480_v55 = vpack.c.bf16 %v1700_v54, %v1699_v53  ;;  %v1702_v57 = vld [vmem:[#allocation14 + $0x1c8] sm:$0xff]  ;;  %v1703_v59 = vld [vmem:[#allocation14 + $0x1d0] sm:$0xff]  ;;  %v1704_v60 = vld [vmem:[#allocation14 + $0x1d8] sm:$0xff]  ;;  %1123 = vst [vmem:[#allocation2 + $0xa1] sm:$0x1] %v5591_v1  ;;  %s5416_s23 = sshll.u32 %s5592_s15, 4  ;;  %s5417_s23 = int_to_ptr.vmem [resolvable:$false] %s5416_s23 }
 0x18f   : > { %4293 = vmatprep.subr.bf16.mxu0 %v6188_v15  ;;  %4471 = vmatpush3.bf16.msra.mxu1 %v4468_v46  ;;  %v4484_v58 = vpack.c.bf16 %v1702_v57, %v1701_v56  ;;  %v4488_v61 = vpack.c.bf16 %v1704_v60, %v1703_v59  ;;  %v1705_v62 = vld [vmem:[#allocation14 + $0x1e0] sm:$0xff]  ;;  %v1706_v63 = vld [vmem:[#allocation14 + $0x1e8] sm:$0xff]  ;;  %1124 = vst [vmem:[#allocation2 + $0xb9] sm:$0x1] %v5591_v1  ;;  %1125 = vst [vmem:[#allocation2 + $0xd1] sm:$0x1] %v5591_v1  ;;  %p5419_p5 = scmp.lt.s32.totalorder %s6814_s24, %s5417_s23 }
 0x190   : > { %4473 = vmatprep.subr.bf16.mxu1 %v4472_v49  ;;  %v4492_v0 = vpack.c.bf16 %v1706_v63, %v1705_v62  ;;  %1126 = vst [vmem:[#allocation2 + $0xe9] sm:$0x1] %v5591_v1  ;;  %v1176_v2 = vld [vmem:[#allocation14 + $0x80] sm:$0xff]  ;;  %v1708_v6 = vld [vmem:[#allocation14 + $0x1f8] sm:$0xff]  ;;  %v1182_v17 = vld [vmem:[#allocation14 + $0xb0] sm:$0xff] }
 0x191   : > { %v1179_v9 = vld [vmem:[#allocation14 + $0x98] sm:$0xff]  ;;  %v1887_v11 = vld [vmem:[#allocation14 + $0x200] sm:$0xff]  ;;  %v1186_v23 = vld [vmem:[#allocation14 + $0xd0] sm:$0xff]  ;;  %s1074_s4 = scalar_select %p1073_p9, 1, 0 }
 0x192   : > { %4295 = vmatpush3.bf16.msra.mxu0 %v6188_v15  ;;  %v1180_v14 = vld [vmem:[#allocation14 + $0xa0] sm:$0xff]  ;;  %s1080_s10 = scalar_select %p1079_p11, 1, 0 }
 0x193   : > { %4297 = vmatprep.subr.bf16.mxu0 %v6192_v18  ;;  %4475 = vmatpush3.bf16.msra.mxu1 %v4472_v49  ;;  %v1184_v20 = vld [vmem:[#allocation14 + $0xc0] sm:$0xff] }
 0x194   : > { %4477 = vmatprep.subr.bf16.mxu1 %v4476_v52 }
 0x196   : > { %4299 = vmatpush3.bf16.msra.mxu0 %v6192_v18 }
 0x197   : > { %4301 = vmatprep.subr.bf16.mxu0 %v6196_v21  ;;  %4479 = vmatpush3.bf16.msra.mxu1 %v4476_v52 }
 0x198   : > { %4481 = vmatprep.subr.bf16.mxu1 %v4480_v55 }
 0x19a   : > { %4303 = vmatpush3.bf16.msra.mxu0 %v6196_v21 }
 0x19b   : > { %4305 = vmatprep.subr.bf16.mxu0 %v6200_v24  ;;  %4483 = vmatpush3.bf16.msra.mxu1 %v4480_v55 }
 0x19c   : > { %4485 = vmatprep.subr.bf16.mxu1 %v4484_v58 }
 0x19e   : > { %4307 = vmatpush3.bf16.msra.mxu0 %v6200_v24 }
 0x19f   : > { %4309 = vmatprep.subr.bf16.mxu0 %v6172_v3  ;;  %4487 = vmatpush3.bf16.msra.mxu1 %v4484_v58 }
 0x1a0   : > { %4489 = vmatprep.subr.bf16.mxu1 %v4488_v61 }
 0x1a1   : > { %3679 = vmatmul.mubr.f32.vlgmr.msra.gmra.mrb[0].mxu0 %v587_v25 }
 0x1a2   : > { %4311 = vmatpush3.bf16.msra.mxu0 %v6172_v3  ;;  %3681 = vmatprep.mubr.f32.mxu0 %v588_v26  ;;  %v1188_v26 = vld [vmem:[#allocation14 + $0xe0] sm:$0xff] }
 0x1a3   : > { %4313 = vmatprep.subr.bf16.mxu0 %v6174_v5  ;;  %4491 = vmatpush3.bf16.msra.mxu1 %v4488_v61 }
 0x1a4   : > { %4493 = vmatprep.subr.bf16.mxu1 %v4492_v0 }
 0x1a5   : > { %3682 = vmatmul.mubr.f32.gmra.mrb[2].mxu0 %v589_v27  ;;  %v1189_v27 = vld [vmem:[#allocation14 + $0xe8] sm:$0xff] }
 0x1a6   : > { %4315 = vmatpush3.bf16.msra.mxu0 %v6174_v5  ;;  %3684 = vmatprep.mubr.f32.mxu0 %v590_v28  ;;  %v4396_v28 = vpack.c.bf16 %v1189_v27, %v1188_v26 }
 0x1a7   : > { %4317 = vmatprep.subr.bf16.mxu0 %v6179_v8  ;;  %4495 = vmatpush3.bf16.msra.mxu1 %v4492_v0 }
 0x1a9   : > { %3685 = vmatmul.mubr.f32.gmra.mrb[4].mxu0 %v591_v29  ;;  %v1190_v29 = vld [vmem:[#allocation14 + $0xf0] sm:$0xff] }
 0x1aa   : > { %4319 = vmatpush3.bf16.msra.mxu0 %v6179_v8  ;;  %3687 = vmatprep.mubr.f32.mxu0 %v592_v30  ;;  %v1191_v30 = vld [vmem:[#allocation14 + $0xf8] sm:$0xff] }
 0x1ab   : > { %4321 = vmatprep.subr.bf16.mxu0 %v6184_v12 }
 0x1ad   : > { %3688 = vmatmul.mubr.f32.gmra.mrb[6].mxu0 %v593_v31  ;;  %v4400_v31 = vpack.c.bf16 %v1191_v30, %v1190_v29 }
 0x1ae   : > { %4323 = vmatpush3.bf16.msra.mxu0 %v6184_v12  ;;  %3690 = vmatprep.mubr.f32.mxu0 %v594_v32  ;;  %v1143_v32 = vld [vmem:[#allocation14] sm:$0xff] }
 0x1af   : > { %4325 = vmatprep.subr.bf16.mxu0 %v6188_v15 }
 0x1b1   : > { %3691 = vmatmul.mubr.f32.gmra.mrb[8].mxu0 %v595_v33  ;;  %v1144_v33 = vld [vmem:[#allocation14 + $0x8] sm:$0xff] }
 0x1b2   : > { %4327 = vmatpush3.bf16.msra.mxu0 %v6188_v15  ;;  %3693 = vmatprep.mubr.f32.mxu0 %v596_v34  ;;  %v6263_v34 = vpack.c.bf16 %v1144_v33, %v1143_v32 }
 0x1b3   : > { %4329 = vmatprep.subr.bf16.mxu0 %v6192_v18 }
 0x1b5   : > { %3694 = vmatmul.mubr.f32.gmra.mrb[10].mxu0 %v597_v35  ;;  %v6266_v35 = vld [vmem:[#allocation11] ss:$0 sm:$0xff] }
 0x1b6   : > { %4331 = vmatpush3.bf16.msra.mxu0 %v6192_v18  ;;  %3696 = vmatprep.mubr.f32.mxu0 %v598_v36  ;;  %v6268_v36 = vld [vmem:[#allocation12] ss:$0 sm:$0xff] }
 0x1b7   : > { %4333 = vmatprep.subr.bf16.mxu0 %v6196_v21 }
 0x1b9   : > { %3697 = vmatmul.mubr.f32.gmra.mrb[12].mxu0 %v599_v37 }
 0x1ba   : > { %4335 = vmatpush3.bf16.msra.mxu0 %v6196_v21  ;;  %3699 = vmatprep.mubr.f32.mxu0 %v600_v38 }
 0x1bb   : > { %4337 = vmatprep.subr.bf16.mxu0 %v6200_v24 }
 0x1bd   : > { %3700 = vmatmul.mubr.f32.gmra.mrb[14].mxu0 %v601_v39 }
 0x1be   : > { %4339 = vmatpush3.bf16.msra.mxu0 %v6200_v24  ;;  %3734 = vmatprep.mubr.f32.mxu0 %v887_v40 }
 0x1bf   : > { %4341 = vmatprep.subr.bf16.mxu0 %v6172_v3 }
 0x1c1   : > { %3735 = vmatmul.mubr.f32.vlgmr.msra.gmra.mrb[16].mxu0 %v888_v41 }
 0x1c2   : > { %4343 = vmatpush3.bf16.msra.mxu0 %v6172_v3  ;;  %3769 = vmatprep.mubr.f32.mxu0 %v980_v42  ;;  %v1177_v3 = vld [vmem:[#allocation14 + $0x88] sm:$0xff] }
 0x1c3   : > { %4345 = vmatprep.subr.bf16.mxu0 %v6174_v5  ;;  %v4372_v4 = vpack.c.bf16 %v1177_v3, %v1176_v2 }
 0x1c6   : > { %4347 = vmatpush3.bf16.msra.mxu0 %v6174_v5  ;;  %v1707_v5 = vld [vmem:[#allocation14 + $0x1f0] sm:$0xff] }
 0x1c7   : > { %4349 = vmatprep.subr.bf16.mxu0 %v6179_v8  ;;  %v4496_v7 = vpack.c.bf16 %v1708_v6, %v1707_v5 }
 0x1c9   : > { %4497 = vmatprep.subr.bf16.mxu1 %v4496_v7 }
 0x1ca   : > { %4351 = vmatpush3.bf16.msra.mxu0 %v6179_v8  ;;  %v1178_v8 = vld [vmem:[#allocation14 + $0x90] sm:$0xff]  ;;  %4499 = vmatpush3.bf16.msra.mxu1 %v4496_v7 }
 0x1cb   : > { %4353 = vmatprep.subr.bf16.mxu0 %v6184_v12  ;;  %v4376_v10 = vpack.c.bf16 %v1179_v9, %v1178_v8 }
 0x1ce   : > { %4355 = vmatpush3.bf16.msra.mxu0 %v6184_v12  ;;  %v1888_v12 = vld [vmem:[#allocation14 + $0x208] sm:$0xff] }
 0x1cf   : > { %4357 = vmatprep.subr.bf16.mxu0 %v6188_v15  ;;  %v6260_v13 = vpack.c.bf16 %v1888_v12, %v1887_v11 }
 0x1d1   : > { %4501 = vmatprep.subr.bf16.mxu1 %v6260_v13 }
 0x1d2   : > { %4359 = vmatpush3.bf16.msra.mxu0 %v6188_v15  ;;  %v1181_v15 = vld [vmem:[#allocation14 + $0xa8] sm:$0xff] }
 0x1d3   : > { %4361 = vmatprep.subr.bf16.mxu0 %v6192_v18  ;;  %v4380_v16 = vpack.c.bf16 %v1181_v15, %v1180_v14 }
 0x1d6   : > { %4363 = vmatpush3.bf16.msra.mxu0 %v6192_v18  ;;  %v1183_v18 = vld [vmem:[#allocation14 + $0xb8] sm:$0xff] }
 0x1d7   : > { %4365 = vmatprep.subr.bf16.mxu0 %v6196_v21  ;;  %v4384_v19 = vpack.c.bf16 %v1183_v18, %v1182_v17 }
 0x1da   : > { %4367 = vmatpush3.bf16.msra.mxu0 %v6196_v21  ;;  %v1185_v21 = vld [vmem:[#allocation14 + $0xc8] sm:$0xff] }
 0x1db   : > { %4369 = vmatprep.subr.bf16.mxu0 %v6200_v24  ;;  %v4388_v22 = vpack.c.bf16 %v1185_v21, %v1184_v20 }
 0x1de   : > { %4371 = vmatpush3.bf16.msra.mxu0 %v6200_v24  ;;  %v1187_v24 = vld [vmem:[#allocation14 + $0xd8] sm:$0xff] }
 0x1df   : > { %4373 = vmatprep.subr.bf16.mxu0 %v4372_v4  ;;  %v4392_v25 = vpack.c.bf16 %v1187_v24, %v1186_v23 }
 0x1e1   : > { %3770 = vmatmul.mubr.f32.vlgmr.msra.gmra.mrb[18].mxu0 %v981_v43 }
 0x1e2   : > { %4375 = vmatpush3.bf16.msra.mxu0 %v4372_v4 }
 0x1e3   : > { %4377 = vmatprep.subr.bf16.mxu0 %v4376_v10 }
 0x1e6   : > { %4379 = vmatpush3.bf16.msra.mxu0 %v4376_v10 }
 0x1e7   : > { %4381 = vmatprep.subr.bf16.mxu0 %v4380_v16 }
 0x1ea   : > { %4383 = vmatpush3.bf16.msra.mxu0 %v4380_v16 }
 0x1eb   : > { %4385 = vmatprep.subr.bf16.mxu0 %v4384_v19 }
 0x1ee   : > { %4387 = vmatpush3.bf16.msra.mxu0 %v4384_v19 }
 0x1ef   : > { %4389 = vmatprep.subr.bf16.mxu0 %v4388_v22 }
 0x1f2   : > { %4391 = vmatpush3.bf16.msra.mxu0 %v4388_v22 }
 0x1f3   : > { %4393 = vmatprep.subr.bf16.mxu0 %v4392_v25 }
 0x1f6   : > { %4395 = vmatpush3.bf16.msra.mxu0 %v4392_v25 }
 0x1f7   : > { %4397 = vmatprep.subr.bf16.mxu0 %v4396_v28 }
 0x1fa   : > { %4399 = vmatpush3.bf16.msra.mxu0 %v4396_v28 }
 0x1fb   : > { %4401 = vmatprep.subr.bf16.mxu0 %v4400_v31 }
 0x1fe   : > { %4403 = vmatpush3.bf16.msra.mxu0 %v4400_v31 }
 0x1ff   : > { %4405 = vmatprep.subr.bf16.mxu0 %v6263_v34 }
 0x274   : > { %v3680_v37 = vpop.f32.mrb[0].mxu0 }
 0x275   : > { %v754_v38 = vmul.f32 %v3680_v37, %v6266_v35  ;;  %v668_v39 = vpop.f32.mrb[1].mxu0 }
 0x276   : > { %v753_v40 = vmul.f32 %v6266_v35, %v668_v39 }
 0x277   : > { %v6273_v41 = vadd.f32 %v6268_v36, %v754_v38 }
 0x278   : > { %v6276_v42 = vadd.f32 %v6268_v36, %v753_v40  ;;  %v3683_v43 = vpop.f32.mrb[2].mxu0 }
 0x279   : > { %v792_v44 = vsub.f32 0.0, %v6273_v41  ;;  %v756_v45 = vmul.f32 %v3683_v43, %v6266_v35  ;;  %v678_v46 = vpop.f32.mrb[3].mxu0 }
 0x27a   : > { %v791_v47 = vsub.f32 0.0, %v6276_v42  ;;  %v755_v48 = vmul.f32 %v6266_v35, %v678_v46 }
 0x27b   : > { %v809_v49 = vmul.f32 1.442695, %v792_v44  ;;  %v6283_v50 = vadd.f32 %v6268_v36, %v756_v45 }
 0x27c   : > { %v807_v51 = vmul.f32 1.442695, %v791_v47  ;;  %v6286_v52 = vadd.f32 %v6268_v36, %v755_v48  ;;  %v3686_v53 = vpop.f32.mrb[4].mxu0 }
 0x27d   : > { %4990 = vpow2.f32 %v809_v49  ;;  %v794_v54 = vsub.f32 0.0, %v6283_v50  ;;  %v758_v55 = vmul.f32 %v3686_v53, %v6266_v35  ;;  %v688_v56 = vpop.f32.mrb[5].mxu0 }
 0x27e   : > { %4992 = vpow2.f32 %v807_v51  ;;  %v793_v57 = vsub.f32 0.0, %v6286_v52  ;;  %v757_v58 = vmul.f32 %v6266_v35, %v688_v56 }
 0x27f   : > { %v813_v59 = vmul.f32 1.442695, %v794_v54  ;;  %v6293_v60 = vadd.f32 %v6268_v36, %v758_v55 }
 0x280   : > { %v811_v61 = vmul.f32 1.442695, %v793_v57  ;;  %v6296_v62 = vadd.f32 %v6268_v36, %v757_v58  ;;  %v3689_v63 = vpop.f32.mrb[6].mxu0 }
 0x281   : > { %4994 = vpow2.f32 %v813_v59  ;;  %v796_v0 = vsub.f32 0.0, %v6293_v60  ;;  %v760_v1 = vmul.f32 %v3689_v63, %v6266_v35  ;;  %v698_v2 = vpop.f32.mrb[7].mxu0 }
 0x282   : > { %4996 = vpow2.f32 %v811_v61  ;;  %v795_v3 = vsub.f32 0.0, %v6296_v62  ;;  %v759_v4 = vmul.f32 %v6266_v35, %v698_v2 }
 0x283   : > { %v817_v5 = vmul.f32 1.442695, %v796_v0  ;;  %v6303_v6 = vadd.f32 %v6268_v36, %v760_v1 }
 0x284   : > { %v815_v7 = vmul.f32 1.442695, %v795_v3  ;;  %v6306_v8 = vadd.f32 %v6268_v36, %v759_v4  ;;  %v3692_v9 = vpop.f32.mrb[8].mxu0 }
 0x285   : > { %4998 = vpow2.f32 %v817_v5  ;;  %v798_v10 = vsub.f32 0.0, %v6303_v6  ;;  %v762_v11 = vmul.f32 %v3692_v9, %v6266_v35  ;;  %v708_v12 = vpop.f32.mrb[9].mxu0 }
 0x286   : > { %5000 = vpow2.f32 %v815_v7  ;;  %v797_v14 = vsub.f32 0.0, %v6306_v8  ;;  %v761_v15 = vmul.f32 %v6266_v35, %v708_v12 }
 0x287   : > { %v4991_v16 = vpop.eup %4990  ;;  %v821_v17 = vmul.f32 1.442695, %v798_v10  ;;  %v6313_v18 = vadd.f32 %v6268_v36, %v762_v11 }
 0x288   : > { %v4993_v19 = vpop.eup %4992  ;;  %v840_v20 = vadd.f32 1.0, %v4991_v16  ;;  %v819_v21 = vmul.f32 1.442695, %v797_v14  ;;  %v6316_v22 = vadd.f32 %v6268_v36, %v761_v15  ;;  %v3695_v23 = vpop.f32.mrb[10].mxu0 }
 0x289   : > { %v839_v24 = vadd.f32 1.0, %v4993_v19  ;;  %5002 = vpow2.f32 %v821_v17  ;;  %v800_v25 = vsub.f32 0.0, %v6313_v18  ;;  %v764_v26 = vmul.f32 %v3695_v23, %v6266_v35  ;;  %v718_v27 = vpop.f32.mrb[11].mxu0 }
 0x28a   : > { %5004 = vrcp.f32 %v840_v20  ;;  %v799_v28 = vsub.f32 0.0, %v6316_v22  ;;  %v763_v29 = vmul.f32 %v6266_v35, %v718_v27 }
 0x28b   : > { %v4995_v30 = vpop.eup %4994  ;;  %5006 = vrcp.f32 %v839_v24  ;;  %v825_v31 = vmul.f32 1.442695, %v800_v25  ;;  %v6323_v32 = vadd.f32 %v6268_v36, %v764_v26 }
 0x28c   : > { %v4997_v33 = vpop.eup %4996  ;;  %v842_v37 = vadd.f32 1.0, %v4995_v30  ;;  %5008 = vpow2.f32 %v819_v21  ;;  %v823_v38 = vmul.f32 1.442695, %v799_v28  ;;  %v6326_v39 = vadd.f32 %v6268_v36, %v763_v29  ;;  %v3698_v40 = vpop.f32.mrb[12].mxu0 }
 0x28d   : > { %v841_v43 = vadd.f32 1.0, %v4997_v33  ;;  %5010 = vpow2.f32 %v825_v31  ;;  %v802_v44 = vsub.f32 0.0, %v6323_v32  ;;  %v766_v45 = vmul.f32 %v3698_v40, %v6266_v35  ;;  %v728_v46 = vpop.f32.mrb[13].mxu0 }
 0x28e   : > { %5012 = vrcp.f32 %v842_v37  ;;  %v801_v47 = vsub.f32 0.0, %v6326_v39  ;;  %v765_v48 = vmul.f32 %v6266_v35, %v728_v46 }
 0x28f   : > { %v4999_v49 = vpop.eup %4998  ;;  %5014 = vrcp.f32 %v841_v43  ;;  %v829_v51 = vmul.f32 1.442695, %v802_v44  ;;  %v6333_v53 = vadd.f32 %v6268_v36, %v766_v45 }
 0x290   : > { %v5001_v54 = vpop.eup %5000  ;;  %v844_v55 = vadd.f32 1.0, %v4999_v49  ;;  %5016 = vpow2.f32 %v823_v38  ;;  %v827_v56 = vmul.f32 1.442695, %v801_v47  ;;  %v6336_v57 = vadd.f32 %v6268_v36, %v765_v48  ;;  %v3701_v58 = vpop.f32.mrb[14].mxu0  ;;  %v1889_v49 = vld [vmem:[#allocation14 + $0x210] sm:$0xff] }
 0x291   : > { %v843_v59 = vadd.f32 1.0, %v5001_v54  ;;  %5018 = vpow2.f32 %v829_v51  ;;  %v804_v61 = vsub.f32 0.0, %v6333_v53  ;;  %v768_v63 = vmul.f32 %v3701_v58, %v6266_v35  ;;  %v738_v0 = vpop.f32.mrb[15].mxu0  ;;  %v1890_v51 = vld [vmem:[#allocation14 + $0x218] sm:$0xff] }
 0x292   : > { %5020 = vrcp.f32 %v844_v55  ;;  %v803_v1 = vsub.f32 0.0, %v6336_v57  ;;  %v767_v2 = vmul.f32 %v6266_v35, %v738_v0  ;;  %v4504_v0 = vpack.c.bf16 %v1890_v51, %v1889_v49 }
 0x293   : > { %v5003_v3 = vpop.eup %5002  ;;  %5022 = vrcp.f32 %v843_v59  ;;  %v833_v4 = vmul.f32 1.442695, %v804_v61  ;;  %v6343_v5 = vadd.f32 %v6268_v36, %v768_v63 }
 0x294   : > { %v5005_v7 = vpop.eup %5004  ;;  %v846_v9 = vadd.f32 1.0, %v5003_v3  ;;  %5024 = vpow2.f32 %v827_v56  ;;  %v831_v10 = vmul.f32 1.442695, %v803_v1  ;;  %v6346_v11 = vadd.f32 %v6268_v36, %v767_v2  ;;  %v3736_v12 = vpop.f32.mrb[16].mxu0  ;;  %v1892_v2 = vld [vmem:[#allocation14 + $0x228] sm:$0xff] }
 0x295   : > { %v5007_v14 = vpop.eup %5006  ;;  %v6349_v15 = vmul.f32 %v5005_v7, %v6273_v41  ;;  %5026 = vpow2.f32 %v833_v4  ;;  %v806_v16 = vsub.f32 0.0, %v6343_v5  ;;  %v965_v17 = vmul.f32 %v3736_v12, %v6266_v35  ;;  %v955_v19 = vpop.f32.mrb[17].mxu0 }
 0x296   : > { %v5009_v20 = vpop.eup %5008  ;;  %v6354_v21 = vmul.f32 %v5007_v14, %v6276_v42  ;;  %5028 = vrcp.f32 %v846_v9  ;;  %v805_v23 = vsub.f32 0.0, %v6346_v11  ;;  %v964_v24 = vmul.f32 %v6266_v35, %v955_v19  ;;  %v1894_v19 = vld [vmem:[#allocation14 + $0x238] sm:$0xff] }
 0x297   : > { %v5011_v25 = vpop.eup %5010  ;;  %1087 = vst [vmem:[#allocation2 + $0x21] sm:$0xff] %v6349_v15  ;;  %v845_v41 = vadd.f32 1.0, %v5009_v20  ;;  %5030 = vpow2.f32 %v831_v10  ;;  %v837_v26 = vmul.f32 1.442695, %v806_v16  ;;  %v6360_v27 = vadd.f32 %v6268_v36, %v965_v17  ;;  %v1893_v17 = vld [vmem:[#allocation14 + $0x230] sm:$0xff] }
 0x298   : > { %v5013_v28 = vpop.eup %5012  ;;  %1086 = vst [vmem:[#allocation2 + $0x19] sm:$0xff] %v6354_v21  ;;  %v848_v29 = vadd.f32 1.0, %v5011_v25  ;;  %v835_v42 = vmul.f32 1.442695, %v805_v23  ;;  %v6364_v30 = vadd.f32 %v6268_v36, %v964_v24 }
 0x299   : > { %v5015_v31 = vpop.eup %5014  ;;  %v6367_v33 = vmul.f32 %v5013_v28, %v6283_v50  ;;  %5032 = vrcp.f32 %v845_v41  ;;  %v969_v37 = vsub.f32 0.0, %v6360_v27  ;;  %v4512_v28 = vpack.c.bf16 %v1894_v19, %v1893_v17 }
 0x29a   : > { %v5017_v38 = vpop.eup %5016  ;;  %v6371_v40 = vmul.f32 %v5015_v31, %v6286_v52  ;;  %5034 = vrcp.f32 %v848_v29  ;;  %v968_v43 = vsub.f32 0.0, %v6364_v30  ;;  %v1896_v31 = vld [vmem:[#allocation14 + $0x248] sm:$0xff] }
 0x29b   : > { %v5019_v44 = vpop.eup %5018  ;;  %1089 = vst [vmem:[#allocation2 + $0x39] sm:$0xff] %v6367_v33  ;;  %v847_v45 = vadd.f32 1.0, %v5017_v38  ;;  %5036 = vpow2.f32 %v837_v26  ;;  %v972_v46 = vmul.f32 1.442695, %v969_v37 }
 0x29c   : > { %v5021_v47 = vpop.eup %5020  ;;  %1088 = vst [vmem:[#allocation2 + $0x31] sm:$0xff] %v6371_v40  ;;  %v850_v50 = vadd.f32 1.0, %v5019_v44  ;;  %5038 = vpow2.f32 %v835_v42  ;;  %v970_v48 = vmul.f32 1.442695, %v968_v43  ;;  %v1895_v42 = vld [vmem:[#allocation14 + $0x240] sm:$0xff] }
 0x29d   : > { %v5023_v54 = vpop.eup %5022  ;;  %v6377_v52 = vmul.f32 %v5021_v47, %v6293_v60  ;;  %5040 = vrcp.f32 %v847_v45 }
 0x29e   : > { %v5025_v55 = vpop.eup %5024  ;;  %v6380_v56 = vmul.f32 %v5023_v54, %v6296_v62  ;;  %5042 = vrcp.f32 %v850_v50  ;;  %v1891_v62 = vld [vmem:[#allocation14 + $0x220] sm:$0xff]  ;;  %v1897_v50 = vld [vmem:[#allocation14 + $0x250] sm:$0xff] }
 0x29f   : > { %v5027_v58 = vpop.eup %5026  ;;  %1091 = vst [vmem:[#allocation2 + $0x51] sm:$0xff] %v6377_v52  ;;  %v849_v59 = vadd.f32 1.0, %v5025_v55  ;;  %5044 = vpow2.f32 %v972_v46  ;;  %v6383_v61 = vld [vmem:[#allocation2 + $0x18] sm:$0xff]  ;;  %v6385_v63 = vld [vmem:[#allocation2 + $0x20] sm:$0xff]  ;;  %v4508_v14 = vpack.c.bf16 %v1892_v2, %v1891_v62  ;;  %v4516_v46 = vpack.c.bf16 %v1896_v31, %v1895_v42 }
 0x2a0   : > { %v5029_v1 = vpop.eup %5028  ;;  %1090 = vst [vmem:[#allocation2 + $0x49] sm:$0xff] %v6380_v56  ;;  %v852_v60 = vadd.f32 1.0, %v5027_v58  ;;  %5046 = vpow2.f32 %v970_v48  ;;  %3972 = vmatprep.mubr.f32.mxu1 %v6383_v61  ;;  %v1898_v48 = vld [vmem:[#allocation14 + $0x258] sm:$0xff]  ;;  %v1899_v58 = vld [vmem:[#allocation14 + $0x260] sm:$0xff]  ;;  %v1075_v2 = vstv %s1074_s4  ;;  %s5418_s4 = scalar_lea.vmem %s5417_s23, 4096 }
 0x2a1   : > { %v5031_v3 = vpop.eup %5030  ;;  %v6390_v4 = vmul.f32 %v5029_v1, %v6303_v6  ;;  %5048 = vrcp.f32 %v849_v59  ;;  %3973 = vmatmul.mubr.f32.vlgmr.msra.gmra.mrb[0].mxu1 %v6385_v63  ;;  %v1900_v59 = vld [vmem:[#allocation14 + $0x268] sm:$0xff]  ;;  %vm6463_vm0 = vcmp.eq.s32.totalorder %v1075_v2, 1  ;;  %p5420_p10 = scmp.lt.s32.totalorder %s5418_s4, %s5412_s2 }
 0x2a2   : > { %5050 = vrcp.f32 %v852_v60  ;;  %v851_v7 = vadd.f32 1.0, %v5031_v3  ;;  %4503 = vmatpush3.bf16.msra.mxu1 %v6260_v13  ;;  %v4524_v3 = vpack.c.bf16 %v1900_v59, %v1899_v58  ;;  %v2083_v58 = vld [vmem:[#allocation14 + $0x290] sm:$0xff]  ;;  %v2084_v59 = vld [vmem:[#allocation14 + $0x298] sm:$0xff]  ;;  %v1148_v2 = vld [vmem:[#allocation14 + $0x28] sm:$0xff] }
 0x2a3   : > { %v5033_v9 = vpop.eup %5032  ;;  %1093 = vst [vmem:[#allocation2 + $0x69] sm:$0xff] %v6390_v4  ;;  %v6395_v10 = vld [vmem:[#allocation2 + $0x30] sm:$0xff]  ;;  %4505 = vmatprep.subr.bf16.mxu1 %v4504_v0  ;;  %v6397_v12 = vld [vmem:[#allocation2 + $0x38] sm:$0xff]  ;;  %p5421_p0 = por %p5420_p10, %p5419_p5 }
 0x2a4   : > { %v5035_v16 = vpop.eup %5034  ;;  %v6400_v6 = vmul.f32 %v5033_v9, %v6306_v8  ;;  %5052 = vrcp.f32 %v851_v7  ;;  %3975 = vmatprep.mubr.f32.mxu1 %v6395_v10  ;;  %v1901_v9 = vld [vmem:[#allocation14 + $0x270] sm:$0xff] }
 0x2a5   : > { %v5037_v20 = vpop.eup %5036  ;;  %v6404_v13 = vmul.f32 %v5035_v16, %v6313_v18  ;;  %3976 = vmatmul.mubr.f32.gmra.mrb[2].mxu1 %v6397_v12  ;;  %p5422_p2 = pnand %p5421_p0, %p5415_p1 }
 0x2a6   : > { %v5039_v23 = vpop.eup %5038  ;;  %1092 = vst [vmem:[#allocation2 + $0x61] sm:$0xff] %v6400_v6  ;;  %v854_v24 = vadd.f32 1.0, %v5037_v20  ;;  %4507 = vmatpush3.bf16.msra.mxu1 %v4504_v0 }
 0x2a7   : > { %v5041_v25 = vpop.eup %5040  ;;  %1095 = vst [vmem:[#allocation2 + $0x81] sm:$0xff] %v6404_v13  ;;  %v853_v8 = vadd.f32 1.0, %v5039_v23  ;;  %v6409_v41 = vld [vmem:[#allocation2 + $0x48] sm:$0xff]  ;;  %4509 = vmatprep.subr.bf16.mxu1 %v4508_v14  ;;  %v6411_v26 = vld [vmem:[#allocation2 + $0x50] sm:$0xff] }
 0x2a8   : > { %v5043_v29 = vpop.eup %5042  ;;  %v6414_v18 = vmul.f32 %v5041_v25, %v6316_v22  ;;  %5054 = vrcp.f32 %v854_v24  ;;  %3978 = vmatprep.mubr.f32.mxu1 %v6409_v41 }
 0x2a9   : > { %v5045_v37 = vpop.eup %5044  ;;  %v6418_v38 = vmul.f32 %v5043_v29, %v6323_v32  ;;  %5056 = vrcp.f32 %v853_v8  ;;  %3979 = vmatmul.mubr.f32.gmra.mrb[4].mxu1 %v6411_v26  ;;  %v2081_v29 = vld [vmem:[#allocation14 + $0x280] sm:$0xff] }
 0x2aa   : > { %v5047_v43 = vpop.eup %5046  ;;  %1094 = vst [vmem:[#allocation2 + $0x79] sm:$0xff] %v6414_v18  ;;  %v975_v44 = vadd.f32 1.0, %v5045_v37  ;;  %4511 = vmatpush3.bf16.msra.mxu1 %v4508_v14  ;;  %v1902_v14 = vld [vmem:[#allocation14 + $0x278] sm:$0xff] }
 0x2ab   : > { %v5049_v45 = vpop.eup %5048  ;;  %1097 = vst [vmem:[#allocation2 + $0x99] sm:$0xff] %v6418_v38  ;;  %v974_v22 = vadd.f32 1.0, %v5047_v43  ;;  %4513 = vmatprep.subr.bf16.mxu1 %v4512_v28 }
 0x2ac   : > { %v5051_v47 = vpop.eup %5050  ;;  %v6425_v32 = vmul.f32 %v5049_v45, %v6326_v39  ;;  %5058 = vrcp.f32 %v975_v44  ;;  %v2082_v44 = vld [vmem:[#allocation14 + $0x288] sm:$0xff] }
 0x2ad   : > { %v6428_v49 = vmul.f32 %v5051_v47, %v6333_v53  ;;  %5060 = vrcp.f32 %v974_v22  ;;  %v6430_v51 = vld [vmem:[#allocation2 + $0x60] sm:$0xff]  ;;  %v6432_v54 = vld [vmem:[#allocation2 + $0x68] sm:$0xff]  ;;  %v4520_v53 = vpack.c.bf16 %v1898_v48, %v1897_v50 }
 0x2ae   : > { %v5053_v55 = vpop.eup %5052  ;;  %1096 = vst [vmem:[#allocation2 + $0x91] sm:$0xff] %v6425_v32  ;;  %3981 = vmatprep.mubr.f32.mxu1 %v6430_v51  ;;  %4515 = vmatpush3.bf16.msra.mxu1 %v4512_v28  ;;  %v4528_v28 = vpack.c.bf16 %v1902_v14, %v1901_v9  ;;  %v1146_v47 = vld [vmem:[#allocation14 + $0x18] sm:$0xff]  ;;  %v2085_v9 = vld [vmem:[#allocation14 + $0x2a0] sm:$0xff]  ;;  %v2086_v14 = vld [vmem:[#allocation14 + $0x2a8] sm:$0xff] }
 0x2af   : > { %1099 = vst [vmem:[#allocation2 + $0xb1] sm:$0xff] %v6428_v49  ;;  %v6438_v39 = vmul.f32 %v5053_v55, %v6336_v57  ;;  %3982 = vmatmul.mubr.f32.gmra.mrb[6].mxu1 %v6432_v54  ;;  %4517 = vmatprep.subr.bf16.mxu1 %v4516_v46 }
 0x2b1   : > { %1098 = vst [vmem:[#allocation2 + $0xa9] sm:$0xff] %v6438_v39  ;;  %v6444_v0 = vld [vmem:[#allocation2 + $0x78] sm:$0xff]  ;;  %v6446_v1 = vld [vmem:[#allocation2 + $0x80] sm:$0xff] }
 0x2b2   : > { %v5055_v60 = vpop.eup %5054  ;;  %3984 = vmatprep.mubr.f32.mxu1 %v6444_v0  ;;  %4519 = vmatpush3.bf16.msra.mxu1 %v4516_v46  ;;  %v1145_v46 = vld [vmem:[#allocation14 + $0x10] sm:$0xff] }
 0x2b3   : > { %v5057_v57 = vpop.eup %5056  ;;  %v6450_v62 = vmul.f32 %v5055_v60, %v6343_v5  ;;  %3985 = vmatmul.mubr.f32.gmra.mrb[8].mxu1 %v6446_v1  ;;  %4521 = vmatprep.subr.bf16.mxu1 %v4520_v53  ;;  %v4408_v60 = vpack.c.bf16 %v1146_v47, %v1145_v46  ;;  %v1156_v46 = vld [vmem:[#allocation14 + $0x68] sm:$0xff] }
 0x2b4   : > { %v6454_v7 = vmul.f32 %v5057_v57, %v6346_v11  ;;  %v3771_v16 = vpop.f32.mrb[18].mxu0  ;;  %v1147_v57 = vld [vmem:[#allocation14 + $0x20] sm:$0xff] }
 0x2b5   : > { %1101 = vst [vmem:[#allocation2 + $0xc9] sm:$0xff] %v6450_v62  ;;  %v6457_v17 = vld [vmem:[#allocation2 + $0x90] sm:$0xff]  ;;  %v6459_v19 = vld [vmem:[#allocation2 + $0x98] sm:$0xff]  ;;  %v1058_v5 = vmul.f32 %v3771_v16, %v6266_v35  ;;  %v1048_v20 = vpop.f32.mrb[19].mxu0  ;;  %v4412_v16 = vpack.c.bf16 %v1148_v2, %v1147_v57 }
 0x2b6   : > { %v5059_v23 = vpop.eup %5058  ;;  %1100 = vst [vmem:[#allocation2 + $0xc1] sm:$0xff] %v6454_v7  ;;  %3987 = vmatprep.mubr.f32.mxu1 %v6457_v17  ;;  %4523 = vmatpush3.bf16.msra.mxu1 %v4520_v53  ;;  %v1057_v11 = vmul.f32 %v6266_v35, %v1048_v20  ;;  %v1150_v20 = vld [vmem:[#allocation14 + $0x38] sm:$0xff] }
 0x2b7   : > { %v5061_v25 = vpop.eup %5060  ;;  %v979_v8 = vmul.f32 %v5059_v23, %v6360_v27  ;;  %3988 = vmatmul.mubr.f32.gmra.mrb[10].mxu1 %v6459_v19  ;;  %4525 = vmatprep.subr.bf16.mxu1 %v4524_v3  ;;  %v6472_v42 = vadd.f32 %v6268_v36, %v1058_v5  ;;  %v1149_v5 = vld [vmem:[#allocation14 + $0x30] sm:$0xff]  ;;  %v2088_v23 = vld [vmem:[#allocation14 + $0x2b8] sm:$0xff] }
 0x2b8   : > { %v978_v31 = vmul.f32 %v5061_v25, %v6364_v30  ;;  %v6475_v37 = vld [vmem:[#allocation2 + $0xa8] sm:$0xff]  ;;  %v6477_v43 = vld [vmem:[#allocation2 + $0xb0] sm:$0xff]  ;;  %v6480_v35 = vadd.f32 %v6268_v36, %v1057_v11  ;;  %v4532_v36 = vpack.c.bf16 %v2082_v44, %v2081_v29  ;;  %v4416_v24 = vpack.c.bf16 %v1150_v20, %v1149_v5  ;;  %v1152_v25 = vld [vmem:[#allocation14 + $0x48] sm:$0xff] }
 0x2b9   : > { %v1078_v27 = vsel %vm6463_vm0, %v979_v8, 0.0  ;;  %3990 = vmatprep.mubr.f32.mxu1 %v6475_v37  ;;  %v1062_v45 = vsub.f32 0.0, %v6472_v42  ;;  %v1500_v5 = vld [vmem:[#allocation14 + $0x108] sm:$0xff] }
 0x2ba   : > { %1103 = vst [vmem:[#allocation2 + $0x9] sm:$0xff] %v1078_v27  ;;  %v1077_v22 = vsel %vm6463_vm0, %v978_v31, 0.0  ;;  %4527 = vmatpush3.bf16.msra.mxu1 %v4524_v3  ;;  %v1061_v30 = vsub.f32 0.0, %v6480_v35  ;;  %5150 = vmatprep.mubr.msk.f32.mxu0 %vm6463_vm0, %v978_v31  ;;  %v4536_v3 = vpack.c.bf16 %v2084_v59, %v2083_v58  ;;  %v2089_v31 = vld [vmem:[#allocation14 + $0x2c0] sm:$0xff]  ;;  %v1154_v27 = vld [vmem:[#allocation14 + $0x58] sm:$0xff] }
 0x2bb   : > { %1102 = vst [vmem:[#allocation2 + $0x1] sm:$0xff] %v1077_v22  ;;  %3991 = vmatmul.mubr.f32.gmra.mrb[12].mxu1 %v6477_v43  ;;  %4529 = vmatprep.subr.bf16.mxu1 %v4528_v28  ;;  %v1065_v50 = vmul.f32 1.442695, %v1062_v45  ;;  %v2091_v22 = vld [vmem:[#allocation14 + $0x2d0] sm:$0xff]  ;;  %v1158_v59 = vld [vmem:[#allocation14 + $0x78] sm:$0xff] }
 0x2bc   : > { %v1063_v48 = vmul.f32 1.442695, %v1061_v30  ;;  %5151 = vmatmul.mubr.msk.f32.vlgmr.msra.gmra.mrb[20].mxu0 %vm6463_vm0, %v979_v8  ;;  %v2092_v30 = vld [vmem:[#allocation14 + $0x2d8] sm:$0xff] }
 0x2bd   : > { %v6492_v55 = vld [vmem:[#allocation2 + $0xc0] sm:$0xff]  ;;  %v6494_v53 = vld [vmem:[#allocation2 + $0xc8] sm:$0xff]  ;;  %5062 = vpow2.f32 %v1065_v50  ;;  %3807 = vmatprep.mubr.f32.mxu0 %v6354_v21  ;;  %4407 = vmatpush3.bf16.msra.mxu0 %v6263_v34  ;;  %v4552_v47 = vpack.c.bf16 %v2092_v30, %v2091_v22  ;;  %v2093_v50 = vld [vmem:[#allocation14 + $0x2e0] sm:$0xff] }
 0x2be   : > { %3993 = vmatprep.mubr.f32.mxu1 %v6492_v55  ;;  %4531 = vmatpush3.bf16.msra.mxu1 %v4528_v28  ;;  %5064 = vpow2.f32 %v1063_v48  ;;  %v2087_v34 = vld [vmem:[#allocation14 + $0x2b0] sm:$0xff]  ;;  %v2094_v48 = vld [vmem:[#allocation14 + $0x2e8] sm:$0xff] }
 0x2bf   : > { %3994 = vmatmul.mubr.f32.gmra.mrb[14].mxu1 %v6494_v53  ;;  %4533 = vmatprep.subr.bf16.mxu1 %v4532_v36  ;;  %v4544_v28 = vpack.c.bf16 %v2088_v23, %v2087_v34  ;;  %v2277_v34 = vld [vmem:[#allocation14 + $0x308] sm:$0xff] }
 0x2c0   : > { %4028 = vmatprep.mubr.f32.mxu1 %v6354_v21  ;;  %3808 = vmatmul.mubr.f32.gmra.mrb[22].mxu0 %v6349_v15  ;;  %v4540_v21 = vpack.c.bf16 %v2086_v14, %v2085_v9  ;;  %v2095_v9 = vld [vmem:[#allocation14 + $0x2f0] sm:$0xff]  ;;  %v2096_v14 = vld [vmem:[#allocation14 + $0x2f8] sm:$0xff]  ;;  %v6561_v30 = vld [vmem:[#allocation2 + $0x3a] sm:$0xff] }
 0x2c1   : > { %4409 = vmatprep.subr.bf16.mxu0 %v4408_v60  ;;  %3810 = vmatprep.mubr.f32.mxu0 %v6371_v40 }
 0x2c2   : > { %4411 = vmatpush3.bf16.msra.mxu0 %v4408_v60  ;;  %v1127_v20 = vld [vmem:[#allocation2] sm:$0xff] }
 0x2c3   : > { %4029 = vmatmul.mubr.f32.vlgmr.msra.gmra.mrb[0].mxu1 %v6349_v15  ;;  %4413 = vmatprep.subr.bf16.mxu0 %v4412_v16  ;;  %v1151_v15 = vld [vmem:[#allocation14 + $0x40] sm:$0xff] }
 0x2c4   : > { %4535 = vmatpush3.bf16.msra.mxu1 %v4532_v36  ;;  %4031 = vmatprep.mubr.f32.mxu1 %v6371_v40  ;;  %v4420_v44 = vpack.c.bf16 %v1152_v25, %v1151_v15  ;;  %v1128_v15 = vld [vmem:[#allocation2 + $0x8] sm:$0xff] }
 0x2c5   : > { %4537 = vmatprep.subr.bf16.mxu1 %v4536_v3  ;;  %3811 = vmatmul.mubr.f32.gmra.mrb[24].mxu0 %v6367_v33  ;;  %v2278_v25 = vld [vmem:[#allocation14 + $0x310] sm:$0xff] }
 0x2c6   : > { %3813 = vmatprep.mubr.f32.mxu0 %v6380_v56  ;;  %4415 = vmatpush3.bf16.msra.mxu0 %v4412_v16 }
 0x2c7   : > { %v5063_v11 = vpop.eup %5062  ;;  %4032 = vmatmul.mubr.f32.gmra.mrb[2].mxu1 %v6367_v33  ;;  %4417 = vmatprep.subr.bf16.mxu0 %v4416_v24  ;;  %v2090_v33 = vld [vmem:[#allocation14 + $0x2c8] sm:$0xff] }
 0x2c8   : > { %v5065_v8 = vpop.eup %5064  ;;  %4539 = vmatpush3.bf16.msra.mxu1 %v4536_v3  ;;  %4034 = vmatprep.mubr.f32.mxu1 %v6380_v56  ;;  %v1068_v40 = vadd.f32 1.0, %v5063_v11  ;;  %v1153_v56 = vld [vmem:[#allocation14 + $0x50] sm:$0xff]  ;;  %v4548_v45 = vpack.c.bf16 %v2090_v33, %v2089_v31  ;;  %v4556_v3 = vpack.c.bf16 %v2094_v48, %v2093_v50  ;;  %v1502_v11 = vld [vmem:[#allocation14 + $0x118] sm:$0xff]  ;;  %v2280_v33 = vld [vmem:[#allocation14 + $0x320] sm:$0xff] }
 0x2c9   : > { %4541 = vmatprep.subr.bf16.mxu1 %v4540_v21  ;;  %v1067_v29 = vadd.f32 1.0, %v5065_v8  ;;  %3814 = vmatmul.mubr.f32.gmra.mrb[26].mxu0 %v6377_v52  ;;  %v4424_v36 = vpack.c.bf16 %v1154_v27, %v1153_v56  ;;  %v2279_v8 = vld [vmem:[#allocation14 + $0x318] sm:$0xff]  ;;  %v6553_v31 = vld [vmem:[#allocation2 + $0x22] sm:$0xff]  ;;  %v2284_v48 = vld [vmem:[#allocation14 + $0x340] sm:$0xff] }
 0x2ca   : > { %5066 = vrcp.f32 %v1068_v40  ;;  %3816 = vmatprep.mubr.f32.mxu0 %v6400_v6  ;;  %4419 = vmatpush3.bf16.msra.mxu0 %v4416_v24  ;;  %v1501_v24 = vld [vmem:[#allocation14 + $0x110] sm:$0xff]  ;;  %v6550_v40 = vld [vmem:[#allocation2 + $0x1a] sm:$0xff]  ;;  %v6569_v50 = vld [vmem:[#allocation2 + $0x52] sm:$0xff] }
 0x2cb   : > { %4035 = vmatmul.mubr.f32.gmra.mrb[4].mxu1 %v6377_v52  ;;  %5068 = vrcp.f32 %v1067_v29  ;;  %4421 = vmatprep.subr.bf16.mxu0 %v4420_v44  ;;  %v1155_v52 = vld [vmem:[#allocation14 + $0x60] sm:$0xff]  ;;  %v1504_v29 = vld [vmem:[#allocation14 + $0x128] sm:$0xff]  ;;  %v1505_v27 = vld [vmem:[#allocation14 + $0x130] sm:$0xff] }
 0x2cc   : > { %4543 = vmatpush3.bf16.msra.mxu1 %v4540_v21  ;;  %4037 = vmatprep.mubr.f32.mxu1 %v6400_v6  ;;  %v1081_v6 = vstv %s1080_s10  ;;  %v4428_v58 = vpack.c.bf16 %v1156_v46, %v1155_v52  ;;  %v4560_v21 = vpack.c.bf16 %v2096_v14, %v2095_v9  ;;  %v6565_v52 = vld [vmem:[#allocation2 + $0x4a] sm:$0xff] }
 0x2cd   : > { %4545 = vmatprep.subr.bf16.mxu1 %v4544_v28  ;;  %3817 = vmatmul.mubr.f32.gmra.mrb[28].mxu0 %v6390_v4  ;;  %vm6525_vm1 = vcmp.eq.s32.totalorder %v1081_v6, 1  ;;  %v1507_v6 = vld [vmem:[#allocation14 + $0x140] sm:$0xff]  ;;  %v6577_v9 = vld [vmem:[#allocation2 + $0x6a] sm:$0xff] }
 0x2ce   : > { %3819 = vmatprep.mubr.f32.mxu0 %v6414_v18  ;;  %4423 = vmatpush3.bf16.msra.mxu0 %v4420_v44  ;;  %v2281_v44 = vld [vmem:[#allocation14 + $0x328] sm:$0xff]  ;;  %v2286_v14 = vld [vmem:[#allocation14 + $0x350] sm:$0xff] }
 0x2cf   : > { %4038 = vmatmul.mubr.f32.gmra.mrb[6].mxu1 %v6390_v4  ;;  %4425 = vmatprep.subr.bf16.mxu0 %v4424_v36  ;;  %v1157_v4 = vld [vmem:[#allocation14 + $0x70] sm:$0xff]  ;;  %v4572_v22 = vpack.c.bf16 %v2281_v44, %v2280_v33  ;;  %v6601_v33 = vld [vmem:[#allocation2 + $0xb2] sm:$0xff] }
 0x2d0   : > { %4547 = vmatpush3.bf16.msra.mxu1 %v4544_v28  ;;  %4040 = vmatprep.mubr.f32.mxu1 %v6414_v18  ;;  %v4432_v16 = vpack.c.bf16 %v1158_v59, %v1157_v4  ;;  %v4440_v28 = vpack.c.bf16 %v1502_v11, %v1501_v24  ;;  %v6573_v4 = vld [vmem:[#allocation2 + $0x62] sm:$0xff]  ;;  %v2470_v44 = vld [vmem:[#allocation14 + $0x380] sm:$0xff] }
 0x2d1   : > { %4549 = vmatprep.subr.bf16.mxu1 %v4548_v45  ;;  %3820 = vmatmul.mubr.f32.gmra.mrb[30].mxu0 %v6404_v13  ;;  %v1513_v11 = vld [vmem:[#allocation14 + $0x170] sm:$0xff] }
 0x2d2   : > { %3822 = vmatprep.mubr.f32.mxu0 %v6425_v32  ;;  %4427 = vmatpush3.bf16.msra.mxu0 %v4424_v36  ;;  %v2283_v36 = vld [vmem:[#allocation14 + $0x338] sm:$0xff] }
 0x2d3   : > { %4041 = vmatmul.mubr.f32.gmra.mrb[8].mxu1 %v6404_v13  ;;  %4429 = vmatprep.subr.bf16.mxu0 %v4428_v58 }
 0x2d4   : > { %v5067_v60 = vpop.eup %5066  ;;  %4551 = vmatpush3.bf16.msra.mxu1 %v4548_v45  ;;  %4043 = vmatprep.mubr.f32.mxu1 %v6425_v32  ;;  %v1506_v45 = vld [vmem:[#allocation14 + $0x138] sm:$0xff] }
 0x2d5   : > { %v5069_v57 = vpop.eup %5068  ;;  %v6531_v2 = vmul.f32 %v5067_v60, %v6472_v42  ;;  %4553 = vmatprep.subr.bf16.mxu1 %v4552_v47  ;;  %3823 = vmatmul.mubr.f32.gmra.mrb[32].mxu0 %v6418_v38  ;;  %v1499_v42 = vld [vmem:[#allocation14 + $0x100] sm:$0xff]  ;;  %v4448_v46 = vpack.c.bf16 %v1506_v45, %v1505_v27  ;;  %v1509_v60 = vld [vmem:[#allocation14 + $0x150] sm:$0xff] }
 0x2d6   : > { %v6534_v13 = vmul.f32 %v5069_v57, %v6480_v35  ;;  %3825 = vmatprep.mubr.f32.mxu0 %v6438_v39  ;;  %4431 = vmatpush3.bf16.msra.mxu0 %v4428_v58  ;;  %v4436_v23 = vpack.c.bf16 %v1500_v5, %v1499_v42  ;;  %v2285_v58 = vld [vmem:[#allocation14 + $0x348] sm:$0xff]  ;;  %v1510_v57 = vld [vmem:[#allocation14 + $0x158] sm:$0xff]  ;;  %v1511_v5 = vld [vmem:[#allocation14 + $0x160] sm:$0xff] }
 0x2d7   : > { %v1084_v32 = vsel %vm6525_vm1, %v6531_v2, 0.0  ;;  %4044 = vmatmul.mubr.f32.gmra.mrb[10].mxu1 %v6418_v38  ;;  %4433 = vmatprep.subr.bf16.mxu0 %v4432_v16  ;;  %v2276_v38 = vld [vmem:[#allocation14 + $0x300] sm:$0xff]  ;;  %v4456_v42 = vpack.c.bf16 %v1510_v57, %v1509_v60  ;;  %v6605_v27 = vld [vmem:[#allocation2 + $0xc2] sm:$0xff]  ;;  %v2485_v57 = vld [vmem:[#allocation14 + $0x3f8] sm:$0xff] }
 0x2d8   : > { %1106 = vst [vmem:[#allocation2 + $0xe1] sm:$0xff] %v1084_v32  ;;  %v1083_v35 = vsel %vm6525_vm1, %v6534_v13, 0.0  ;;  %4555 = vmatpush3.bf16.msra.mxu1 %v4552_v47  ;;  %4046 = vmatprep.mubr.f32.mxu1 %v6438_v39  ;;  %v4564_v39 = vpack.c.bf16 %v2277_v34, %v2276_v38  ;;  %v1508_v47 = vld [vmem:[#allocation14 + $0x148] sm:$0xff]  ;;  %v2288_v38 = vld [vmem:[#allocation14 + $0x360] sm:$0xff] }
 0x2d9   : > { %1105 = vst [vmem:[#allocation2 + $0xd9] sm:$0xff] %v1083_v35  ;;  %4557 = vmatprep.subr.bf16.mxu1 %v4556_v3  ;;  %3826 = vmatmul.mubr.f32.gmra.mrb[34].mxu0 %v6428_v49  ;;  %v4452_v59 = vpack.c.bf16 %v1508_v47, %v1507_v6  ;;  %v6581_v32 = vld [vmem:[#allocation2 + $0x7a] sm:$0xff]  ;;  %v1482_v45 = vld [vmem:[#allocation2 + $0x2] sm:$0xff]  ;;  %v1483_v6 = vld [vmem:[#allocation2 + $0xa] sm:$0xff] }
 0x2da   : > { %3860 = vmatprep.mubr.f32.mxu0 %v1127_v20  ;;  %4435 = vmatpush3.bf16.msra.mxu0 %v4432_v16  ;;  %v2287_v16 = vld [vmem:[#allocation14 + $0x358] sm:$0xff]  ;;  %v1512_v35 = vld [vmem:[#allocation14 + $0x168] sm:$0xff] }
 0x2db   : > { %4047 = vmatmul.mubr.f32.gmra.mrb[12].mxu1 %v6428_v49  ;;  %4437 = vmatprep.subr.bf16.mxu0 %v4436_v23  ;;  %v1503_v49 = vld [vmem:[#allocation14 + $0x120] sm:$0xff]  ;;  %v4584_v20 = vpack.c.bf16 %v2287_v16, %v2286_v14  ;;  %v2289_v34 = vld [vmem:[#allocation14 + $0x368] sm:$0xff]  ;;  %v4460_v24 = vpack.c.bf16 %v1512_v35, %v1511_v5 }
 0x2dc   : > { %4559 = vmatpush3.bf16.msra.mxu1 %v4556_v3  ;;  %4049 = vmatprep.mubr.f32.mxu1 %v6454_v7  ;;  %v4568_v7 = vpack.c.bf16 %v2279_v8, %v2278_v25  ;;  %v4444_v56 = vpack.c.bf16 %v1504_v29, %v1503_v49  ;;  %v4580_v3 = vpack.c.bf16 %v2285_v58, %v2284_v48  ;;  %v6593_v25 = vld [vmem:[#allocation2 + $0x9a] sm:$0xff]  ;;  %v2290_v8 = vld [vmem:[#allocation14 + $0x370] sm:$0xff]  ;;  %v2453_v5 = vld [vmem:[#allocation2 + $0x31] sm:$0xff] }
 0x2dd   : > { %4561 = vmatprep.subr.bf16.mxu1 %v4560_v21  ;;  %3861 = vmatmul.mubr.f32.vlgmr.msra.gmra.mrb[20].mxu0 %v1128_v15  ;;  %v4588_v15 = vpack.c.bf16 %v2289_v34, %v2288_v38  ;;  %v6597_v49 = vld [vmem:[#allocation2 + $0xaa] sm:$0xff]  ;;  %v2475_v48 = vld [vmem:[#allocation14 + $0x3a8] sm:$0xff]  ;;  %v2668_v38 = vld [vmem:[#allocation14 + $0x420] sm:$0xff] }
 0x2de   : > { %3863 = vmatprep.mubr.f32.mxu0 %v6383_v61  ;;  %4439 = vmatpush3.bf16.msra.mxu0 %v4436_v23  ;;  %v2282_v61 = vld [vmem:[#allocation14 + $0x330] sm:$0xff]  ;;  %v6589_v23 = vld [vmem:[#allocation2 + $0x92] sm:$0xff]  ;;  %v2483_v60 = vld [vmem:[#allocation14 + $0x3e8] sm:$0xff] }
 0x2df   : > { %4050 = vmatmul.mubr.f32.gmra.mrb[14].mxu1 %v6450_v62  ;;  %v6557_v62 = vld [vmem:[#allocation2 + $0x32] sm:$0xff]  ;;  %4441 = vmatprep.subr.bf16.mxu0 %v4440_v28  ;;  %v2669_v34 = vld [vmem:[#allocation14 + $0x428] sm:$0xff] }
 0x2e0   : > { %4563 = vmatpush3.bf16.msra.mxu1 %v4560_v21  ;;  %4084 = vmatprep.mubr.f32.mxu1 %v6550_v40  ;;  %v6585_v21 = vld [vmem:[#allocation2 + $0x82] sm:$0xff]  ;;  %v2273_v14 = vld [vmem:[#allocation2 + $0xd8] sm:$0xff] }
 0x2e1   : > { %4565 = vmatprep.subr.bf16.mxu1 %v4564_v39  ;;  %3864 = vmatmul.mubr.f32.gmra.mrb[22].mxu0 %v6385_v63  ;;  %v4576_v63 = vpack.c.bf16 %v2283_v36, %v2282_v61  ;;  %v6609_v61 = vld [vmem:[#allocation2 + $0xca] sm:$0xff]  ;;  %v2274_v16 = vld [vmem:[#allocation2 + $0xe0] sm:$0xff] }
 0x2e2   : > { %3866 = vmatprep.mubr.f32.mxu0 %v6395_v10  ;;  %4443 = vmatpush3.bf16.msra.mxu0 %v4440_v28  ;;  %v2291_v28 = vld [vmem:[#allocation14 + $0x378] sm:$0xff]  ;;  %v2472_v36 = vld [vmem:[#allocation14 + $0x390] sm:$0xff]  ;;  %v2661_v18 = vld [vmem:[#allocation2 + $0xda] sm:$0xff] }
 0x2e3   : > { %4085 = vmatmul.mubr.f32.vlgmr.msra.gmra.mrb[0].mxu1 %v6553_v31  ;;  %4445 = vmatprep.subr.bf16.mxu0 %v4444_v56 }
 0x2e4   : > { %4567 = vmatpush3.bf16.msra.mxu1 %v4564_v39  ;;  %4087 = vmatprep.mubr.f32.mxu1 %v6557_v62  ;;  %v1514_v39 = vld [vmem:[#allocation14 + $0x178] sm:$0xff] }
 0x2e5   : > { %4569 = vmatprep.subr.bf16.mxu1 %v4568_v7  ;;  %3867 = vmatmul.mubr.f32.gmra.mrb[24].mxu0 %v6397_v12  ;;  %v4464_v29 = vpack.c.bf16 %v1514_v39, %v1513_v11  ;;  %v2456_v11 = vld [vmem:[#allocation2 + $0x51] sm:$0xff]  ;;  %v2670_v39 = vld [vmem:[#allocation14 + $0x430] sm:$0xff] }
 0x2e6   : > { %3869 = vmatprep.mubr.f32.mxu0 %v6409_v41  ;;  %4447 = vmatpush3.bf16.msra.mxu0 %v4444_v56  ;;  %v2471_v56 = vld [vmem:[#allocation14 + $0x388] sm:$0xff] }
 0x2e7   : > { %4088 = vmatmul.mubr.f32.gmra.mrb[2].mxu1 %v6561_v30  ;;  %4449 = vmatprep.subr.bf16.mxu0 %v4448_v46 }
 0x2e8   : > { %4571 = vmatpush3.bf16.msra.mxu1 %v4568_v7  ;;  %4090 = vmatprep.mubr.f32.mxu1 %v6565_v52  ;;  %v4592_v7 = vpack.c.bf16 %v2291_v28, %v2290_v8  ;;  %v2457_v8 = vld [vmem:[#allocation2 + $0x61] sm:$0xff] }
 0x2e9   : > { %4573 = vmatprep.subr.bf16.mxu1 %v4572_v22  ;;  %3870 = vmatmul.mubr.f32.gmra.mrb[26].mxu0 %v6411_v26 }
 0x2ea   : > { %3872 = vmatprep.mubr.f32.mxu0 %v6430_v51  ;;  %4451 = vmatpush3.bf16.msra.mxu0 %v4448_v46  ;;  %v2473_v46 = vld [vmem:[#allocation14 + $0x398] sm:$0xff] }
 0x2eb   : > { %4091 = vmatmul.mubr.f32.gmra.mrb[4].mxu1 %v6569_v50  ;;  %4453 = vmatprep.subr.bf16.mxu0 %v4452_v59  ;;  %v4600_v47 = vpack.c.bf16 %v2473_v46, %v2472_v36  ;;  %v2674_v36 = vld [vmem:[#allocation14 + $0x450] sm:$0xff]  ;;  %v2675_v46 = vld [vmem:[#allocation14 + $0x458] sm:$0xff] }
 0x2ec   : > { %4575 = vmatpush3.bf16.msra.mxu1 %v4572_v22  ;;  %4093 = vmatprep.mubr.f32.mxu1 %v6573_v4  ;;  %v4596_v22 = vpack.c.bf16 %v2471_v56, %v2470_v44  ;;  %v2673_v44 = vld [vmem:[#allocation14 + $0x448] sm:$0xff] }
 0x2ed   : > { %4577 = vmatprep.subr.bf16.mxu1 %v4576_v63  ;;  %3873 = vmatmul.mubr.f32.gmra.mrb[28].mxu0 %v6432_v54  ;;  %v2459_v56 = vld [vmem:[#allocation2 + $0x79] sm:$0xff] }
 0x2ee   : > { %3875 = vmatprep.mubr.f32.mxu0 %v6444_v0  ;;  %4455 = vmatpush3.bf16.msra.mxu0 %v4452_v59  ;;  %v2477_v59 = vld [vmem:[#allocation14 + $0x3b8] sm:$0xff] }
 0x2ef   : > { %4094 = vmatmul.mubr.f32.gmra.mrb[6].mxu1 %v6577_v9  ;;  %4457 = vmatprep.subr.bf16.mxu0 %v4456_v42 }
 0x2f0   : > { %4579 = vmatpush3.bf16.msra.mxu1 %v4576_v63  ;;  %4096 = vmatprep.mubr.f32.mxu1 %v6581_v32  ;;  %v2474_v63 = vld [vmem:[#allocation14 + $0x3a0] sm:$0xff] }
 0x2f1   : > { %4581 = vmatprep.subr.bf16.mxu1 %v4580_v3  ;;  %3876 = vmatmul.mubr.f32.gmra.mrb[30].mxu0 %v6446_v1  ;;  %v4604_v58 = vpack.c.bf16 %v2475_v48, %v2474_v63  ;;  %v2462_v63 = vld [vmem:[#allocation2 + $0x99] sm:$0xff] }
 0x2f2   : > { %3878 = vmatprep.mubr.f32.mxu0 %v6457_v17  ;;  %4459 = vmatpush3.bf16.msra.mxu0 %v4456_v42  ;;  %v2666_v42 = vld [vmem:[#allocation14 + $0x410] sm:$0xff]  ;;  %v2676_v48 = vld [vmem:[#allocation14 + $0x460] sm:$0xff] }
 0x2f3   : > { %4097 = vmatmul.mubr.f32.gmra.mrb[8].mxu1 %v6585_v21  ;;  %4461 = vmatprep.subr.bf16.mxu0 %v4460_v24 }
 0x2f4   : > { %4583 = vmatpush3.bf16.msra.mxu1 %v4580_v3  ;;  %4099 = vmatprep.mubr.f32.mxu1 %v6589_v23  ;;  %v2665_v3 = vld [vmem:[#allocation14 + $0x408] sm:$0xff] }
 0x2f5   : > { %4585 = vmatprep.subr.bf16.mxu1 %v4584_v20  ;;  %3879 = vmatmul.mubr.f32.gmra.mrb[32].mxu0 %v6459_v19 }
 0x2f6   : > { %3881 = vmatprep.mubr.f32.mxu0 %v6475_v37  ;;  %4463 = vmatpush3.bf16.msra.mxu0 %v4460_v24  ;;  %v4636_v24 = vpack.c.bf16 %v2669_v34, %v2668_v38 }
 0x2f7   : > { %4100 = vmatmul.mubr.f32.gmra.mrb[10].mxu1 %v6593_v25  ;;  %4465 = vmatprep.subr.bf16.mxu0 %v4464_v29 }
 0x2f8   : > { %4587 = vmatpush3.bf16.msra.mxu1 %v4584_v20  ;;  %4102 = vmatprep.mubr.f32.mxu1 %v6597_v49  ;;  %v2454_v20 = vld [vmem:[#allocation2 + $0x39] sm:$0xff] }
 0x2f9   : > { %4589 = vmatprep.subr.bf16.mxu1 %v4588_v15  ;;  %3882 = vmatmul.mubr.f32.gmra.mrb[34].mxu0 %v6477_v43 }
 0x2fa   : > { %4467 = vmatpush3.bf16.msra.mxu0 %v4464_v29  ;;  %3916 = vmatprep.mubr.f32.mxu0 %v1482_v45  ;;  %v2458_v29 = vld [vmem:[#allocation2 + $0x69] sm:$0xff] }
 0x2fb   : > { %4103 = vmatmul.mubr.f32.gmra.mrb[12].mxu1 %v6601_v33 }
 0x2fc   : > { %4591 = vmatpush3.bf16.msra.mxu1 %v4588_v15  ;;  %4105 = vmatprep.mubr.f32.mxu1 %v6605_v27  ;;  %v2671_v15 = vld [vmem:[#allocation14 + $0x438] sm:$0xff] }
 0x2fd   : > { %4593 = vmatprep.subr.bf16.mxu1 %v4592_v7  ;;  %3917 = vmatmul.mubr.f32.vlgmr.msra.gmra.mrb[20].mxu0 %v1483_v6  ;;  %v4640_v28 = vpack.c.bf16 %v2671_v15, %v2670_v39  ;;  %v2461_v6 = vld [vmem:[#allocation2 + $0x91] sm:$0xff] }
 0x2fe   : > { %3919 = vmatprep.mubr.f32.mxu0 %v6550_v40  ;;  %v2479_v40 = vld [vmem:[#allocation14 + $0x3c8] sm:$0xff] }
 0x2ff   : > { %4106 = vmatmul.mubr.f32.gmra.mrb[14].mxu1 %v6609_v61 }
 0x300   : > { %4595 = vmatpush3.bf16.msra.mxu1 %v4592_v7  ;;  %4140 = vmatprep.mubr.f32.mxu1 %v6395_v10  ;;  %v2476_v10 = vld [vmem:[#allocation14 + $0x3b0] sm:$0xff]  ;;  %v2672_v7 = vld [vmem:[#allocation14 + $0x440] sm:$0xff] }
 0x301   : > { %4597 = vmatprep.subr.bf16.mxu1 %v4596_v22  ;;  %3920 = vmatmul.mubr.f32.gmra.mrb[22].mxu0 %v6553_v31  ;;  %v2481_v31 = vld [vmem:[#allocation14 + $0x3d8] sm:$0xff]  ;;  %v4644_v45 = vpack.c.bf16 %v2673_v44, %v2672_v7 }
 0x302   : > { %3922 = vmatprep.mubr.f32.mxu0 %v6557_v62 }
 0x303   : > { %4141 = vmatmul.mubr.f32.vlgmr.msra.gmra.mrb[0].mxu1 %v6397_v12  ;;  %v4608_v12 = vpack.c.bf16 %v2477_v59, %v2476_v10  ;;  %v2463_v10 = vld [vmem:[#allocation2 + $0xa9] sm:$0xff] }
 0x304   : > { %4599 = vmatpush3.bf16.msra.mxu1 %v4596_v22  ;;  %4143 = vmatprep.mubr.f32.mxu1 %v6409_v41  ;;  %v2478_v41 = vld [vmem:[#allocation14 + $0x3c0] sm:$0xff]  ;;  %v2460_v22 = vld [vmem:[#allocation2 + $0x81] sm:$0xff] }
 0x305   : > { %4601 = vmatprep.subr.bf16.mxu1 %v4600_v47  ;;  %3923 = vmatmul.mubr.f32.gmra.mrb[24].mxu0 %v6561_v30 }
 0x306   : > { %3925 = vmatprep.mubr.f32.mxu0 %v6565_v52 }
 0x307   : > { %4144 = vmatmul.mubr.f32.gmra.mrb[2].mxu1 %v6411_v26  ;;  %v4612_v26 = vpack.c.bf16 %v2479_v40, %v2478_v41  ;;  %v2678_v41 = vld [vmem:[#allocation14 + $0x470] sm:$0xff]  ;;  %v2679_v40 = vld [vmem:[#allocation14 + $0x478] sm:$0xff] }
 0x308   : > { %4603 = vmatpush3.bf16.msra.mxu1 %v4600_v47  ;;  %4146 = vmatprep.mubr.f32.mxu1 %v6430_v51  ;;  %v2480_v51 = vld [vmem:[#allocation14 + $0x3d0] sm:$0xff]  ;;  %v4648_v47 = vpack.c.bf16 %v2675_v46, %v2674_v36 }
 0x309   : > { %4605 = vmatprep.subr.bf16.mxu1 %v4604_v58  ;;  %3926 = vmatmul.mubr.f32.gmra.mrb[26].mxu0 %v6569_v50 }
 0x30a   : > { %3928 = vmatprep.mubr.f32.mxu0 %v6573_v4 }
 0x30b   : > { %4147 = vmatmul.mubr.f32.gmra.mrb[4].mxu1 %v6432_v54  ;;  %v4616_v54 = vpack.c.bf16 %v2481_v31, %v2480_v51  ;;  %v4656_v51 = vpack.c.bf16 %v2679_v40, %v2678_v41  ;;  %v2466_v31 = vld [vmem:[#allocation2 + $0xc9] sm:$0xff] }
 0x30c   : > { %4607 = vmatpush3.bf16.msra.mxu1 %v4604_v58  ;;  %4149 = vmatprep.mubr.f32.mxu1 %v6444_v0  ;;  %v2482_v0 = vld [vmem:[#allocation14 + $0x3e0] sm:$0xff]  ;;  %v2677_v58 = vld [vmem:[#allocation14 + $0x468] sm:$0xff] }
 0x30d   : > { %4609 = vmatprep.subr.bf16.mxu1 %v4608_v12  ;;  %3929 = vmatmul.mubr.f32.gmra.mrb[28].mxu0 %v6577_v9  ;;  %v4652_v59 = vpack.c.bf16 %v2677_v58, %v2676_v48 }
 0x30e   : > { %3931 = vmatprep.mubr.f32.mxu0 %v6581_v32 }
 0x30f   : > { %4150 = vmatmul.mubr.f32.gmra.mrb[6].mxu1 %v6446_v1  ;;  %v4620_v1 = vpack.c.bf16 %v2483_v60, %v2482_v0  ;;  %v6672_v60 = vld [vmem:[#allocation15] ss:$0 sm:$0xff] }
 0x310   : > { %4611 = vmatpush3.bf16.msra.mxu1 %v4608_v12  ;;  %4152 = vmatprep.mubr.f32.mxu1 %v6457_v17  ;;  %v2484_v17 = vld [vmem:[#allocation14 + $0x3f0] sm:$0xff]  ;;  %v2464_v12 = vld [vmem:[#allocation2 + $0xb1] sm:$0xff] }
 0x311   : > { %4613 = vmatprep.subr.bf16.mxu1 %v4612_v26  ;;  %3932 = vmatmul.mubr.f32.gmra.mrb[30].mxu0 %v6585_v21 }
 0x312   : > { %3934 = vmatprep.mubr.f32.mxu0 %v6589_v23 }
 0x313   : > { %4153 = vmatmul.mubr.f32.gmra.mrb[8].mxu1 %v6459_v19  ;;  %v4624_v19 = vpack.c.bf16 %v2485_v57, %v2484_v17  ;;  %v6674_v57 = vld [vmem:[#allocation17] ss:$0 sm:$0xff] }
 0x314   : > { %4615 = vmatpush3.bf16.msra.mxu1 %v4612_v26  ;;  %4155 = vmatprep.mubr.f32.mxu1 %v6475_v37  ;;  %v2664_v37 = vld [vmem:[#allocation14 + $0x400] sm:$0xff]  ;;  %v2465_v26 = vld [vmem:[#allocation2 + $0xc1] sm:$0xff] }
 0x315   : > { %4617 = vmatprep.subr.bf16.mxu1 %v4616_v54  ;;  %3935 = vmatmul.mubr.f32.gmra.mrb[32].mxu0 %v6593_v25 }
 0x316   : > { %3937 = vmatprep.mubr.f32.mxu0 %v6597_v49 }
 0x317   : > { %4156 = vmatmul.mubr.f32.gmra.mrb[10].mxu1 %v6477_v43  ;;  %v4628_v43 = vpack.c.bf16 %v2665_v3, %v2664_v37 }
 0x318   : > { %4619 = vmatpush3.bf16.msra.mxu1 %v4616_v54  ;;  %4158 = vmatprep.mubr.f32.mxu1 %v6492_v55  ;;  %v2667_v55 = vld [vmem:[#allocation14 + $0x418] sm:$0xff] }
 0x319   : > { %4621 = vmatprep.subr.bf16.mxu1 %v4620_v1  ;;  %3938 = vmatmul.mubr.f32.gmra.mrb[34].mxu0 %v6601_v33  ;;  %v4632_v35 = vpack.c.bf16 %v2667_v55, %v2666_v42 }
 0x31b   : > { %4159 = vmatmul.mubr.f32.gmra.mrb[12].mxu1 %v6494_v53  ;;  %v2455_v53 = vld [vmem:[#allocation2 + $0x49] sm:$0xff] }
 0x31c   : > { %4623 = vmatpush3.bf16.msra.mxu1 %v4620_v1  ;;  %4161 = vmatprep.mubr.f32.mxu1 %v2273_v14 }
 0x31d   : > { %4625 = vmatprep.subr.bf16.mxu1 %v4624_v19 }
 0x31f   : > { %4162 = vmatmul.mubr.f32.gmra.mrb[14].mxu1 %v2274_v16 }
 0x320   : > { %4627 = vmatpush3.bf16.msra.mxu1 %v4624_v19  ;;  %4196 = vmatprep.mubr.f32.mxu1 %v2453_v5 }
 0x321   : > { %4629 = vmatprep.subr.bf16.mxu1 %v4628_v43 }
 0x323   : > { %4197 = vmatmul.mubr.f32.vlgmr.msra.gmra.mrb[0].mxu1 %v2454_v20 }
 0x324   : > { %4631 = vmatpush3.bf16.msra.mxu1 %v4628_v43  ;;  %4199 = vmatprep.mubr.f32.mxu1 %v2455_v53 }
 0x325   : > { %4633 = vmatprep.subr.bf16.mxu1 %v4632_v35 }
 0x327   : > { %4200 = vmatmul.mubr.f32.gmra.mrb[2].mxu1 %v2456_v11 }
 0x328   : > { %4635 = vmatpush3.bf16.msra.mxu1 %v4632_v35  ;;  %4202 = vmatprep.mubr.f32.mxu1 %v2457_v8 }
 0x329   : > { %4637 = vmatprep.subr.bf16.mxu1 %v4636_v24 }
 0x32b   : > { %4203 = vmatmul.mubr.f32.gmra.mrb[4].mxu1 %v2458_v29 }
 0x32c   : > { %4639 = vmatpush3.bf16.msra.mxu1 %v4636_v24  ;;  %4205 = vmatprep.mubr.f32.mxu1 %v2459_v56 }
 0x32d   : > { %4641 = vmatprep.subr.bf16.mxu1 %v4640_v28 }
 0x32f   : > { %4206 = vmatmul.mubr.f32.gmra.mrb[6].mxu1 %v2460_v22 }
 0x330   : > { %4643 = vmatpush3.bf16.msra.mxu1 %v4640_v28  ;;  %4208 = vmatprep.mubr.f32.mxu1 %v2461_v6 }
 0x331   : > { %4645 = vmatprep.subr.bf16.mxu1 %v4644_v45 }
 0x333   : > { %4209 = vmatmul.mubr.f32.gmra.mrb[8].mxu1 %v2462_v63 }
 0x334   : > { %4647 = vmatpush3.bf16.msra.mxu1 %v4644_v45  ;;  %4211 = vmatprep.mubr.f32.mxu1 %v2463_v10 }
 0x335   : > { %4649 = vmatprep.subr.bf16.mxu1 %v4648_v47 }
 0x337   : > { %4212 = vmatmul.mubr.f32.gmra.mrb[10].mxu1 %v2464_v12 }
 0x338   : > { %4651 = vmatpush3.bf16.msra.mxu1 %v4648_v47  ;;  %4214 = vmatprep.mubr.f32.mxu1 %v2465_v26 }
 0x339   : > { %4653 = vmatprep.subr.bf16.mxu1 %v4652_v59 }
 0x33b   : > { %4215 = vmatmul.mubr.f32.gmra.mrb[12].mxu1 %v2466_v31 }
 0x33c   : > { %4655 = vmatpush3.bf16.msra.mxu1 %v4652_v59  ;;  %5152 = vmatprep.mubr.msk.f32.mxu1 %vm6525_vm1, %v6534_v13 }
 0x33d   : > { %4657 = vmatprep.subr.bf16.mxu1 %v4656_v51 }
 0x33f   : > { %5153 = vmatmul.mubr.msk.f32.gmra.mrb[14].mxu1 %vm6525_vm1, %v6531_v2  ;;  %v2662_v2 = vld [vmem:[#allocation2 + $0xe2] sm:$0xff] }
 0x340   : > { %4659 = vmatpush3.bf16.msra.mxu1 %v4656_v51  ;;  %4252 = vmatprep.mubr.f32.mxu1 %v6557_v62 }
 0x343   : > { %4253 = vmatmul.mubr.f32.vlgmr.msra.gmra.mrb[0].mxu1 %v6561_v30 }
 0x344   : > { %4255 = vmatprep.mubr.f32.mxu1 %v6565_v52 }
 0x347   : > { %4256 = vmatmul.mubr.f32.gmra.mrb[2].mxu1 %v6569_v50 }
 0x348   : > { %4258 = vmatprep.mubr.f32.mxu1 %v6573_v4 }
 0x34b   : > { %4259 = vmatmul.mubr.f32.gmra.mrb[4].mxu1 %v6577_v9 }
 0x34c   : > { %4261 = vmatprep.mubr.f32.mxu1 %v6581_v32 }
 0x34f   : > { %4262 = vmatmul.mubr.f32.gmra.mrb[6].mxu1 %v6585_v21 }
 0x350   : > { %4264 = vmatprep.mubr.f32.mxu1 %v6589_v23 }
 0x353   : > { %4265 = vmatmul.mubr.f32.gmra.mrb[8].mxu1 %v6593_v25 }
 0x354   : > { %4267 = vmatprep.mubr.f32.mxu1 %v6597_v49 }
 0x357   : > { %4268 = vmatmul.mubr.f32.gmra.mrb[10].mxu1 %v6601_v33 }
 0x358   : > { %4270 = vmatprep.mubr.f32.mxu1 %v6605_v27 }
 0x35b   : > { %4271 = vmatmul.mubr.f32.gmra.mrb[12].mxu1 %v6609_v61 }
 0x35c   : > { %4273 = vmatprep.mubr.f32.mxu1 %v2661_v18 }
 0x35f   : > { %4274 = vmatmul.mubr.f32.gmra.mrb[14].mxu1 %v2662_v2 }
 0x3d0   : > { %v3918_v13 = vpop.f32.mrb[20].mxu0 }
 0x3d1   : > { %v1581_v62 = vpop.f32.mrb[21].mxu0 }
 0x3d4   : > { %v3921_v30 = vpop.f32.mrb[22].mxu0 }
 0x3d5   : > { %v1591_v52 = vpop.f32.mrb[23].mxu0 }
 0x3d8   : > { %v3924_v50 = vpop.f32.mrb[24].mxu0 }
 0x3d9   : > { %v1601_v4 = vpop.f32.mrb[25].mxu0 }
 0x3dc   : > { %v3927_v9 = vpop.f32.mrb[26].mxu0 }
 0x3dd   : > { %v1611_v32 = vpop.f32.mrb[27].mxu0 }
 0x3e0   : > { %v3930_v21 = vpop.f32.mrb[28].mxu0 }
 0x3e1   : > { %v1621_v23 = vpop.f32.mrb[29].mxu0 }
 0x3e4   : > { %v6660_v25 = vpop.f32.mrb[30].mxu0 }
 0x3e5   : > { %v6662_v49 = vpop.f32.mrb[31].mxu0 }
 0x3e8   : > { %v6664_v33 = vpop.f32.mrb[32].mxu0 }
 0x3e9   : > { %v6666_v27 = vpop.f32.mrb[33].mxu0 }
 0x3ec   : > { %v6668_v61 = vpop.f32.mrb[34].mxu0 }
 0x3ed   : > { %v6670_v54 = vpop.f32.mrb[35].mxu0 }
 0x416   : > { %v4254_v0 = vpop.f32.mrb[0].mxu1 }
 0x417   : > { %v4660_v1 = vadd.f32 %v4254_v0, %v3918_v13  ;;  %v2746_v17 = vpop.f32.mrb[1].mxu1 }
 0x418   : > { %v4661_v19 = vadd.f32 %v2746_v17, %v1581_v62 }
 0x419   : > { %v2849_v37 = vmul.f32 %v4660_v1, %v6672_v60 }
 0x41a   : > { %v2848_v3 = vmul.f32 %v4661_v19, %v6672_v60  ;;  %v4257_v14 = vpop.f32.mrb[2].mxu1 }
 0x41b   : > { %v6679_v43 = vadd.f32 %v6674_v57, %v2849_v37  ;;  %v4662_v16 = vadd.f32 %v4257_v14, %v3921_v30  ;;  %v2756_v42 = vpop.f32.mrb[3].mxu1 }
 0x41c   : > { %v6682_v55 = vadd.f32 %v6674_v57, %v2848_v3  ;;  %v4663_v5 = vadd.f32 %v2756_v42, %v1591_v52 }
 0x41d   : > { %v2888_v35 = vsub.f32 0.0, %v6679_v43  ;;  %v2851_v20 = vmul.f32 %v4662_v16, %v6672_v60 }
 0x41e   : > { %v2887_v38 = vsub.f32 0.0, %v6682_v55  ;;  %v2850_v34 = vmul.f32 %v4663_v5, %v6672_v60  ;;  %v4260_v53 = vpop.f32.mrb[4].mxu1 }
 0x41f   : > { %v2905_v24 = vmul.f32 1.442695, %v2888_v35  ;;  %v6689_v11 = vadd.f32 %v6674_v57, %v2851_v20  ;;  %v4664_v39 = vadd.f32 %v4260_v53, %v3924_v50  ;;  %v2766_v15 = vpop.f32.mrb[5].mxu1 }
 0x420   : > { %v2903_v8 = vmul.f32 1.442695, %v2887_v38  ;;  %v6692_v28 = vadd.f32 %v6674_v57, %v2850_v34  ;;  %v4665_v29 = vadd.f32 %v2766_v15, %v1601_v4 }
 0x421   : > { %5070 = vpow2.f32 %v2905_v24  ;;  %v2890_v7 = vsub.f32 0.0, %v6689_v11  ;;  %v2853_v44 = vmul.f32 %v4664_v39, %v6672_v60 }
 0x422   : > { %5072 = vpow2.f32 %v2903_v8  ;;  %v2889_v56 = vsub.f32 0.0, %v6692_v28  ;;  %v2852_v45 = vmul.f32 %v4665_v29, %v6672_v60  ;;  %v4263_v22 = vpop.f32.mrb[6].mxu1 }
 0x423   : > { %v2909_v36 = vmul.f32 1.442695, %v2890_v7  ;;  %v6699_v46 = vadd.f32 %v6674_v57, %v2853_v44  ;;  %v4666_v6 = vadd.f32 %v4263_v22, %v3927_v9  ;;  %v2776_v47 = vpop.f32.mrb[7].mxu1 }
 0x424   : > { %v2907_v63 = vmul.f32 1.442695, %v2889_v56  ;;  %v6702_v48 = vadd.f32 %v6674_v57, %v2852_v45  ;;  %v4667_v58 = vadd.f32 %v2776_v47, %v1611_v32 }
 0x425   : > { %5074 = vpow2.f32 %v2909_v36  ;;  %v2892_v10 = vsub.f32 0.0, %v6699_v46  ;;  %v2855_v59 = vmul.f32 %v4666_v6, %v6672_v60 }
 0x426   : > { %5076 = vpow2.f32 %v2907_v63  ;;  %v2891_v12 = vsub.f32 0.0, %v6702_v48  ;;  %v2854_v41 = vmul.f32 %v4667_v58, %v6672_v60  ;;  %v4266_v40 = vpop.f32.mrb[8].mxu1 }
 0x427   : > { %v2913_v26 = vmul.f32 1.442695, %v2892_v10  ;;  %v6709_v51 = vadd.f32 %v6674_v57, %v2855_v59  ;;  %v4668_v31 = vadd.f32 %v4266_v40, %v3930_v21  ;;  %v2786_v18 = vpop.f32.mrb[9].mxu1 }
 0x428   : > { %v2911_v2 = vmul.f32 1.442695, %v2891_v12  ;;  %v6712_v13 = vadd.f32 %v6674_v57, %v2854_v41  ;;  %v4669_v62 = vadd.f32 %v2786_v18, %v1621_v23 }
 0x429   : > { %5078 = vpow2.f32 %v2913_v26  ;;  %v2894_v30 = vsub.f32 0.0, %v6709_v51  ;;  %v2857_v52 = vmul.f32 %v4668_v31, %v6672_v60 }
 0x42a   : > { %5080 = vpow2.f32 %v2911_v2  ;;  %v2893_v50 = vsub.f32 0.0, %v6712_v13  ;;  %v2856_v4 = vmul.f32 %v4669_v62, %v6672_v60  ;;  %v4269_v9 = vpop.f32.mrb[10].mxu1 }
 0x42b   : > { %v5071_v32 = vpop.eup %5070  ;;  %v2917_v0 = vmul.f32 1.442695, %v2894_v30  ;;  %v6719_v21 = vadd.f32 %v6674_v57, %v2857_v52  ;;  %v4670_v1 = vadd.f32 %v4269_v9, %v6660_v25  ;;  %v2796_v17 = vpop.f32.mrb[11].mxu1 }
 0x42c   : > { %v5073_v23 = vpop.eup %5072  ;;  %v2936_v19 = vadd.f32 1.0, %v5071_v32  ;;  %v2915_v37 = vmul.f32 1.442695, %v2893_v50  ;;  %v6723_v3 = vadd.f32 %v6674_v57, %v2856_v4  ;;  %v4671_v14 = vadd.f32 %v2796_v17, %v6662_v49 }
 0x42d   : > { %v2935_v16 = vadd.f32 1.0, %v5073_v23  ;;  %5082 = vpow2.f32 %v2917_v0  ;;  %v2896_v42 = vsub.f32 0.0, %v6719_v21  ;;  %v2859_v5 = vmul.f32 %v4670_v1, %v6672_v60 }
 0x42e   : > { %5084 = vrcp.f32 %v2936_v19  ;;  %v2895_v35 = vsub.f32 0.0, %v6723_v3  ;;  %v2858_v25 = vmul.f32 %v4671_v14, %v6672_v60  ;;  %v4272_v20 = vpop.f32.mrb[12].mxu1 }
 0x42f   : > { %v5075_v38 = vpop.eup %5074  ;;  %5086 = vrcp.f32 %v2935_v16  ;;  %v2921_v34 = vmul.f32 1.442695, %v2896_v42  ;;  %v6731_v53 = vadd.f32 %v6674_v57, %v2859_v5  ;;  %v4672_v49 = vadd.f32 %v4272_v20, %v6664_v33  ;;  %v2806_v24 = vpop.f32.mrb[13].mxu1  ;;  %v5135_v5 = vld [vmem:[%s6137_s30] sm:$0xff] }
 0x430   : > { %v5077_v39 = vpop.eup %5076  ;;  %v2938_v15 = vadd.f32 1.0, %v5075_v38  ;;  %5088 = vpow2.f32 %v2915_v37  ;;  %v2919_v8 = vmul.f32 1.442695, %v2895_v35  ;;  %v6735_v29 = vadd.f32 %v6674_v57, %v2858_v25  ;;  %v5134_v37 = vld [vmem:[%s6137_s30 + $0x8] sm:$0xff] }
 0x431   : > { %v2937_v7 = vadd.f32 1.0, %v5077_v39  ;;  %5090 = vpow2.f32 %v2921_v34  ;;  %v2898_v44 = vsub.f32 0.0, %v6731_v53  ;;  %v2861_v56 = vmul.f32 %v4672_v49, %v6672_v60 }
 0x432   : > { %5092 = vrcp.f32 %v2938_v15  ;;  %v2897_v45 = vsub.f32 0.0, %v6735_v29  ;;  %v4673_v22 = vadd.f32 %v2806_v24, %v6666_v27  ;;  %v4275_v33 = vpop.f32.mrb[14].mxu1  ;;  %v5136_v24 = vld [vmem:[%s6137_s30 + $0x18] sm:$0xff] }
 0x433   : > { %v5079_v36 = vpop.eup %5078  ;;  %5094 = vrcp.f32 %v2937_v7  ;;  %v2925_v6 = vmul.f32 1.442695, %v2898_v44  ;;  %v6742_v47 = vadd.f32 %v6674_v57, %v2861_v56  ;;  %v4674_v63 = vadd.f32 %v4275_v33, %v6668_v61  ;;  %v2816_v58 = vpop.f32.mrb[15].mxu1  ;;  %v5137_v7 = vld [vmem:[%s6137_s30 + $0x10] sm:$0xff] }
 0x434   : > { %v5081_v10 = vpop.eup %5080  ;;  %v2940_v59 = vadd.f32 1.0, %v5079_v36  ;;  %5096 = vpow2.f32 %v2919_v8  ;;  %v2923_v12 = vmul.f32 1.442695, %v2897_v45  ;;  %v2860_v41 = vmul.f32 %v4673_v22, %v6672_v60  ;;  %v5138_v36 = vld [vmem:[%s6137_s30 + $0x28] sm:$0xff] }
 0x435   : > { %v2939_v40 = vadd.f32 1.0, %v5081_v10  ;;  %5098 = vpow2.f32 %v2925_v6  ;;  %v2900_v27 = vsub.f32 0.0, %v6742_v47  ;;  %v2863_v26 = vmul.f32 %v4674_v63, %v6672_v60  ;;  %v5139_v10 = vld [vmem:[%s6137_s30 + $0x20] sm:$0xff] }
 0x436   : > { %5100 = vrcp.f32 %v2940_v59  ;;  %v6749_v31 = vadd.f32 %v6674_v57, %v2860_v41  ;;  %v4675_v18 = vadd.f32 %v2816_v58, %v6670_v54 }
 0x437   : > { %v5083_v61 = vpop.eup %5082  ;;  %5102 = vrcp.f32 %v2939_v40  ;;  %v2929_v2 = vmul.f32 1.442695, %v2900_v27  ;;  %v6753_v62 = vadd.f32 %v6674_v57, %v2863_v26  ;;  %v5140_v40 = vld [vmem:[%s6137_s30 + $0x38] sm:$0xff] }
 0x438   : > { %v5085_v30 = vpop.eup %5084  ;;  %v2942_v52 = vadd.f32 1.0, %v5083_v61  ;;  %5104 = vpow2.f32 %v2923_v12  ;;  %v2899_v50 = vsub.f32 0.0, %v6749_v31  ;;  %v2862_v4 = vmul.f32 %v4675_v18, %v6672_v60 }
 0x439   : > { %v5087_v9 = vpop.eup %5086  ;;  %v2968_v32 = vmul.f32 %v5085_v30, %v6679_v43  ;;  %5106 = vpow2.f32 %v2929_v2  ;;  %v2902_v54 = vsub.f32 0.0, %v6753_v62 }
 0x43a   : > { %v5089_v0 = vpop.eup %5088  ;;  %v2967_v1 = vmul.f32 %v5087_v9, %v6682_v55  ;;  %5108 = vrcp.f32 %v2942_v52  ;;  %v2927_v17 = vmul.f32 1.442695, %v2899_v50  ;;  %v6761_v23 = vadd.f32 %v6674_v57, %v2862_v4  ;;  %v5141_v52 = vld [vmem:[%s6137_s30 + $0x30] sm:$0xff] }
 0x43b   : > { %v5091_v19 = vpop.eup %5090  ;;  %v2984_v14 = vadd.f32 %v5134_v37, %v2968_v32  ;;  %v2941_v60 = vadd.f32 1.0, %v5089_v0  ;;  %v2933_v16 = vmul.f32 1.442695, %v2902_v54  ;;  %v5142_v32 = vld [vmem:[%s6137_s30 + $0x48] sm:$0xff] }
 0x43c   : > { %v5093_v42 = vpop.eup %5092  ;;  %v2983_v43 = vadd.f32 %v5135_v5, %v2967_v1  ;;  %v2944_v35 = vadd.f32 1.0, %v5091_v19  ;;  %5110 = vpow2.f32 %v2927_v17  ;;  %v2901_v25 = vsub.f32 0.0, %v6761_v23  ;;  %v5143_v17 = vld [vmem:[%s6137_s30 + $0x40] sm:$0xff] }
 0x43d   : > { %v5095_v55 = vpop.eup %5094  ;;  %3000 = vst [vmem:[%s6768_s25 + $0x8] sm:$0xff] %v2984_v14  ;;  %v2970_v57 = vmul.f32 %v5093_v42, %v6689_v11  ;;  %5112 = vrcp.f32 %v2941_v60  ;;  %v5144_v14 = vld [vmem:[%s6137_s30 + $0x58] sm:$0xff] }
 0x43e   : > { %v5097_v20 = vpop.eup %5096  ;;  %2999 = vst [vmem:[%s6768_s25] sm:$0xff] %v2983_v43  ;;  %v2969_v38 = vmul.f32 %v5095_v55, %v6692_v28  ;;  %5114 = vrcp.f32 %v2944_v35  ;;  %v2931_v34 = vmul.f32 1.442695, %v2901_v25  ;;  %v5146_v35 = vld [vmem:[%s6137_s30 + $0x68] sm:$0xff] }
 0x43f   : > { %v5099_v49 = vpop.eup %5098  ;;  %v2986_v39 = vadd.f32 %v5136_v24, %v2970_v57  ;;  %v2943_v15 = vadd.f32 1.0, %v5097_v20  ;;  %5116 = vpow2.f32 %v2933_v16  ;;  %v5147_v57 = vld [vmem:[%s6137_s30 + $0x60] sm:$0xff] }
 0x440   : > { %v5101_v8 = vpop.eup %5100  ;;  %v2985_v44 = vadd.f32 %v5137_v7, %v2969_v38  ;;  %v2946_v11 = vadd.f32 1.0, %v5099_v49  ;;  %5118 = vpow2.f32 %v2931_v34  ;;  %v5148_v49 = vld [vmem:[%s6137_s30 + $0x78] sm:$0xff] }
 0x441   : > { %v5103_v56 = vpop.eup %5102  ;;  %3002 = vst [vmem:[%s6768_s25 + $0x18] sm:$0xff] %v2986_v39  ;;  %v2972_v28 = vmul.f32 %v5101_v8, %v6699_v46  ;;  %5120 = vrcp.f32 %v2943_v15 }
 0x442   : > { %v5105_v45 = vpop.eup %5104  ;;  %3001 = vst [vmem:[%s6768_s25 + $0x10] sm:$0xff] %v2985_v44  ;;  %v2971_v22 = vmul.f32 %v5103_v56, %v6702_v48  ;;  %5122 = vrcp.f32 %v2946_v11 }
 0x443   : > { %v5107_v33 = vpop.eup %5106  ;;  %v2988_v6 = vadd.f32 %v5138_v36, %v2972_v28  ;;  %v2945_v63 = vadd.f32 1.0, %v5105_v45 }
 0x444   : > { %v5109_v58 = vpop.eup %5108  ;;  %v2987_v59 = vadd.f32 %v5139_v10, %v2971_v22  ;;  %v2948_v12 = vadd.f32 1.0, %v5107_v33 }
 0x445   : > { %3004 = vst [vmem:[%s6768_s25 + $0x28] sm:$0xff] %v2988_v6  ;;  %v2974_v46 = vmul.f32 %v5109_v58, %v6709_v51  ;;  %5124 = vrcp.f32 %v2945_v63 }
 0x446   : > { %v5111_v41 = vpop.eup %5110  ;;  %3003 = vst [vmem:[%s6768_s25 + $0x20] sm:$0xff] %v2987_v59  ;;  %5126 = vrcp.f32 %v2948_v12 }
 0x447   : > { %v5113_v48 = vpop.eup %5112  ;;  %v2990_v27 = vadd.f32 %v5140_v40, %v2974_v46  ;;  %v2947_v26 = vadd.f32 1.0, %v5111_v41 }
 0x448   : > { %v5115_v18 = vpop.eup %5114  ;;  %v2973_v61 = vmul.f32 %v5113_v48, %v6712_v13 }
 0x449   : > { %v5117_v2 = vpop.eup %5116  ;;  %3006 = vst [vmem:[%s6768_s25 + $0x38] sm:$0xff] %v2990_v27  ;;  %v2976_v30 = vmul.f32 %v5115_v18, %v6719_v21  ;;  %5128 = vrcp.f32 %v2947_v26 }
 0x44a   : > { %v5119_v51 = vpop.eup %5118  ;;  %v2989_v50 = vadd.f32 %v5141_v52, %v2973_v61  ;;  %v2950_v4 = vadd.f32 1.0, %v5117_v2 }
 0x44b   : > { %v5121_v9 = vpop.eup %5120  ;;  %v2992_v54 = vadd.f32 %v5142_v32, %v2976_v30  ;;  %v2949_v0 = vadd.f32 1.0, %v5119_v51 }
 0x44c   : > { %v5123_v1 = vpop.eup %5122  ;;  %3005 = vst [vmem:[%s6768_s25 + $0x30] sm:$0xff] %v2989_v50  ;;  %v2975_v13 = vmul.f32 %v5121_v9, %v6723_v3  ;;  %5130 = vrcp.f32 %v2950_v4 }
 0x44d   : > { %3008 = vst [vmem:[%s6768_s25 + $0x48] sm:$0xff] %v2992_v54  ;;  %v2978_v21 = vmul.f32 %v5123_v1, %v6731_v53  ;;  %5132 = vrcp.f32 %v2949_v0  ;;  %v5145_v53 = vld [vmem:[%s6137_s30 + $0x50] sm:$0xff] }
 0x44e   : > { %v2991_v19 = vadd.f32 %v5143_v17, %v2975_v13 }
 0x44f   : > { %v5125_v37 = vpop.eup %5124  ;;  %v2994_v60 = vadd.f32 %v5144_v14, %v2978_v21 }
 0x450   : > { %v5127_v16 = vpop.eup %5126  ;;  %3007 = vst [vmem:[%s6768_s25 + $0x40] sm:$0xff] %v2991_v19  ;;  %v2977_v3 = vmul.f32 %v5125_v37, %v6735_v29 }
 0x451   : > { %3010 = vst [vmem:[%s6768_s25 + $0x58] sm:$0xff] %v2994_v60  ;;  %v2980_v42 = vmul.f32 %v5127_v16, %v6742_v47 }
 0x452   : > { %v2993_v5 = vadd.f32 %v5145_v53, %v2977_v3 }
 0x453   : > { %v5129_v43 = vpop.eup %5128  ;;  %v2996_v25 = vadd.f32 %v5146_v35, %v2980_v42 }
 0x454   : > { %3009 = vst [vmem:[%s6768_s25 + $0x50] sm:$0xff] %v2993_v5  ;;  %v2979_v55 = vmul.f32 %v5129_v43, %v6749_v31  ;;  %v5149_v31 = vld [vmem:[%s6137_s30 + $0x70] sm:$0xff] }
 0x455   : > { %3012 = vst [vmem:[%s6768_s25 + $0x68] sm:$0xff] %v2996_v25 }
 0x456   : > { %v5131_v29 = vpop.eup %5130  ;;  %v2995_v47 = vadd.f32 %v5147_v57, %v2979_v55 }
 0x457   : > { %v5133_v20 = vpop.eup %5132  ;;  %v2982_v38 = vmul.f32 %v5131_v29, %v6753_v62 }
 0x458   : > { %3011 = vst [vmem:[%s6768_s25 + $0x60] sm:$0xff] %v2995_v47  ;;  %v2981_v34 = vmul.f32 %v5133_v20, %v6761_v23 }
 0x459   : > { %v2998_v24 = vadd.f32 %v5148_v49, %v2982_v38 }
 0x45a   : > { %v2997_v39 = vadd.f32 %v5149_v31, %v2981_v34 }
 0x45b   : > { %3014 = vst [vmem:[%s6768_s25 + $0x78] sm:$0xff] %v2998_v24 }
 0x45c   : > { %3013 = vst [vmem:[%s6768_s25 + $0x70] sm:$0xff] %v2997_v39 }
 0x45d   : > { %5425 = shalt.err (!%p5422_p2)
}
 0x45e   : > { %s5426_s30 = scalar_lea.hbm %s6820_s11, 2048  ;;  %s5430_s12 = scalar_lea.hbm %s7024_s3, 8192 }
 0x45f   : > { %p5427_p6 = scmp.ne.s32.totalorder %s6820_s11, %s5426_s30  ;;  %p5431_p3 = scmp.lt.u32.totalorder %s6820_s11, %s7024_s3 }
 0x460   : > { %p5432_p9 = scmp.lt.u32.totalorder %s5430_s12, %s5426_s30  ;;  %p5434_p7 = scmp.lt.u32.totalorder %s5426_s30, %s6820_s11 }
 0x461   : > { %p5428_p8 = pnand %p5427_p6, %p7025_p12 }
 0x462   : > { %p5433_p11 = por %p5432_p9, %p5431_p3 }
 0x463   : > { %p5429_p4 = pneg %p5428_p8 }
 0x464   : > { %p5435_p13 = por %p5434_p7, %p5433_p11 }
 0x466   : > { %p5436_p1 = pnand %p5435_p13, %p5429_p4 }
 0x468   : > { %5439 = shalt.err (!%p5436_p1)
}
 0x469   : > { %s5593_s8 = smov 128   ;;  %s5594_s13 = smov 8  }
 0x46a   : > { %4818 = dma.vmem_to_hbm [thread:$0]  (%p7025_p12), %s6814_s24, 2048, %s6820_s11, %s3016_s18, %s5593_s8, %s5593_s8, %s5594_s13  }
 0x46b PF: > { %s7026_s9 = sld [smem:[#allocation30_spill]]  ;;  %p4866_p5 = scmp.ge.s32.totalorder %s5578_s22, 2 }
 0x46c   : > { %p7027_p10 = scmp.ne.s32.totalorder %s6986_s1, 0 }
 0x46e   : > { %p4850_p0 = pnand %p4866_p5, %p7027_p10 }
 0x471   : > { %s3047_s27 = sand.u32 1, %s7026_s9  }
 0x472   : > { %s3048_s16 = scalar_lea.sflag [#allocation5], %s3047_s27 }
 0x473   : > { %5521 = dma.done.wait (!%p4850_p0), %s3048_s16, 2048  }
 0x474   : > { %5523 = vsyncadd (!%p4850_p0), %s3048_s16, 4294965248  ;;  %s31_s22 = sadd.s32 1, %s5578_s22   ;;  %s7029_s30 = sld [smem:[#allocation27_spill]] }
 0x475   : > { %p6853_p2 = scmp.ge.s32.totalorder %s31_s22, 6   ;;  %s7030_s10 = sld [smem:[#allocation28_spill]] }
 0x476   : > { %s7031_s12 = sld [smem:[#allocation29_spill]]  ;;  %s7032_s15 = sld [smem:[#allocation31_spill]] }
 0x477   : > { %s7033_s29 = sld [smem:[#allocation35_spill]]  ;;  %s7034_s1 = sld [smem:[#allocation36_spill]] }
 0x478   : > { %s7035_s11 = smov %s7059_s0  ;;  %s7036_s13 = smov %s5546_s14 }
 0x479   : > { %s7037_s14 = smov %s5859_s5  ;;  %s7038_s16 = smov %s5558_s17 }
 0x47a   : > { %s7039_s17 = smov %s5979_s7  ;;  %s7040_s18 = smov %s5570_s20 }
 0x47b   : > { %s7041_s19 = smov %s5574_s21  ;;  %30 = sbr.rel (!%p6853_p2) target bundleno = 26 (0x1a), region = 160 }
 0x47d   : > { %s7042_s20 = smov %s7033_s29  ;;  %s7043_s21 = smov %s7034_s1 }
 0x482   :  { %3053 = vsyncpa [#allocation4], 1 }
 0x483   :  { %3055 = vsyncpa [#allocation4 + $0x1], 1 }
 0x484   :  { %3056 = vsyncpa [#allocation7], 1 }
 0x485   :  { %3058 = vsyncpa [#allocation7 + $0x1], 1 }
 0x486   :  { %3059 = vsyncpa [#allocation10], 1 }
 0x487   :  { %3060 = vsyncpa [#allocation13], 1 }
 0x488   :  { %3061 = vsyncpa [#allocation16], 1 }
 0x489   :  { %3062 = vsyncpa [#allocation5], 1 }
 0x48a   :  { %3064 = vsyncpa [#allocation5 + $0x1], 1 }

</bundles_post_ra>
